<compile_context>
chip_gen: v7x
topology: tpu7x:2x2x1
jax: 0.10.0
libtpu: 0.0.40
codegen_flags: <defaults>
</compile_context>

<pallas_src>
import functools

import numpy as np

import jax
import jax.numpy as jnp
from jax.experimental import pallas as pl
from jax.experimental.pallas import tpu as pltpu

_EPS = 1e-5  # InstanceNorm2d default eps


# --------------------------- small lane-group helpers ------------------------
def _sum_lane_groups(v, groups, gsize):
    """(R, groups*gsize) -> (R, gsize): sum over the `groups` lane groups."""
    while groups > 1:
        half = groups // 2
        lo = v[:, : half * gsize]
        hi = v[:, half * gsize : 2 * half * gsize]
        s = lo + hi
        if groups % 2 == 1:
            rest = v[:, 2 * half * gsize :]
            head = s[:, :gsize] + rest
            s = head if half == 1 else jnp.concatenate([head, s[:, gsize:]], axis=1)
        v, groups = s, half
    return v


def _tile_lane_groups(v, reps):
    """(R, gsize) -> (R, reps*gsize): tile along lanes via repeated doubling."""
    if reps == 1:
        return v
    gsize = v.shape[1]
    out, width = v, 1
    while width < reps:
        out = jnp.concatenate([out, out], axis=1)
        width *= 2
    return out[:, : reps * gsize]


# --------------------------------- kernel ------------------------------------
def _conv_block(pad_ref, b_ref, H, W, Cin, Cout):
    """Fused Conv3x3(pad=1) + InstanceNorm + ELU + MaxPool2d(2) for one block.

    pad_ref: (H+2, W*Cin) VMEM scratch; rows 0 and H+1 are zero, rows 1..H hold
             the block input with lane index = w*Cin + c.
    b_ref:   (3, W*Cin, W*Cout) banded conv weights (see _make_banded); output
             columns are even/odd de-interleaved.
    Returns (H//2, (W//2)*Cout) pooled+normalized+ELU output, lane = pw*Cout+o.
    """
    del Cin  # implicit in the banded weight shape
    H2, W2 = H // 2, W // 2
    half = W2 * Cout

    out_e = None  # conv output rows 0, 2, 4, ...  -> (H2, W*Cout)
    out_o = None  # conv output rows 1, 3, 5, ...
    for ky in range(3):
        rhs = b_ref[ky]                                        # (W*Cin, W*Cout)
        lhs_e = pad_ref[pl.ds(ky, H2, stride=2), :]            # rows ky, ky+2, ...
        lhs_o = pad_ref[pl.ds(ky + 1, H2, stride=2), :]        # rows ky+1, ky+3, ...
        pe = jnp.dot(lhs_e, rhs, preferred_element_type=jnp.float32)
        po = jnp.dot(lhs_o, rhs, preferred_element_type=jnp.float32)
        out_e = pe if out_e is None else out_e + pe
        out_o = po if out_o is None else out_o + po

    # InstanceNorm statistics over the full pre-pool conv output (two-pass).
    n = jnp.float32(H * W)
    col_sum = (jnp.sum(out_e, axis=0, keepdims=True)
               + jnp.sum(out_o, axis=0, keepdims=True))        # (1, W*Cout)
    mean_c = _sum_lane_groups(col_sum, W, Cout) / n            # (1, Cout)
    mean_full = _tile_lane_groups(mean_c, W)                   # (1, W*Cout)
    de = out_e - mean_full
    do = out_o - mean_full
    col_ssd = (jnp.sum(de * de, axis=0, keepdims=True)
               + jnp.sum(do * do, axis=0, keepdims=True))
    var_c = _sum_lane_groups(col_ssd, W, Cout) / n
    inv_c = jax.lax.rsqrt(var_c + _EPS)                        # (1, Cout)

    # MaxPool2d(2): vertical pair max, then horizontal pair max (columns are
    # already de-interleaved -> max of two contiguous lane slices).  Pooling
    # the raw conv output is valid: positive-scale norm + ELU are increasing.
    vmax = jnp.maximum(out_e, out_o)                           # (H2, W*Cout)
    pooled = jnp.maximum(vmax[:, :half], vmax[:, half:])       # (H2, W2*Cout)

    mean_p = mean_full[:, :half]                               # still channel-tiled
    inv_p = _tile_lane_groups(inv_c, W2)
    y = (pooled - mean_p) * inv_p                              # InstanceNorm (no affine)
    return jnp.where(y > 0, y, jnp.exp(jnp.minimum(y, 0.0)) - 1.0)  # ELU(alpha=1)


def _encoder_kernel(*refs, dims):
    """Whole 5-block encoder for one batch element (grid over batch)."""
    n_layers = len(dims)
    x_ref = refs[0]
    b_refs = refs[1:1 + n_layers]
    o_ref = refs[1 + n_layers]
    pad_refs = refs[2 + n_layers:]

    def stage(pad, H, data):
        # zero the two vertical-padding border rows, then write the data rows.
        z = jnp.zeros((1, pad.shape[1]), pad.dtype)
        pad[pl.ds(0, 1), :] = z
        pad[pl.ds(H + 1, 1), :] = z
        pad[pl.ds(1, H), :] = data

    stage(pad_refs[0], dims[0][0], x_ref[0])

    y = None
    for li, (H, W, Cin, Cout) in enumerate(dims):
        y = _conv_block(pad_refs[li], b_refs[li], H, W, Cin, Cout)
        if li + 1 < n_layers:
            stage(pad_refs[li + 1], dims[li + 1][0], y)
    o_ref[0] = y


# --------------------------- wrapper / weight prep ----------------------------
def _make_banded(w_hwio, W):
    """(3,3,Cin,Cout) HWIO conv weights -> (3, W*Cin, W*Cout) banded matrices.

    For each ky, B[ky] applies the width/channel part of the 3x3 conv with
    padding=1 to one flattened image row (lane index = w*Cin + c):
        out[col(v, o)] = sum_{u, c} row[u*Cin + c] * B[ky, u*Cin + c, col(v, o)]
    Output columns are permuted so all even output positions come first, then
    all odd ones (bakes the MaxPool horizontal de-interleave into the MXU).
    """
    Cin, Cout = int(w_hwio.shape[2]), int(w_hwio.shape[3])
    ws = np.concatenate([np.arange(0, W, 2), np.arange(1, W, 2)])  # permuted out cols
    sel = np.zeros((3, W, W), dtype=np.float32)
    cols = np.arange(W)
    for kx in range(3):
        wi = ws + kx - 1
        ok = (wi >= 0) & (wi < W)
        sel[kx, wi[ok], cols[ok]] = 1.0
    b = jnp.einsum("xuv,yxco->yucvo", jnp.asarray(sel), w_hwio.astype(jnp.float32))
    return b.reshape(3, W * Cin, W * Cout)


@jax.jit
def encoder_forward(x_nchw, params):
    """Fused Pallas encoder.  x_nchw: (B, C, H, W) like the PyTorch module.
    params: list of (w, b) with w in HWIO layout (3, 3, Cin, Cout).
    Conv biases are ignored: InstanceNorm cancels a per-channel constant."""
    B, C0, H0, W0 = x_nchw.shape
    x = jnp.transpose(x_nchw, (0, 2, 3, 1)).astype(jnp.float32)   # NHWC
    x = x.reshape(B, H0, W0 * C0)                                 # lane = w*C + c

    dims = []
    H, W, Cin = H0, W0, C0
    for (w, _b) in params:
        Cout = int(w.shape[-1])
        dims.append((H, W, Cin, Cout))
        H, W, Cin = H // 2, W // 2, Cout
    dims = tuple(dims)
    Hf, Wf, Cf = H, W, Cin

    banded = [_make_banded(w, d[1]) for (w, _b), d in zip(params, dims)]

    in_specs = [pl.BlockSpec((1, H0, W0 * C0), lambda bi: (bi, 0, 0))]
    for bm in banded:
        in_specs.append(pl.BlockSpec(bm.shape, lambda bi: (0, 0, 0)))
    scratch = [pltpu.VMEM((d[0] + 2, d[1] * d[2]), jnp.float32) for d in dims]

    out = pl.pallas_call(
        functools.partial(_encoder_kernel, dims=dims),
        out_shape=jax.ShapeDtypeStruct((B, Hf, Wf * Cf), jnp.float32),
        grid_spec=pltpu.PrefetchScalarGridSpec(
            num_scalar_prefetch=0,
            grid=(B,),
            in_specs=in_specs,
            out_specs=pl.BlockSpec((1, Hf, Wf * Cf), lambda bi: (bi, 0, 0)),
            scratch_shapes=scratch,
        ),
        compiler_params=pltpu.CompilerParams(dimension_semantics=("parallel",)),
    )(x, *banded)

    # back to NCHW ordering, then flatten(start_dim=1) to match torch.flatten
    out = out.reshape(B, Hf, Wf, Cf)
    out = jnp.transpose(out, (0, 3, 1, 2))
    return out.reshape(B, -1)


# ---------------- pure-JAX reference (for correctness check) ----------------
def _ref_block(x, w, b):
    y = jax.lax.conv_general_dilated(
        x, w, window_strides=(1, 1), padding=((1, 1), (1, 1)),
        dimension_numbers=("NHWC", "HWIO", "NHWC")) + b
    mean = jnp.mean(y, axis=(1, 2), keepdims=True)
    var = jnp.mean((y - mean) ** 2, axis=(1, 2), keepdims=True)
    y = (y - mean) * jax.lax.rsqrt(var + _EPS)
    y = jnp.where(y > 0, y, jnp.exp(jnp.minimum(y, 0.0)) - 1.0)
    y = jax.lax.reduce_window(y, -jnp.inf, jax.lax.max,
                              (1, 2, 2, 1), (1, 2, 2, 1), "VALID")
    return y


def encoder_ref(x_nchw, params):
    x = jnp.transpose(x_nchw, (0, 2, 3, 1)).astype(jnp.float32)
    for (w, b) in params:
        x = _ref_block(x, w, b)
    x = jnp.transpose(x, (0, 3, 1, 2))
    return x.reshape(x.shape[0], -1)


if __name__ == "__main__":
    B = 2
    x_dim = (4, 32, 32)          # (C, H, W); 32 survives 5 MaxPool(2) halvings -> 1x1
    hid_dim, z_dim = 8, 16
    channels = [x_dim[0], hid_dim, hid_dim, hid_dim, hid_dim, z_dim]

    key = jax.random.PRNGKey(0)
    params = []
    for i in range(5):
        key, kw, kb = jax.random.split(key, 3)
        cin, cout = channels[i], channels[i + 1]
        bound = 1.0 / (3.0 * (cin ** 0.5))   # ~ kaiming-uniform-ish scale
        w = jax.random.uniform(kw, (3, 3, cin, cout), jnp.float32, -bound, bound)
        bb = jax.random.uniform(kb, (cout,), jnp.float32, -bound, bound)
        params.append((w, bb))   # the bias is used by the reference only

    key, kx = jax.random.split(key)
    x = jax.random.normal(kx, (B,) + x_dim, jnp.float32)   # NCHW, like PyTorch

    z = jax.block_until_ready(encoder_forward(x, params))
    assert z.shape == (B, z_dim), z.shape

    z_ref = jax.block_until_ready(encoder_ref(x, params))
    err = float(jnp.max(jnp.abs(z - z_ref)))
    if err > 2e-3:
        raise AssertionError(f"Pallas encoder mismatch vs reference: max err {err}")

    print("KERNEL_OK")
</pallas_src>

<mosaic_0001>
module attributes {stable_mosaic.version = 11 : i64} {
  func.func @_encoder_kernel(%arg0: i32, %arg1: memref<1x32x128xf32, #tpu.memory_space<vmem>>, %arg2: memref<3x128x256xf32, #tpu.memory_space<vmem>>, %arg3: memref<3x128x128xf32, #tpu.memory_space<vmem>>, %arg4: memref<3x64x64xf32, #tpu.memory_space<vmem>>, %arg5: memref<3x32x32xf32, #tpu.memory_space<vmem>>, %arg6: memref<3x16x32xf32, #tpu.memory_space<vmem>>, %arg7: memref<1x1x16xf32, #tpu.memory_space<vmem>>, %arg8: memref<34x128xf32, #tpu.memory_space<vmem>>, %arg9: memref<18x128xf32, #tpu.memory_space<vmem>>, %arg10: memref<10x64xf32, #tpu.memory_space<vmem>>, %arg11: memref<6x32xf32, #tpu.memory_space<vmem>>, %arg12: memref<4x16xf32, #tpu.memory_space<vmem>>) attributes {dimension_semantics = [#tpu.dimension_semantics<parallel>], iteration_bounds = array<i64: 2>, scalar_prefetch = 0 : i64, scratch_operands = 5 : i64, tpu.core_type = #tpu.core_type<tc>, window_params = [{transform_indices = @transform_0, window_bounds = array<i64: 1, 32, 128>}, {pipeline_mode = #tpu.pipeline_mode<synchronous>, transform_indices = @transform_1, window_bounds = array<i64: 3, 128, 256>}, {pipeline_mode = #tpu.pipeline_mode<synchronous>, transform_indices = @transform_2, window_bounds = array<i64: 3, 128, 128>}, {pipeline_mode = #tpu.pipeline_mode<synchronous>, transform_indices = @transform_3, window_bounds = array<i64: 3, 64, 64>}, {pipeline_mode = #tpu.pipeline_mode<synchronous>, transform_indices = @transform_4, window_bounds = array<i64: 3, 32, 32>}, {pipeline_mode = #tpu.pipeline_mode<synchronous>, transform_indices = @transform_5, window_bounds = array<i64: 3, 16, 32>}, {transform_indices = @transform_6, window_bounds = array<i64: 1, 1, 16>}]} {
    %c0 = arith.constant 0 : index
    %c0_0 = arith.constant 0 : index
    %c0_1 = arith.constant 0 : index
    %0 = vector.load %arg1[%c0, %c0_0, %c0_1] : memref<1x32x128xf32, #tpu.memory_space<vmem>>, vector<1x32x128xf32>
    %1 = vector.shape_cast %0 : vector<1x32x128xf32> to vector<32x128xf32>
    %cst = arith.constant 0.000000e+00 : f32
    %2 = vector.broadcast %cst : f32 to vector<1x128xf32>
    %c0_2 = arith.constant 0 : index
    %c0_3 = arith.constant 0 : index
    %3 = vector.load %arg8[%c0_2, %c0_3] : memref<34x128xf32, #tpu.memory_space<vmem>>, vector<1x128xf32>
    tpu.vector_store %arg8[%c0_2, %c0_3], %2 {strides = array<i32>} : memref<34x128xf32, #tpu.memory_space<vmem>>, vector<1x128xf32>,
    %c33 = arith.constant 33 : index
    %c0_4 = arith.constant 0 : index
    %4 = vector.load %arg8[%c33, %c0_4] : memref<34x128xf32, #tpu.memory_space<vmem>>, vector<1x128xf32>
    tpu.vector_store %arg8[%c33, %c0_4], %2 {strides = array<i32>} : memref<34x128xf32, #tpu.memory_space<vmem>>, vector<1x128xf32>,
    %c1 = arith.constant 1 : index
    %c0_5 = arith.constant 0 : index
    %5 = vector.load %arg8[%c1, %c0_5] : memref<34x128xf32, #tpu.memory_space<vmem>>, vector<32x128xf32>
    tpu.vector_store %arg8[%c1, %c0_5], %1 {strides = array<i32>} : memref<34x128xf32, #tpu.memory_space<vmem>>, vector<32x128xf32>,
    %c0_6 = arith.constant 0 : index
    %c0_7 = arith.constant 0 : index
    %c0_8 = arith.constant 0 : index
    %6 = vector.load %arg2[%c0_6, %c0_7, %c0_8] : memref<3x128x256xf32, #tpu.memory_space<vmem>>, vector<1x128x256xf32>
    %7 = vector.shape_cast %6 : vector<1x128x256xf32> to vector<128x256xf32>
    %c0_9 = arith.constant 0 : index
    %c0_10 = arith.constant 0 : index
    %8 = tpu.strided_load %arg8[%c0_9, %c0_10] {strides = array<i32: 2, 1>} : memref<34x128xf32, #tpu.memory_space<vmem>>, vector<16x128xf32>
    %c1_11 = arith.constant 1 : index
    %c0_12 = arith.constant 0 : index
    %9 = tpu.strided_load %arg8[%c1_11, %c0_12] {strides = array<i32: 2, 1>} : memref<34x128xf32, #tpu.memory_space<vmem>>, vector<16x128xf32>
    %cst_13 = arith.constant dense<0.000000e+00> : vector<16x256xf32>
    %10 = tpu.matmul %8, %7, %cst_13 {dimension_numbers = #tpu.dot_dimension_numbers<[1], [0], [0], [1], [0, 0, 1, 1], [], []>} : vector<16x128xf32>, vector<128x256xf32>, vector<16x256xf32> -> vector<16x256xf32>
    %cst_14 = arith.constant dense<0.000000e+00> : vector<16x256xf32>
    %11 = tpu.matmul %9, %7, %cst_14 {dimension_numbers = #tpu.dot_dimension_numbers<[1], [0], [0], [1], [0, 0, 1, 1], [], []>} : vector<16x128xf32>, vector<128x256xf32>, vector<16x256xf32> -> vector<16x256xf32>
    %c1_15 = arith.constant 1 : index
    %c0_16 = arith.constant 0 : index
    %c0_17 = arith.constant 0 : index
    %12 = vector.load %arg2[%c1_15, %c0_16, %c0_17] : memref<3x128x256xf32, #tpu.memory_space<vmem>>, vector<1x128x256xf32>
    %13 = vector.shape_cast %12 : vector<1x128x256xf32> to vector<128x256xf32>
    %c1_18 = arith.constant 1 : index
    %c0_19 = arith.constant 0 : index
    %14 = tpu.strided_load %arg8[%c1_18, %c0_19] {strides = array<i32: 2, 1>} : memref<34x128xf32, #tpu.memory_space<vmem>>, vector<16x128xf32>
    %c2 = arith.constant 2 : index
    %c0_20 = arith.constant 0 : index
    %15 = tpu.strided_load %arg8[%c2, %c0_20] {strides = array<i32: 2, 1>} : memref<34x128xf32, #tpu.memory_space<vmem>>, vector<16x128xf32>
    %cst_21 = arith.constant dense<0.000000e+00> : vector<16x256xf32>
    %16 = tpu.matmul %14, %13, %cst_21 {dimension_numbers = #tpu.dot_dimension_numbers<[1], [0], [0], [1], [0, 0, 1, 1], [], []>} : vector<16x128xf32>, vector<128x256xf32>, vector<16x256xf32> -> vector<16x256xf32>
    %cst_22 = arith.constant dense<0.000000e+00> : vector<16x256xf32>
    %17 = tpu.matmul %15, %13, %cst_22 {dimension_numbers = #tpu.dot_dimension_numbers<[1], [0], [0], [1], [0, 0, 1, 1], [], []>} : vector<16x128xf32>, vector<128x256xf32>, vector<16x256xf32> -> vector<16x256xf32>
    %18 = arith.addf %10, %16 : vector<16x256xf32>
    %19 = arith.addf %11, %17 : vector<16x256xf32>
    %c2_23 = arith.constant 2 : index
    %c0_24 = arith.constant 0 : index
    %c0_25 = arith.constant 0 : index
    %20 = vector.load %arg2[%c2_23, %c0_24, %c0_25] : memref<3x128x256xf32, #tpu.memory_space<vmem>>, vector<1x128x256xf32>
    %21 = vector.shape_cast %20 : vector<1x128x256xf32> to vector<128x256xf32>
    %c2_26 = arith.constant 2 : index
    %c0_27 = arith.constant 0 : index
    %22 = tpu.strided_load %arg8[%c2_26, %c0_27] {strides = array<i32: 2, 1>} : memref<34x128xf32, #tpu.memory_space<vmem>>, vector<16x128xf32>
    %c3 = arith.constant 3 : index
    %c0_28 = arith.constant 0 : index
    %23 = tpu.strided_load %arg8[%c3, %c0_28] {strides = array<i32: 2, 1>} : memref<34x128xf32, #tpu.memory_space<vmem>>, vector<16x128xf32>
    %cst_29 = arith.constant dense<0.000000e+00> : vector<16x256xf32>
    %24 = tpu.matmul %22, %21, %cst_29 {dimension_numbers = #tpu.dot_dimension_numbers<[1], [0], [0], [1], [0, 0, 1, 1], [], []>} : vector<16x128xf32>, vector<128x256xf32>, vector<16x256xf32> -> vector<16x256xf32>
    %cst_30 = arith.constant dense<0.000000e+00> : vector<16x256xf32>
    %25 = tpu.matmul %23, %21, %cst_30 {dimension_numbers = #tpu.dot_dimension_numbers<[1], [0], [0], [1], [0, 0, 1, 1], [], []>} : vector<16x128xf32>, vector<128x256xf32>, vector<16x256xf32> -> vector<16x256xf32>
    %26 = arith.addf %18, %24 : vector<16x256xf32>
    %27 = arith.addf %19, %25 : vector<16x256xf32>
    %cst_31 = arith.constant dense<0.000000e+00> : vector<256xf32>
    %28 = vector.multi_reduction <add>, %26, %cst_31 [0] : vector<16x256xf32> to vector<256xf32>
    %29 = vector.shape_cast %28 : vector<256xf32> to vector<1x256xf32>
    %cst_32 = arith.constant dense<0.000000e+00> : vector<256xf32>
    %30 = vector.multi_reduction <add>, %27, %cst_32 [0] : vector<16x256xf32> to vector<256xf32>
    %31 = vector.shape_cast %30 : vector<256xf32> to vector<1x256xf32>
    %32 = arith.addf %29, %31 : vector<1x256xf32>
    %33 = vector.extract_strided_slice %32 {offsets = [0, 0], sizes = [1, 128], strides = [1, 1]} : vector<1x256xf32> to vector<1x128xf32>
    %34 = vector.extract_strided_slice %32 {offsets = [0, 128], sizes = [1, 128], strides = [1, 1]} : vector<1x256xf32> to vector<1x128xf32>
    %35 = arith.addf %33, %34 : vector<1x128xf32>
    %36 = vector.extract_strided_slice %35 {offsets = [0, 0], sizes = [1, 64], strides = [1, 1]} : vector<1x128xf32> to vector<1x64xf32>
    %37 = vector.extract_strided_slice %35 {offsets = [0, 64], sizes = [1, 64], strides = [1, 1]} : vector<1x128xf32> to vector<1x64xf32>
    %38 = arith.addf %36, %37 : vector<1x64xf32>
    %39 = vector.extract_strided_slice %38 {offsets = [0, 0], sizes = [1, 32], strides = [1, 1]} : vector<1x64xf32> to vector<1x32xf32>
    %40 = vector.extract_strided_slice %38 {offsets = [0, 32], sizes = [1, 32], strides = [1, 1]} : vector<1x64xf32> to vector<1x32xf32>
    %41 = arith.addf %39, %40 : vector<1x32xf32>
    %42 = vector.extract_strided_slice %41 {offsets = [0, 0], sizes = [1, 16], strides = [1, 1]} : vector<1x32xf32> to vector<1x16xf32>
    %43 = vector.extract_strided_slice %41 {offsets = [0, 16], sizes = [1, 16], strides = [1, 1]} : vector<1x32xf32> to vector<1x16xf32>
    %44 = arith.addf %42, %43 : vector<1x16xf32>
    %45 = vector.extract_strided_slice %44 {offsets = [0, 0], sizes = [1, 8], strides = [1, 1]} : vector<1x16xf32> to vector<1x8xf32>
    %46 = vector.extract_strided_slice %44 {offsets = [0, 8], sizes = [1, 8], strides = [1, 1]} : vector<1x16xf32> to vector<1x8xf32>
    %47 = arith.addf %45, %46 : vector<1x8xf32>
    %cst_33 = arith.constant 1.024000e+03 : f32
    %48 = vector.broadcast %cst_33 : f32 to vector<1x8xf32>
    %49 = arith.divf %47, %48 : vector<1x8xf32>
    %50 = tpu.concatenate %49, %49 in 1 : vector<1x8xf32>, vector<1x8xf32> -> vector<1x16xf32>
    %51 = tpu.concatenate %50, %50 in 1 : vector<1x16xf32>, vector<1x16xf32> -> vector<1x32xf32>
    %52 = tpu.concatenate %51, %51 in 1 : vector<1x32xf32>, vector<1x32xf32> -> vector<1x64xf32>
    %53 = tpu.concatenate %52, %52 in 1 : vector<1x64xf32>, vector<1x64xf32> -> vector<1x128xf32>
    %54 = tpu.concatenate %53, %53 in 1 : vector<1x128xf32>, vector<1x128xf32> -> vector<1x256xf32>
    %55 = vector.broadcast %54 : vector<1x256xf32> to vector<16x256xf32>
    %56 = arith.subf %26, %55 : vector<16x256xf32>
    %57 = vector.broadcast %54 : vector<1x256xf32> to vector<16x256xf32>
    %58 = arith.subf %27, %57 : vector<16x256xf32>
    %59 = arith.mulf %56, %56 : vector<16x256xf32>
    %cst_34 = arith.constant dense<0.000000e+00> : vector<256xf32>
    %60 = vector.multi_reduction <add>, %59, %cst_34 [0] : vector<16x256xf32> to vector<256xf32>
    %61 = vector.shape_cast %60 : vector<256xf32> to vector<1x256xf32>
    %62 = arith.mulf %58, %58 : vector<16x256xf32>
    %cst_35 = arith.constant dense<0.000000e+00> : vector<256xf32>
    %63 = vector.multi_reduction <add>, %62, %cst_35 [0] : vector<16x256xf32> to vector<256xf32>
    %64 = vector.shape_cast %63 : vector<256xf32> to vector<1x256xf32>
    %65 = arith.addf %61, %64 : vector<1x256xf32>
    %66 = vector.extract_strided_slice %65 {offsets = [0, 0], sizes = [1, 128], strides = [1, 1]} : vector<1x256xf32> to vector<1x128xf32>
    %67 = vector.extract_strided_slice %65 {offsets = [0, 128], sizes = [1, 128], strides = [1, 1]} : vector<1x256xf32> to vector<1x128xf32>
    %68 = arith.addf %66, %67 : vector<1x128xf32>
    %69 = vector.extract_strided_slice %68 {offsets = [0, 0], sizes = [1, 64], strides = [1, 1]} : vector<1x128xf32> to vector<1x64xf32>
    %70 = vector.extract_strided_slice %68 {offsets = [0, 64], sizes = [1, 64], strides = [1, 1]} : vector<1x128xf32> to vector<1x64xf32>
    %71 = arith.addf %69, %70 : vector<1x64xf32>
    %72 = vector.extract_strided_slice %71 {offsets = [0, 0], sizes = [1, 32], strides = [1, 1]} : vector<1x64xf32> to vector<1x32xf32>
    %73 = vector.extract_strided_slice %71 {offsets = [0, 32], sizes = [1, 32], strides = [1, 1]} : vector<1x64xf32> to vector<1x32xf32>
    %74 = arith.addf %72, %73 : vector<1x32xf32>
    %75 = vector.extract_strided_slice %74 {offsets = [0, 0], sizes = [1, 16], strides = [1, 1]} : vector<1x32xf32> to vector<1x16xf32>
    %76 = vector.extract_strided_slice %74 {offsets = [0, 16], sizes = [1, 16], strides = [1, 1]} : vector<1x32xf32> to vector<1x16xf32>
    %77 = arith.addf %75, %76 : vector<1x16xf32>
    %78 = vector.extract_strided_slice %77 {offsets = [0, 0], sizes = [1, 8], strides = [1, 1]} : vector<1x16xf32> to vector<1x8xf32>
    %79 = vector.extract_strided_slice %77 {offsets = [0, 8], sizes = [1, 8], strides = [1, 1]} : vector<1x16xf32> to vector<1x8xf32>
    %80 = arith.addf %78, %79 : vector<1x8xf32>
    %cst_36 = arith.constant 1.024000e+03 : f32
    %81 = vector.broadcast %cst_36 : f32 to vector<1x8xf32>
    %82 = arith.divf %80, %81 : vector<1x8xf32>
    %cst_37 = arith.constant 9.99999974E-6 : f32
    %83 = vector.broadcast %cst_37 : f32 to vector<1x8xf32>
    %84 = arith.addf %82, %83 : vector<1x8xf32>
    %85 = math.rsqrt %84 : vector<1x8xf32>
    %86 = arith.maximumf %26, %27 : vector<16x256xf32>
    %87 = vector.extract_strided_slice %86 {offsets = [0, 0], sizes = [16, 128], strides = [1, 1]} : vector<16x256xf32> to vector<16x128xf32>
    %88 = vector.extract_strided_slice %86 {offsets = [0, 128], sizes = [16, 128], strides = [1, 1]} : vector<16x256xf32> to vector<16x128xf32>
    %89 = arith.maximumf %87, %88 : vector<16x128xf32>
    %90 = vector.extract_strided_slice %54 {offsets = [0, 0], sizes = [1, 128], strides = [1, 1]} : vector<1x256xf32> to vector<1x128xf32>
    %91 = tpu.concatenate %85, %85 in 1 : vector<1x8xf32>, vector<1x8xf32> -> vector<1x16xf32>
    %92 = tpu.concatenate %91, %91 in 1 : vector<1x16xf32>, vector<1x16xf32> -> vector<1x32xf32>
    %93 = tpu.concatenate %92, %92 in 1 : vector<1x32xf32>, vector<1x32xf32> -> vector<1x64xf32>
    %94 = tpu.concatenate %93, %93 in 1 : vector<1x64xf32>, vector<1x64xf32> -> vector<1x128xf32>
    %95 = vector.broadcast %90 : vector<1x128xf32> to vector<16x128xf32>
    %96 = arith.subf %89, %95 : vector<16x128xf32>
    %97 = vector.broadcast %94 : vector<1x128xf32> to vector<16x128xf32>
    %98 = arith.mulf %96, %97 : vector<16x128xf32>
    %cst_38 = arith.constant 0.000000e+00 : f32
    %99 = vector.broadcast %cst_38 : f32 to vector<16x128xf32>
    %100 = arith.cmpf ogt, %98, %99 : vector<16x128xf32>
    %cst_39 = arith.constant 0.000000e+00 : f32
    %101 = vector.broadcast %cst_39 : f32 to vector<16x128xf32>
    %102 = arith.minimumf %98, %101 : vector<16x128xf32>
    %103 = math.exp %102 : vector<16x128xf32>
    %cst_40 = arith.constant 1.000000e+00 : f32
    %104 = vector.broadcast %cst_40 : f32 to vector<16x128xf32>
    %105 = arith.subf %103, %104 : vector<16x128xf32>
    %106 = arith.select %100, %98, %105 : vector<16x128xi1>, vector<16x128xf32>
    %cst_41 = arith.constant 0.000000e+00 : f32
    %107 = vector.broadcast %cst_41 : f32 to vector<1x128xf32>
    %c0_42 = arith.constant 0 : index
    %c0_43 = arith.constant 0 : index
    %108 = vector.load %arg9[%c0_42, %c0_43] : memref<18x128xf32, #tpu.memory_space<vmem>>, vector<1x128xf32>
    tpu.vector_store %arg9[%c0_42, %c0_43], %107 {strides = array<i32>} : memref<18x128xf32, #tpu.memory_space<vmem>>, vector<1x128xf32>,
    %c17 = arith.constant 17 : index
    %c0_44 = arith.constant 0 : index
    %109 = vector.load %arg9[%c17, %c0_44] : memref<18x128xf32, #tpu.memory_space<vmem>>, vector<1x128xf32>
    tpu.vector_store %arg9[%c17, %c0_44], %107 {strides = array<i32>} : memref<18x128xf32, #tpu.memory_space<vmem>>, vector<1x128xf32>,
    %c1_45 = arith.constant 1 : index
    %c0_46 = arith.constant 0 : index
    %110 = vector.load %arg9[%c1_45, %c0_46] : memref<18x128xf32, #tpu.memory_space<vmem>>, vector<16x128xf32>
    tpu.vector_store %arg9[%c1_45, %c0_46], %106 {strides = array<i32>} : memref<18x128xf32, #tpu.memory_space<vmem>>, vector<16x128xf32>,
    %c0_47 = arith.constant 0 : index
    %c0_48 = arith.constant 0 : index
    %c0_49 = arith.constant 0 : index
    %111 = vector.load %arg3[%c0_47, %c0_48, %c0_49] : memref<3x128x128xf32, #tpu.memory_space<vmem>>, vector<1x128x128xf32>
    %112 = vector.shape_cast %111 : vector<1x128x128xf32> to vector<128x128xf32>
    %c0_50 = arith.constant 0 : index
    %c0_51 = arith.constant 0 : index
    %113 = tpu.strided_load %arg9[%c0_50, %c0_51] {strides = array<i32: 2, 1>} : memref<18x128xf32, #tpu.memory_space<vmem>>, vector<8x128xf32>
    %c1_52 = arith.constant 1 : index
    %c0_53 = arith.constant 0 : index
    %114 = tpu.strided_load %arg9[%c1_52, %c0_53] {strides = array<i32: 2, 1>} : memref<18x128xf32, #tpu.memory_space<vmem>>, vector<8x128xf32>
    %cst_54 = arith.constant dense<0.000000e+00> : vector<8x128xf32>
    %115 = tpu.matmul %113, %112, %cst_54 {dimension_numbers = #tpu.dot_dimension_numbers<[1], [0], [0], [1], [0, 0, 1, 1], [], []>} : vector<8x128xf32>, vector<128x128xf32>, vector<8x128xf32> -> vector<8x128xf32>
    %cst_55 = arith.constant dense<0.000000e+00> : vector<8x128xf32>
    %116 = tpu.matmul %114, %112, %cst_55 {dimension_numbers = #tpu.dot_dimension_numbers<[1], [0], [0], [1], [0, 0, 1, 1], [], []>} : vector<8x128xf32>, vector<128x128xf32>, vector<8x128xf32> -> vector<8x128xf32>
    %c1_56 = arith.constant 1 : index
    %c0_57 = arith.constant 0 : index
    %c0_58 = arith.constant 0 : index
    %117 = vector.load %arg3[%c1_56, %c0_57, %c0_58] : memref<3x128x128xf32, #tpu.memory_space<vmem>>, vector<1x128x128xf32>
    %118 = vector.shape_cast %117 : vector<1x128x128xf32> to vector<128x128xf32>
    %c1_59 = arith.constant 1 : index
    %c0_60 = arith.constant 0 : index
    %119 = tpu.strided_load %arg9[%c1_59, %c0_60] {strides = array<i32: 2, 1>} : memref<18x128xf32, #tpu.memory_space<vmem>>, vector<8x128xf32>
    %c2_61 = arith.constant 2 : index
    %c0_62 = arith.constant 0 : index
    %120 = tpu.strided_load %arg9[%c2_61, %c0_62] {strides = array<i32: 2, 1>} : memref<18x128xf32, #tpu.memory_space<vmem>>, vector<8x128xf32>
    %cst_63 = arith.constant dense<0.000000e+00> : vector<8x128xf32>
    %121 = tpu.matmul %119, %118, %cst_63 {dimension_numbers = #tpu.dot_dimension_numbers<[1], [0], [0], [1], [0, 0, 1, 1], [], []>} : vector<8x128xf32>, vector<128x128xf32>, vector<8x128xf32> -> vector<8x128xf32>
    %cst_64 = arith.constant dense<0.000000e+00> : vector<8x128xf32>
    %122 = tpu.matmul %120, %118, %cst_64 {dimension_numbers = #tpu.dot_dimension_numbers<[1], [0], [0], [1], [0, 0, 1, 1], [], []>} : vector<8x128xf32>, vector<128x128xf32>, vector<8x128xf32> -> vector<8x128xf32>
    %123 = arith.addf %115, %121 : vector<8x128xf32>
    %124 = arith.addf %116, %122 : vector<8x128xf32>
    %c2_65 = arith.constant 2 : index
    %c0_66 = arith.constant 0 : index
    %c0_67 = arith.constant 0 : index
    %125 = vector.load %arg3[%c2_65, %c0_66, %c0_67] : memref<3x128x128xf32, #tpu.memory_space<vmem>>, vector<1x128x128xf32>
    %126 = vector.shape_cast %125 : vector<1x128x128xf32> to vector<128x128xf32>
    %c2_68 = arith.constant 2 : index
    %c0_69 = arith.constant 0 : index
    %127 = tpu.strided_load %arg9[%c2_68, %c0_69] {strides = array<i32: 2, 1>} : memref<18x128xf32, #tpu.memory_space<vmem>>, vector<8x128xf32>
    %c3_70 = arith.constant 3 : index
    %c0_71 = arith.constant 0 : index
    %128 = tpu.strided_load %arg9[%c3_70, %c0_71] {strides = array<i32: 2, 1>} : memref<18x128xf32, #tpu.memory_space<vmem>>, vector<8x128xf32>
    %cst_72 = arith.constant dense<0.000000e+00> : vector<8x128xf32>
    %129 = tpu.matmul %127, %126, %cst_72 {dimension_numbers = #tpu.dot_dimension_numbers<[1], [0], [0], [1], [0, 0, 1, 1], [], []>} : vector<8x128xf32>, vector<128x128xf32>, vector<8x128xf32> -> vector<8x128xf32>
    %cst_73 = arith.constant dense<0.000000e+00> : vector<8x128xf32>
    %130 = tpu.matmul %128, %126, %cst_73 {dimension_numbers = #tpu.dot_dimension_numbers<[1], [0], [0], [1], [0, 0, 1, 1], [], []>} : vector<8x128xf32>, vector<128x128xf32>, vector<8x128xf32> -> vector<8x128xf32>
    %131 = arith.addf %123, %129 : vector<8x128xf32>
    %132 = arith.addf %124, %130 : vector<8x128xf32>
    %cst_74 = arith.constant dense<0.000000e+00> : vector<128xf32>
    %133 = vector.multi_reduction <add>, %131, %cst_74 [0] : vector<8x128xf32> to vector<128xf32>
    %134 = vector.shape_cast %133 : vector<128xf32> to vector<1x128xf32>
    %cst_75 = arith.constant dense<0.000000e+00> : vector<128xf32>
    %135 = vector.multi_reduction <add>, %132, %cst_75 [0] : vector<8x128xf32> to vector<128xf32>
    %136 = vector.shape_cast %135 : vector<128xf32> to vector<1x128xf32>
    %137 = arith.addf %134, %136 : vector<1x128xf32>
    %138 = vector.extract_strided_slice %137 {offsets = [0, 0], sizes = [1, 64], strides = [1, 1]} : vector<1x128xf32> to vector<1x64xf32>
    %139 = vector.extract_strided_slice %137 {offsets = [0, 64], sizes = [1, 64], strides = [1, 1]} : vector<1x128xf32> to vector<1x64xf32>
    %140 = arith.addf %138, %139 : vector<1x64xf32>
    %141 = vector.extract_strided_slice %140 {offsets = [0, 0], sizes = [1, 32], strides = [1, 1]} : vector<1x64xf32> to vector<1x32xf32>
    %142 = vector.extract_strided_slice %140 {offsets = [0, 32], sizes = [1, 32], strides = [1, 1]} : vector<1x64xf32> to vector<1x32xf32>
    %143 = arith.addf %141, %142 : vector<1x32xf32>
    %144 = vector.extract_strided_slice %143 {offsets = [0, 0], sizes = [1, 16], strides = [1, 1]} : vector<1x32xf32> to vector<1x16xf32>
    %145 = vector.extract_strided_slice %143 {offsets = [0, 16], sizes = [1, 16], strides = [1, 1]} : vector<1x32xf32> to vector<1x16xf32>
    %146 = arith.addf %144, %145 : vector<1x16xf32>
    %147 = vector.extract_strided_slice %146 {offsets = [0, 0], sizes = [1, 8], strides = [1, 1]} : vector<1x16xf32> to vector<1x8xf32>
    %148 = vector.extract_strided_slice %146 {offsets = [0, 8], sizes = [1, 8], strides = [1, 1]} : vector<1x16xf32> to vector<1x8xf32>
    %149 = arith.addf %147, %148 : vector<1x8xf32>
    %cst_76 = arith.constant 2.560000e+02 : f32
    %150 = vector.broadcast %cst_76 : f32 to vector<1x8xf32>
    %151 = arith.divf %149, %150 : vector<1x8xf32>
    %152 = tpu.concatenate %151, %151 in 1 : vector<1x8xf32>, vector<1x8xf32> -> vector<1x16xf32>
    %153 = tpu.concatenate %152, %152 in 1 : vector<1x16xf32>, vector<1x16xf32> -> vector<1x32xf32>
    %154 = tpu.concatenate %153, %153 in 1 : vector<1x32xf32>, vector<1x32xf32> -> vector<1x64xf32>
    %155 = tpu.concatenate %154, %154 in 1 : vector<1x64xf32>, vector<1x64xf32> -> vector<1x128xf32>
    %156 = vector.broadcast %155 : vector<1x128xf32> to vector<8x128xf32>
    %157 = arith.subf %131, %156 : vector<8x128xf32>
    %158 = vector.broadcast %155 : vector<1x128xf32> to vector<8x128xf32>
    %159 = arith.subf %132, %158 : vector<8x128xf32>
    %160 = arith.mulf %157, %157 : vector<8x128xf32>
    %cst_77 = arith.constant dense<0.000000e+00> : vector<128xf32>
    %161 = vector.multi_reduction <add>, %160, %cst_77 [0] : vector<8x128xf32> to vector<128xf32>
    %162 = vector.shape_cast %161 : vector<128xf32> to vector<1x128xf32>
    %163 = arith.mulf %159, %159 : vector<8x128xf32>
    %cst_78 = arith.constant dense<0.000000e+00> : vector<128xf32>
    %164 = vector.multi_reduction <add>, %163, %cst_78 [0] : vector<8x128xf32> to vector<128xf32>
    %165 = vector.shape_cast %164 : vector<128xf32> to vector<1x128xf32>
    %166 = arith.addf %162, %165 : vector<1x128xf32>
    %167 = vector.extract_strided_slice %166 {offsets = [0, 0], sizes = [1, 64], strides = [1, 1]} : vector<1x128xf32> to vector<1x64xf32>
    %168 = vector.extract_strided_slice %166 {offsets = [0, 64], sizes = [1, 64], strides = [1, 1]} : vector<1x128xf32> to vector<1x64xf32>
    %169 = arith.addf %167, %168 : vector<1x64xf32>
    %170 = vector.extract_strided_slice %169 {offsets = [0, 0], sizes = [1, 32], strides = [1, 1]} : vector<1x64xf32> to vector<1x32xf32>
    %171 = vector.extract_strided_slice %169 {offsets = [0, 32], sizes = [1, 32], strides = [1, 1]} : vector<1x64xf32> to vector<1x32xf32>
    %172 = arith.addf %170, %171 : vector<1x32xf32>
    %173 = vector.extract_strided_slice %172 {offsets = [0, 0], sizes = [1, 16], strides = [1, 1]} : vector<1x32xf32> to vector<1x16xf32>
    %174 = vector.extract_strided_slice %172 {offsets = [0, 16], sizes = [1, 16], strides = [1, 1]} : vector<1x32xf32> to vector<1x16xf32>
    %175 = arith.addf %173, %174 : vector<1x16xf32>
    %176 = vector.extract_strided_slice %175 {offsets = [0, 0], sizes = [1, 8], strides = [1, 1]} : vector<1x16xf32> to vector<1x8xf32>
    %177 = vector.extract_strided_slice %175 {offsets = [0, 8], sizes = [1, 8], strides = [1, 1]} : vector<1x16xf32> to vector<1x8xf32>
    %178 = arith.addf %176, %177 : vector<1x8xf32>
    %cst_79 = arith.constant 2.560000e+02 : f32
    %179 = vector.broadcast %cst_79 : f32 to vector<1x8xf32>
    %180 = arith.divf %178, %179 : vector<1x8xf32>
    %cst_80 = arith.constant 9.99999974E-6 : f32
    %181 = vector.broadcast %cst_80 : f32 to vector<1x8xf32>
    %182 = arith.addf %180, %181 : vector<1x8xf32>
    %183 = math.rsqrt %182 : vector<1x8xf32>
    %184 = arith.maximumf %131, %132 : vector<8x128xf32>
    %185 = vector.extract_strided_slice %184 {offsets = [0, 0], sizes = [8, 64], strides = [1, 1]} : vector<8x128xf32> to vector<8x64xf32>
    %186 = vector.extract_strided_slice %184 {offsets = [0, 64], sizes = [8, 64], strides = [1, 1]} : vector<8x128xf32> to vector<8x64xf32>
    %187 = arith.maximumf %185, %186 : vector<8x64xf32>
    %188 = vector.extract_strided_slice %155 {offsets = [0, 0], sizes = [1, 64], strides = [1, 1]} : vector<1x128xf32> to vector<1x64xf32>
    %189 = tpu.concatenate %183, %183 in 1 : vector<1x8xf32>, vector<1x8xf32> -> vector<1x16xf32>
    %190 = tpu.concatenate %189, %189 in 1 : vector<1x16xf32>, vector<1x16xf32> -> vector<1x32xf32>
    %191 = tpu.concatenate %190, %190 in 1 : vector<1x32xf32>, vector<1x32xf32> -> vector<1x64xf32>
    %192 = vector.broadcast %188 : vector<1x64xf32> to vector<8x64xf32>
    %193 = arith.subf %187, %192 : vector<8x64xf32>
    %194 = vector.broadcast %191 : vector<1x64xf32> to vector<8x64xf32>
    %195 = arith.mulf %193, %194 : vector<8x64xf32>
    %cst_81 = arith.constant 0.000000e+00 : f32
    %196 = vector.broadcast %cst_81 : f32 to vector<8x64xf32>
    %197 = arith.cmpf ogt, %195, %196 : vector<8x64xf32>
    %cst_82 = arith.constant 0.000000e+00 : f32
    %198 = vector.broadcast %cst_82 : f32 to vector<8x64xf32>
    %199 = arith.minimumf %195, %198 : vector<8x64xf32>
    %200 = math.exp %199 : vector<8x64xf32>
    %cst_83 = arith.constant 1.000000e+00 : f32
    %201 = vector.broadcast %cst_83 : f32 to vector<8x64xf32>
    %202 = arith.subf %200, %201 : vector<8x64xf32>
    %203 = arith.select %197, %195, %202 : vector<8x64xi1>, vector<8x64xf32>
    %cst_84 = arith.constant 0.000000e+00 : f32
    %204 = vector.broadcast %cst_84 : f32 to vector<1x64xf32>
    %c0_85 = arith.constant 0 : index
    %c0_86 = arith.constant 0 : index
    %205 = vector.load %arg10[%c0_85, %c0_86] : memref<10x64xf32, #tpu.memory_space<vmem>>, vector<1x64xf32>
    tpu.vector_store %arg10[%c0_85, %c0_86], %204 {strides = array<i32>} : memref<10x64xf32, #tpu.memory_space<vmem>>, vector<1x64xf32>,
    %c9 = arith.constant 9 : index
    %c0_87 = arith.constant 0 : index
    %206 = vector.load %arg10[%c9, %c0_87] : memref<10x64xf32, #tpu.memory_space<vmem>>, vector<1x64xf32>
    tpu.vector_store %arg10[%c9, %c0_87], %204 {strides = array<i32>} : memref<10x64xf32, #tpu.memory_space<vmem>>, vector<1x64xf32>,
    %c1_88 = arith.constant 1 : index
    %c0_89 = arith.constant 0 : index
    %207 = vector.load %arg10[%c1_88, %c0_89] : memref<10x64xf32, #tpu.memory_space<vmem>>, vector<8x64xf32>
    tpu.vector_store %arg10[%c1_88, %c0_89], %203 {strides = array<i32>} : memref<10x64xf32, #tpu.memory_space<vmem>>, vector<8x64xf32>,
    %c0_90 = arith.constant 0 : index
    %c0_91 = arith.constant 0 : index
    %c0_92 = arith.constant 0 : index
    %208 = vector.load %arg4[%c0_90, %c0_91, %c0_92] : memref<3x64x64xf32, #tpu.memory_space<vmem>>, vector<1x64x64xf32>
    %209 = vector.shape_cast %208 : vector<1x64x64xf32> to vector<64x64xf32>
    %c0_93 = arith.constant 0 : index
    %c0_94 = arith.constant 0 : index
    %210 = tpu.strided_load %arg10[%c0_93, %c0_94] {strides = array<i32: 2, 1>} : memref<10x64xf32, #tpu.memory_space<vmem>>, vector<4x64xf32>
    %c1_95 = arith.constant 1 : index
    %c0_96 = arith.constant 0 : index
    %211 = tpu.strided_load %arg10[%c1_95, %c0_96] {strides = array<i32: 2, 1>} : memref<10x64xf32, #tpu.memory_space<vmem>>, vector<4x64xf32>
    %cst_97 = arith.constant dense<0.000000e+00> : vector<4x64xf32>
    %212 = tpu.matmul %210, %209, %cst_97 {dimension_numbers = #tpu.dot_dimension_numbers<[1], [0], [0], [1], [0, 0, 1, 1], [], []>} : vector<4x64xf32>, vector<64x64xf32>, vector<4x64xf32> -> vector<4x64xf32>
    %cst_98 = arith.constant dense<0.000000e+00> : vector<4x64xf32>
    %213 = tpu.matmul %211, %209, %cst_98 {dimension_numbers = #tpu.dot_dimension_numbers<[1], [0], [0], [1], [0, 0, 1, 1], [], []>} : vector<4x64xf32>, vector<64x64xf32>, vector<4x64xf32> -> vector<4x64xf32>
    %c1_99 = arith.constant 1 : index
    %c0_100 = arith.constant 0 : index
    %c0_101 = arith.constant 0 : index
    %214 = vector.load %arg4[%c1_99, %c0_100, %c0_101] : memref<3x64x64xf32, #tpu.memory_space<vmem>>, vector<1x64x64xf32>
    %215 = vector.shape_cast %214 : vector<1x64x64xf32> to vector<64x64xf32>
    %c1_102 = arith.constant 1 : index
    %c0_103 = arith.constant 0 : index
    %216 = tpu.strided_load %arg10[%c1_102, %c0_103] {strides = array<i32: 2, 1>} : memref<10x64xf32, #tpu.memory_space<vmem>>, vector<4x64xf32>
    %c2_104 = arith.constant 2 : index
    %c0_105 = arith.constant 0 : index
    %217 = tpu.strided_load %arg10[%c2_104, %c0_105] {strides = array<i32: 2, 1>} : memref<10x64xf32, #tpu.memory_space<vmem>>, vector<4x64xf32>
    %cst_106 = arith.constant dense<0.000000e+00> : vector<4x64xf32>
    %218 = tpu.matmul %216, %215, %cst_106 {dimension_numbers = #tpu.dot_dimension_numbers<[1], [0], [0], [1], [0, 0, 1, 1], [], []>} : vector<4x64xf32>, vector<64x64xf32>, vector<4x64xf32> -> vector<4x64xf32>
    %cst_107 = arith.constant dense<0.000000e+00> : vector<4x64xf32>
    %219 = tpu.matmul %217, %215, %cst_107 {dimension_numbers = #tpu.dot_dimension_numbers<[1], [0], [0], [1], [0, 0, 1, 1], [], []>} : vector<4x64xf32>, vector<64x64xf32>, vector<4x64xf32> -> vector<4x64xf32>
    %220 = arith.addf %212, %218 : vector<4x64xf32>
    %221 = arith.addf %213, %219 : vector<4x64xf32>
    %c2_108 = arith.constant 2 : index
    %c0_109 = arith.constant 0 : index
    %c0_110 = arith.constant 0 : index
    %222 = vector.load %arg4[%c2_108, %c0_109, %c0_110] : memref<3x64x64xf32, #tpu.memory_space<vmem>>, vector<1x64x64xf32>
    %223 = vector.shape_cast %222 : vector<1x64x64xf32> to vector<64x64xf32>
    %c2_111 = arith.constant 2 : index
    %c0_112 = arith.constant 0 : index
    %224 = tpu.strided_load %arg10[%c2_111, %c0_112] {strides = array<i32: 2, 1>} : memref<10x64xf32, #tpu.memory_space<vmem>>, vector<4x64xf32>
    %c3_113 = arith.constant 3 : index
    %c0_114 = arith.constant 0 : index
    %225 = tpu.strided_load %arg10[%c3_113, %c0_114] {strides = array<i32: 2, 1>} : memref<10x64xf32, #tpu.memory_space<vmem>>, vector<4x64xf32>
    %cst_115 = arith.constant dense<0.000000e+00> : vector<4x64xf32>
    %226 = tpu.matmul %224, %223, %cst_115 {dimension_numbers = #tpu.dot_dimension_numbers<[1], [0], [0], [1], [0, 0, 1, 1], [], []>} : vector<4x64xf32>, vector<64x64xf32>, vector<4x64xf32> -> vector<4x64xf32>
    %cst_116 = arith.constant dense<0.000000e+00> : vector<4x64xf32>
    %227 = tpu.matmul %225, %223, %cst_116 {dimension_numbers = #tpu.dot_dimension_numbers<[1], [0], [0], [1], [0, 0, 1, 1], [], []>} : vector<4x64xf32>, vector<64x64xf32>, vector<4x64xf32> -> vector<4x64xf32>
    %228 = arith.addf %220, %226 : vector<4x64xf32>
    %229 = arith.addf %221, %227 : vector<4x64xf32>
    %cst_117 = arith.constant dense<0.000000e+00> : vector<64xf32>
    %230 = vector.multi_reduction <add>, %228, %cst_117 [0] : vector<4x64xf32> to vector<64xf32>
    %231 = vector.shape_cast %230 : vector<64xf32> to vector<1x64xf32>
    %cst_118 = arith.constant dense<0.000000e+00> : vector<64xf32>
    %232 = vector.multi_reduction <add>, %229, %cst_118 [0] : vector<4x64xf32> to vector<64xf32>
    %233 = vector.shape_cast %232 : vector<64xf32> to vector<1x64xf32>
    %234 = arith.addf %231, %233 : vector<1x64xf32>
    %235 = vector.extract_strided_slice %234 {offsets = [0, 0], sizes = [1, 32], strides = [1, 1]} : vector<1x64xf32> to vector<1x32xf32>
    %236 = vector.extract_strided_slice %234 {offsets = [0, 32], sizes = [1, 32], strides = [1, 1]} : vector<1x64xf32> to vector<1x32xf32>
    %237 = arith.addf %235, %236 : vector<1x32xf32>
    %238 = vector.extract_strided_slice %237 {offsets = [0, 0], sizes = [1, 16], strides = [1, 1]} : vector<1x32xf32> to vector<1x16xf32>
    %239 = vector.extract_strided_slice %237 {offsets = [0, 16], sizes = [1, 16], strides = [1, 1]} : vector<1x32xf32> to vector<1x16xf32>
    %240 = arith.addf %238, %239 : vector<1x16xf32>
    %241 = vector.extract_strided_slice %240 {offsets = [0, 0], sizes = [1, 8], strides = [1, 1]} : vector<1x16xf32> to vector<1x8xf32>
    %242 = vector.extract_strided_slice %240 {offsets = [0, 8], sizes = [1, 8], strides = [1, 1]} : vector<1x16xf32> to vector<1x8xf32>
    %243 = arith.addf %241, %242 : vector<1x8xf32>
    %cst_119 = arith.constant 6.400000e+01 : f32
    %244 = vector.broadcast %cst_119 : f32 to vector<1x8xf32>
    %245 = arith.divf %243, %244 : vector<1x8xf32>
    %246 = tpu.concatenate %245, %245 in 1 : vector<1x8xf32>, vector<1x8xf32> -> vector<1x16xf32>
    %247 = tpu.concatenate %246, %246 in 1 : vector<1x16xf32>, vector<1x16xf32> -> vector<1x32xf32>
    %248 = tpu.concatenate %247, %247 in 1 : vector<1x32xf32>, vector<1x32xf32> -> vector<1x64xf32>
    %249 = vector.broadcast %248 : vector<1x64xf32> to vector<4x64xf32>
    %250 = arith.subf %228, %249 : vector<4x64xf32>
    %251 = vector.broadcast %248 : vector<1x64xf32> to vector<4x64xf32>
    %252 = arith.subf %229, %251 : vector<4x64xf32>
    %253 = arith.mulf %250, %250 : vector<4x64xf32>
    %cst_120 = arith.constant dense<0.000000e+00> : vector<64xf32>
    %254 = vector.multi_reduction <add>, %253, %cst_120 [0] : vector<4x64xf32> to vector<64xf32>
    %255 = vector.shape_cast %254 : vector<64xf32> to vector<1x64xf32>
    %256 = arith.mulf %252, %252 : vector<4x64xf32>
    %cst_121 = arith.constant dense<0.000000e+00> : vector<64xf32>
    %257 = vector.multi_reduction <add>, %256, %cst_121 [0] : vector<4x64xf32> to vector<64xf32>
    %258 = vector.shape_cast %257 : vector<64xf32> to vector<1x64xf32>
    %259 = arith.addf %255, %258 : vector<1x64xf32>
    %260 = vector.extract_strided_slice %259 {offsets = [0, 0], sizes = [1, 32], strides = [1, 1]} : vector<1x64xf32> to vector<1x32xf32>
    %261 = vector.extract_strided_slice %259 {offsets = [0, 32], sizes = [1, 32], strides = [1, 1]} : vector<1x64xf32> to vector<1x32xf32>
    %262 = arith.addf %260, %261 : vector<1x32xf32>
    %263 = vector.extract_strided_slice %262 {offsets = [0, 0], sizes = [1, 16], strides = [1, 1]} : vector<1x32xf32> to vector<1x16xf32>
    %264 = vector.extract_strided_slice %262 {offsets = [0, 16], sizes = [1, 16], strides = [1, 1]} : vector<1x32xf32> to vector<1x16xf32>
    %265 = arith.addf %263, %264 : vector<1x16xf32>
    %266 = vector.extract_strided_slice %265 {offsets = [0, 0], sizes = [1, 8], strides = [1, 1]} : vector<1x16xf32> to vector<1x8xf32>
    %267 = vector.extract_strided_slice %265 {offsets = [0, 8], sizes = [1, 8], strides = [1, 1]} : vector<1x16xf32> to vector<1x8xf32>
    %268 = arith.addf %266, %267 : vector<1x8xf32>
    %cst_122 = arith.constant 6.400000e+01 : f32
    %269 = vector.broadcast %cst_122 : f32 to vector<1x8xf32>
    %270 = arith.divf %268, %269 : vector<1x8xf32>
    %cst_123 = arith.constant 9.99999974E-6 : f32
    %271 = vector.broadcast %cst_123 : f32 to vector<1x8xf32>
    %272 = arith.addf %270, %271 : vector<1x8xf32>
    %273 = math.rsqrt %272 : vector<1x8xf32>
    %274 = arith.maximumf %228, %229 : vector<4x64xf32>
    %275 = vector.extract_strided_slice %274 {offsets = [0, 0], sizes = [4, 32], strides = [1, 1]} : vector<4x64xf32> to vector<4x32xf32>
    %276 = vector.extract_strided_slice %274 {offsets = [0, 32], sizes = [4, 32], strides = [1, 1]} : vector<4x64xf32> to vector<4x32xf32>
    %277 = arith.maximumf %275, %276 : vector<4x32xf32>
    %278 = vector.extract_strided_slice %248 {offsets = [0, 0], sizes = [1, 32], strides = [1, 1]} : vector<1x64xf32> to vector<1x32xf32>
    %279 = tpu.concatenate %273, %273 in 1 : vector<1x8xf32>, vector<1x8xf32> -> vector<1x16xf32>
    %280 = tpu.concatenate %279, %279 in 1 : vector<1x16xf32>, vector<1x16xf32> -> vector<1x32xf32>
    %281 = vector.broadcast %278 : vector<1x32xf32> to vector<4x32xf32>
    %282 = arith.subf %277, %281 : vector<4x32xf32>
    %283 = vector.broadcast %280 : vector<1x32xf32> to vector<4x32xf32>
    %284 = arith.mulf %282, %283 : vector<4x32xf32>
    %cst_124 = arith.constant 0.000000e+00 : f32
    %285 = vector.broadcast %cst_124 : f32 to vector<4x32xf32>
    %286 = arith.cmpf ogt, %284, %285 : vector<4x32xf32>
    %cst_125 = arith.constant 0.000000e+00 : f32
    %287 = vector.broadcast %cst_125 : f32 to vector<4x32xf32>
    %288 = arith.minimumf %284, %287 : vector<4x32xf32>
    %289 = math.exp %288 : vector<4x32xf32>
    %cst_126 = arith.constant 1.000000e+00 : f32
    %290 = vector.broadcast %cst_126 : f32 to vector<4x32xf32>
    %291 = arith.subf %289, %290 : vector<4x32xf32>
    %292 = arith.select %286, %284, %291 : vector<4x32xi1>, vector<4x32xf32>
    %cst_127 = arith.constant 0.000000e+00 : f32
    %293 = vector.broadcast %cst_127 : f32 to vector<1x32xf32>
    %c0_128 = arith.constant 0 : index
    %c0_129 = arith.constant 0 : index
    %294 = vector.load %arg11[%c0_128, %c0_129] : memref<6x32xf32, #tpu.memory_space<vmem>>, vector<1x32xf32>
    tpu.vector_store %arg11[%c0_128, %c0_129], %293 {strides = array<i32>} : memref<6x32xf32, #tpu.memory_space<vmem>>, vector<1x32xf32>,
    %c5 = arith.constant 5 : index
    %c0_130 = arith.constant 0 : index
    %295 = vector.load %arg11[%c5, %c0_130] : memref<6x32xf32, #tpu.memory_space<vmem>>, vector<1x32xf32>
    tpu.vector_store %arg11[%c5, %c0_130], %293 {strides = array<i32>} : memref<6x32xf32, #tpu.memory_space<vmem>>, vector<1x32xf32>,
    %c1_131 = arith.constant 1 : index
    %c0_132 = arith.constant 0 : index
    %296 = vector.load %arg11[%c1_131, %c0_132] : memref<6x32xf32, #tpu.memory_space<vmem>>, vector<4x32xf32>
    tpu.vector_store %arg11[%c1_131, %c0_132], %292 {strides = array<i32>} : memref<6x32xf32, #tpu.memory_space<vmem>>, vector<4x32xf32>,
    %c0_133 = arith.constant 0 : index
    %c0_134 = arith.constant 0 : index
    %c0_135 = arith.constant 0 : index
    %297 = vector.load %arg5[%c0_133, %c0_134, %c0_135] : memref<3x32x32xf32, #tpu.memory_space<vmem>>, vector<1x32x32xf32>
    %298 = vector.shape_cast %297 : vector<1x32x32xf32> to vector<32x32xf32>
    %c0_136 = arith.constant 0 : index
    %c0_137 = arith.constant 0 : index
    %299 = tpu.strided_load %arg11[%c0_136, %c0_137] {strides = array<i32: 2, 1>} : memref<6x32xf32, #tpu.memory_space<vmem>>, vector<2x32xf32>
    %c1_138 = arith.constant 1 : index
    %c0_139 = arith.constant 0 : index
    %300 = tpu.strided_load %arg11[%c1_138, %c0_139] {strides = array<i32: 2, 1>} : memref<6x32xf32, #tpu.memory_space<vmem>>, vector<2x32xf32>
    %cst_140 = arith.constant dense<0.000000e+00> : vector<2x32xf32>
    %301 = tpu.matmul %299, %298, %cst_140 {dimension_numbers = #tpu.dot_dimension_numbers<[1], [0], [0], [1], [0, 0, 1, 1], [], []>} : vector<2x32xf32>, vector<32x32xf32>, vector<2x32xf32> -> vector<2x32xf32>
    %cst_141 = arith.constant dense<0.000000e+00> : vector<2x32xf32>
    %302 = tpu.matmul %300, %298, %cst_141 {dimension_numbers = #tpu.dot_dimension_numbers<[1], [0], [0], [1], [0, 0, 1, 1], [], []>} : vector<2x32xf32>, vector<32x32xf32>, vector<2x32xf32> -> vector<2x32xf32>
    %c1_142 = arith.constant 1 : index
    %c0_143 = arith.constant 0 : index
    %c0_144 = arith.constant 0 : index
    %303 = vector.load %arg5[%c1_142, %c0_143, %c0_144] : memref<3x32x32xf32, #tpu.memory_space<vmem>>, vector<1x32x32xf32>
    %304 = vector.shape_cast %303 : vector<1x32x32xf32> to vector<32x32xf32>
    %c1_145 = arith.constant 1 : index
    %c0_146 = arith.constant 0 : index
    %305 = tpu.strided_load %arg11[%c1_145, %c0_146] {strides = array<i32: 2, 1>} : memref<6x32xf32, #tpu.memory_space<vmem>>, vector<2x32xf32>
    %c2_147 = arith.constant 2 : index
    %c0_148 = arith.constant 0 : index
    %306 = tpu.strided_load %arg11[%c2_147, %c0_148] {strides = array<i32: 2, 1>} : memref<6x32xf32, #tpu.memory_space<vmem>>, vector<2x32xf32>
    %cst_149 = arith.constant dense<0.000000e+00> : vector<2x32xf32>
    %307 = tpu.matmul %305, %304, %cst_149 {dimension_numbers = #tpu.dot_dimension_numbers<[1], [0], [0], [1], [0, 0, 1, 1], [], []>} : vector<2x32xf32>, vector<32x32xf32>, vector<2x32xf32> -> vector<2x32xf32>
    %cst_150 = arith.constant dense<0.000000e+00> : vector<2x32xf32>
    %308 = tpu.matmul %306, %304, %cst_150 {dimension_numbers = #tpu.dot_dimension_numbers<[1], [0], [0], [1], [0, 0, 1, 1], [], []>} : vector<2x32xf32>, vector<32x32xf32>, vector<2x32xf32> -> vector<2x32xf32>
    %309 = arith.addf %301, %307 : vector<2x32xf32>
    %310 = arith.addf %302, %308 : vector<2x32xf32>
    %c2_151 = arith.constant 2 : index
    %c0_152 = arith.constant 0 : index
    %c0_153 = arith.constant 0 : index
    %311 = vector.load %arg5[%c2_151, %c0_152, %c0_153] : memref<3x32x32xf32, #tpu.memory_space<vmem>>, vector<1x32x32xf32>
    %312 = vector.shape_cast %311 : vector<1x32x32xf32> to vector<32x32xf32>
    %c2_154 = arith.constant 2 : index
    %c0_155 = arith.constant 0 : index
    %313 = tpu.strided_load %arg11[%c2_154, %c0_155] {strides = array<i32: 2, 1>} : memref<6x32xf32, #tpu.memory_space<vmem>>, vector<2x32xf32>
    %c3_156 = arith.constant 3 : index
    %c0_157 = arith.constant 0 : index
    %314 = tpu.strided_load %arg11[%c3_156, %c0_157] {strides = array<i32: 2, 1>} : memref<6x32xf32, #tpu.memory_space<vmem>>, vector<2x32xf32>
    %cst_158 = arith.constant dense<0.000000e+00> : vector<2x32xf32>
    %315 = tpu.matmul %313, %312, %cst_158 {dimension_numbers = #tpu.dot_dimension_numbers<[1], [0], [0], [1], [0, 0, 1, 1], [], []>} : vector<2x32xf32>, vector<32x32xf32>, vector<2x32xf32> -> vector<2x32xf32>
    %cst_159 = arith.constant dense<0.000000e+00> : vector<2x32xf32>
    %316 = tpu.matmul %314, %312, %cst_159 {dimension_numbers = #tpu.dot_dimension_numbers<[1], [0], [0], [1], [0, 0, 1, 1], [], []>} : vector<2x32xf32>, vector<32x32xf32>, vector<2x32xf32> -> vector<2x32xf32>
    %317 = arith.addf %309, %315 : vector<2x32xf32>
    %318 = arith.addf %310, %316 : vector<2x32xf32>
    %cst_160 = arith.constant dense<0.000000e+00> : vector<32xf32>
    %319 = vector.multi_reduction <add>, %317, %cst_160 [0] : vector<2x32xf32> to vector<32xf32>
    %320 = vector.shape_cast %319 : vector<32xf32> to vector<1x32xf32>
    %cst_161 = arith.constant dense<0.000000e+00> : vector<32xf32>
    %321 = vector.multi_reduction <add>, %318, %cst_161 [0] : vector<2x32xf32> to vector<32xf32>
    %322 = vector.shape_cast %321 : vector<32xf32> to vector<1x32xf32>
    %323 = arith.addf %320, %322 : vector<1x32xf32>
    %324 = vector.extract_strided_slice %323 {offsets = [0, 0], sizes = [1, 16], strides = [1, 1]} : vector<1x32xf32> to vector<1x16xf32>
    %325 = vector.extract_strided_slice %323 {offsets = [0, 16], sizes = [1, 16], strides = [1, 1]} : vector<1x32xf32> to vector<1x16xf32>
    %326 = arith.addf %324, %325 : vector<1x16xf32>
    %327 = vector.extract_strided_slice %326 {offsets = [0, 0], sizes = [1, 8], strides = [1, 1]} : vector<1x16xf32> to vector<1x8xf32>
    %328 = vector.extract_strided_slice %326 {offsets = [0, 8], sizes = [1, 8], strides = [1, 1]} : vector<1x16xf32> to vector<1x8xf32>
    %329 = arith.addf %327, %328 : vector<1x8xf32>
    %cst_162 = arith.constant 1.600000e+01 : f32
    %330 = vector.broadcast %cst_162 : f32 to vector<1x8xf32>
    %331 = arith.divf %329, %330 : vector<1x8xf32>
    %332 = tpu.concatenate %331, %331 in 1 : vector<1x8xf32>, vector<1x8xf32> -> vector<1x16xf32>
    %333 = tpu.concatenate %332, %332 in 1 : vector<1x16xf32>, vector<1x16xf32> -> vector<1x32xf32>
    %334 = vector.broadcast %333 : vector<1x32xf32> to vector<2x32xf32>
    %335 = arith.subf %317, %334 : vector<2x32xf32>
    %336 = vector.broadcast %333 : vector<1x32xf32> to vector<2x32xf32>
    %337 = arith.subf %318, %336 : vector<2x32xf32>
    %338 = arith.mulf %335, %335 : vector<2x32xf32>
    %cst_163 = arith.constant dense<0.000000e+00> : vector<32xf32>
    %339 = vector.multi_reduction <add>, %338, %cst_163 [0] : vector<2x32xf32> to vector<32xf32>
    %340 = vector.shape_cast %339 : vector<32xf32> to vector<1x32xf32>
    %341 = arith.mulf %337, %337 : vector<2x32xf32>
    %cst_164 = arith.constant dense<0.000000e+00> : vector<32xf32>
    %342 = vector.multi_reduction <add>, %341, %cst_164 [0] : vector<2x32xf32> to vector<32xf32>
    %343 = vector.shape_cast %342 : vector<32xf32> to vector<1x32xf32>
    %344 = arith.addf %340, %343 : vector<1x32xf32>
    %345 = vector.extract_strided_slice %344 {offsets = [0, 0], sizes = [1, 16], strides = [1, 1]} : vector<1x32xf32> to vector<1x16xf32>
    %346 = vector.extract_strided_slice %344 {offsets = [0, 16], sizes = [1, 16], strides = [1, 1]} : vector<1x32xf32> to vector<1x16xf32>
    %347 = arith.addf %345, %346 : vector<1x16xf32>
    %348 = vector.extract_strided_slice %347 {offsets = [0, 0], sizes = [1, 8], strides = [1, 1]} : vector<1x16xf32> to vector<1x8xf32>
    %349 = vector.extract_strided_slice %347 {offsets = [0, 8], sizes = [1, 8], strides = [1, 1]} : vector<1x16xf32> to vector<1x8xf32>
    %350 = arith.addf %348, %349 : vector<1x8xf32>
    %cst_165 = arith.constant 1.600000e+01 : f32
    %351 = vector.broadcast %cst_165 : f32 to vector<1x8xf32>
    %352 = arith.divf %350, %351 : vector<1x8xf32>
    %cst_166 = arith.constant 9.99999974E-6 : f32
    %353 = vector.broadcast %cst_166 : f32 to vector<1x8xf32>
    %354 = arith.addf %352, %353 : vector<1x8xf32>
    %355 = math.rsqrt %354 : vector<1x8xf32>
    %356 = arith.maximumf %317, %318 : vector<2x32xf32>
    %357 = vector.extract_strided_slice %356 {offsets = [0, 0], sizes = [2, 16], strides = [1, 1]} : vector<2x32xf32> to vector<2x16xf32>
    %358 = vector.extract_strided_slice %356 {offsets = [0, 16], sizes = [2, 16], strides = [1, 1]} : vector<2x32xf32> to vector<2x16xf32>
    %359 = arith.maximumf %357, %358 : vector<2x16xf32>
    %360 = vector.extract_strided_slice %333 {offsets = [0, 0], sizes = [1, 16], strides = [1, 1]} : vector<1x32xf32> to vector<1x16xf32>
    %361 = tpu.concatenate %355, %355 in 1 : vector<1x8xf32>, vector<1x8xf32> -> vector<1x16xf32>
    %362 = vector.broadcast %360 : vector<1x16xf32> to vector<2x16xf32>
    %363 = arith.subf %359, %362 : vector<2x16xf32>
    %364 = vector.broadcast %361 : vector<1x16xf32> to vector<2x16xf32>
    %365 = arith.mulf %363, %364 : vector<2x16xf32>
    %cst_167 = arith.constant 0.000000e+00 : f32
    %366 = vector.broadcast %cst_167 : f32 to vector<2x16xf32>
    %367 = arith.cmpf ogt, %365, %366 : vector<2x16xf32>
    %cst_168 = arith.constant 0.000000e+00 : f32
    %368 = vector.broadcast %cst_168 : f32 to vector<2x16xf32>
    %369 = arith.minimumf %365, %368 : vector<2x16xf32>
    %370 = math.exp %369 : vector<2x16xf32>
    %cst_169 = arith.constant 1.000000e+00 : f32
    %371 = vector.broadcast %cst_169 : f32 to vector<2x16xf32>
    %372 = arith.subf %370, %371 : vector<2x16xf32>
    %373 = arith.select %367, %365, %372 : vector<2x16xi1>, vector<2x16xf32>
    %cst_170 = arith.constant 0.000000e+00 : f32
    %374 = vector.broadcast %cst_170 : f32 to vector<1x16xf32>
    %c0_171 = arith.constant 0 : index
    %c0_172 = arith.constant 0 : index
    %375 = vector.load %arg12[%c0_171, %c0_172] : memref<4x16xf32, #tpu.memory_space<vmem>>, vector<1x16xf32>
    tpu.vector_store %arg12[%c0_171, %c0_172], %374 {strides = array<i32>} : memref<4x16xf32, #tpu.memory_space<vmem>>, vector<1x16xf32>,
    %c3_173 = arith.constant 3 : index
    %c0_174 = arith.constant 0 : index
    %376 = vector.load %arg12[%c3_173, %c0_174] : memref<4x16xf32, #tpu.memory_space<vmem>>, vector<1x16xf32>
    tpu.vector_store %arg12[%c3_173, %c0_174], %374 {strides = array<i32>} : memref<4x16xf32, #tpu.memory_space<vmem>>, vector<1x16xf32>,
    %c1_175 = arith.constant 1 : index
    %c0_176 = arith.constant 0 : index
    %377 = vector.load %arg12[%c1_175, %c0_176] : memref<4x16xf32, #tpu.memory_space<vmem>>, vector<2x16xf32>
    tpu.vector_store %arg12[%c1_175, %c0_176], %373 {strides = array<i32>} : memref<4x16xf32, #tpu.memory_space<vmem>>, vector<2x16xf32>,
    %c0_177 = arith.constant 0 : index
    %c0_178 = arith.constant 0 : index
    %c0_179 = arith.constant 0 : index
    %378 = vector.load %arg6[%c0_177, %c0_178, %c0_179] : memref<3x16x32xf32, #tpu.memory_space<vmem>>, vector<1x16x32xf32>
    %379 = vector.shape_cast %378 : vector<1x16x32xf32> to vector<16x32xf32>
    %c0_180 = arith.constant 0 : index
    %c0_181 = arith.constant 0 : index
    %380 = tpu.strided_load %arg12[%c0_180, %c0_181] {strides = array<i32: 2, 1>} : memref<4x16xf32, #tpu.memory_space<vmem>>, vector<1x16xf32>
    %c1_182 = arith.constant 1 : index
    %c0_183 = arith.constant 0 : index
    %381 = tpu.strided_load %arg12[%c1_182, %c0_183] {strides = array<i32: 2, 1>} : memref<4x16xf32, #tpu.memory_space<vmem>>, vector<1x16xf32>
    %cst_184 = arith.constant dense<0.000000e+00> : vector<1x32xf32>
    %382 = tpu.matmul %380, %379, %cst_184 {dimension_numbers = #tpu.dot_dimension_numbers<[1], [0], [0], [1], [0, 0, 1, 1], [], []>} : vector<1x16xf32>, vector<16x32xf32>, vector<1x32xf32> -> vector<1x32xf32>
    %cst_185 = arith.constant dense<0.000000e+00> : vector<1x32xf32>
    %383 = tpu.matmul %381, %379, %cst_185 {dimension_numbers = #tpu.dot_dimension_numbers<[1], [0], [0], [1], [0, 0, 1, 1], [], []>} : vector<1x16xf32>, vector<16x32xf32>, vector<1x32xf32> -> vector<1x32xf32>
    %c1_186 = arith.constant 1 : index
    %c0_187 = arith.constant 0 : index
    %c0_188 = arith.constant 0 : index
    %384 = vector.load %arg6[%c1_186, %c0_187, %c0_188] : memref<3x16x32xf32, #tpu.memory_space<vmem>>, vector<1x16x32xf32>
    %385 = vector.shape_cast %384 : vector<1x16x32xf32> to vector<16x32xf32>
    %c1_189 = arith.constant 1 : index
    %c0_190 = arith.constant 0 : index
    %386 = tpu.strided_load %arg12[%c1_189, %c0_190] {strides = array<i32: 2, 1>} : memref<4x16xf32, #tpu.memory_space<vmem>>, vector<1x16xf32>
    %c2_191 = arith.constant 2 : index
    %c0_192 = arith.constant 0 : index
    %387 = tpu.strided_load %arg12[%c2_191, %c0_192] {strides = array<i32: 2, 1>} : memref<4x16xf32, #tpu.memory_space<vmem>>, vector<1x16xf32>
    %cst_193 = arith.constant dense<0.000000e+00> : vector<1x32xf32>
    %388 = tpu.matmul %386, %385, %cst_193 {dimension_numbers = #tpu.dot_dimension_numbers<[1], [0], [0], [1], [0, 0, 1, 1], [], []>} : vector<1x16xf32>, vector<16x32xf32>, vector<1x32xf32> -> vector<1x32xf32>
    %cst_194 = arith.constant dense<0.000000e+00> : vector<1x32xf32>
    %389 = tpu.matmul %387, %385, %cst_194 {dimension_numbers = #tpu.dot_dimension_numbers<[1], [0], [0], [1], [0, 0, 1, 1], [], []>} : vector<1x16xf32>, vector<16x32xf32>, vector<1x32xf32> -> vector<1x32xf32>
    %390 = arith.addf %382, %388 : vector<1x32xf32>
    %391 = arith.addf %383, %389 : vector<1x32xf32>
    %c2_195 = arith.constant 2 : index
    %c0_196 = arith.constant 0 : index
    %c0_197 = arith.constant 0 : index
    %392 = vector.load %arg6[%c2_195, %c0_196, %c0_197] : memref<3x16x32xf32, #tpu.memory_space<vmem>>, vector<1x16x32xf32>
    %393 = vector.shape_cast %392 : vector<1x16x32xf32> to vector<16x32xf32>
    %c2_198 = arith.constant 2 : index
    %c0_199 = arith.constant 0 : index
    %394 = tpu.strided_load %arg12[%c2_198, %c0_199] {strides = array<i32: 2, 1>} : memref<4x16xf32, #tpu.memory_space<vmem>>, vector<1x16xf32>
    %c3_200 = arith.constant 3 : index
    %c0_201 = arith.constant 0 : index
    %395 = tpu.strided_load %arg12[%c3_200, %c0_201] {strides = array<i32: 2, 1>} : memref<4x16xf32, #tpu.memory_space<vmem>>, vector<1x16xf32>
    %cst_202 = arith.constant dense<0.000000e+00> : vector<1x32xf32>
    %396 = tpu.matmul %394, %393, %cst_202 {dimension_numbers = #tpu.dot_dimension_numbers<[1], [0], [0], [1], [0, 0, 1, 1], [], []>} : vector<1x16xf32>, vector<16x32xf32>, vector<1x32xf32> -> vector<1x32xf32>
    %cst_203 = arith.constant dense<0.000000e+00> : vector<1x32xf32>
    %397 = tpu.matmul %395, %393, %cst_203 {dimension_numbers = #tpu.dot_dimension_numbers<[1], [0], [0], [1], [0, 0, 1, 1], [], []>} : vector<1x16xf32>, vector<16x32xf32>, vector<1x32xf32> -> vector<1x32xf32>
    %398 = arith.addf %390, %396 : vector<1x32xf32>
    %399 = arith.addf %391, %397 : vector<1x32xf32>
    %cst_204 = arith.constant dense<0.000000e+00> : vector<32xf32>
    %400 = vector.multi_reduction <add>, %398, %cst_204 [0] : vector<1x32xf32> to vector<32xf32>
    %401 = vector.shape_cast %400 : vector<32xf32> to vector<1x32xf32>
    %cst_205 = arith.constant dense<0.000000e+00> : vector<32xf32>
    %402 = vector.multi_reduction <add>, %399, %cst_205 [0] : vector<1x32xf32> to vector<32xf32>
    %403 = vector.shape_cast %402 : vector<32xf32> to vector<1x32xf32>
    %404 = arith.addf %401, %403 : vector<1x32xf32>
    %405 = vector.extract_strided_slice %404 {offsets = [0, 0], sizes = [1, 16], strides = [1, 1]} : vector<1x32xf32> to vector<1x16xf32>
    %406 = vector.extract_strided_slice %404 {offsets = [0, 16], sizes = [1, 16], strides = [1, 1]} : vector<1x32xf32> to vector<1x16xf32>
    %407 = arith.addf %405, %406 : vector<1x16xf32>
    %cst_206 = arith.constant 4.000000e+00 : f32
    %408 = vector.broadcast %cst_206 : f32 to vector<1x16xf32>
    %409 = arith.divf %407, %408 : vector<1x16xf32>
    %410 = tpu.concatenate %409, %409 in 1 : vector<1x16xf32>, vector<1x16xf32> -> vector<1x32xf32>
    %411 = arith.subf %398, %410 : vector<1x32xf32>
    %412 = arith.subf %399, %410 : vector<1x32xf32>
    %413 = arith.mulf %411, %411 : vector<1x32xf32>
    %cst_207 = arith.constant dense<0.000000e+00> : vector<32xf32>
    %414 = vector.multi_reduction <add>, %413, %cst_207 [0] : vector<1x32xf32> to vector<32xf32>
    %415 = vector.shape_cast %414 : vector<32xf32> to vector<1x32xf32>
    %416 = arith.mulf %412, %412 : vector<1x32xf32>
    %cst_208 = arith.constant dense<0.000000e+00> : vector<32xf32>
    %417 = vector.multi_reduction <add>, %416, %cst_208 [0] : vector<1x32xf32> to vector<32xf32>
    %418 = vector.shape_cast %417 : vector<32xf32> to vector<1x32xf32>
    %419 = arith.addf %415, %418 : vector<1x32xf32>
    %420 = vector.extract_strided_slice %419 {offsets = [0, 0], sizes = [1, 16], strides = [1, 1]} : vector<1x32xf32> to vector<1x16xf32>
    %421 = vector.extract_strided_slice %419 {offsets = [0, 16], sizes = [1, 16], strides = [1, 1]} : vector<1x32xf32> to vector<1x16xf32>
    %422 = arith.addf %420, %421 : vector<1x16xf32>
    %cst_209 = arith.constant 4.000000e+00 : f32
    %423 = vector.broadcast %cst_209 : f32 to vector<1x16xf32>
    %424 = arith.divf %422, %423 : vector<1x16xf32>
    %cst_210 = arith.constant 9.99999974E-6 : f32
    %425 = vector.broadcast %cst_210 : f32 to vector<1x16xf32>
    %426 = arith.addf %424, %425 : vector<1x16xf32>
    %427 = math.rsqrt %426 : vector<1x16xf32>
    %428 = arith.maximumf %398, %399 : vector<1x32xf32>
    %429 = vector.extract_strided_slice %428 {offsets = [0, 0], sizes = [1, 16], strides = [1, 1]} : vector<1x32xf32> to vector<1x16xf32>
    %430 = vector.extract_strided_slice %428 {offsets = [0, 16], sizes = [1, 16], strides = [1, 1]} : vector<1x32xf32> to vector<1x16xf32>
    %431 = arith.maximumf %429, %430 : vector<1x16xf32>
    %432 = vector.extract_strided_slice %410 {offsets = [0, 0], sizes = [1, 16], strides = [1, 1]} : vector<1x32xf32> to vector<1x16xf32>
    %433 = arith.subf %431, %432 : vector<1x16xf32>
    %434 = arith.mulf %433, %427 : vector<1x16xf32>
    %cst_211 = arith.constant 0.000000e+00 : f32
    %435 = vector.broadcast %cst_211 : f32 to vector<1x16xf32>
    %436 = arith.cmpf ogt, %434, %435 : vector<1x16xf32>
    %cst_212 = arith.constant 0.000000e+00 : f32
    %437 = vector.broadcast %cst_212 : f32 to vector<1x16xf32>
    %438 = arith.minimumf %434, %437 : vector<1x16xf32>
    %439 = math.exp %438 : vector<1x16xf32>
    %cst_213 = arith.constant 1.000000e+00 : f32
    %440 = vector.broadcast %cst_213 : f32 to vector<1x16xf32>
    %441 = arith.subf %439, %440 : vector<1x16xf32>
    %442 = arith.select %436, %434, %441 : vector<1x16xi1>, vector<1x16xf32>
    %c0_214 = arith.constant 0 : index
    %c0_215 = arith.constant 0 : index
    %c0_216 = arith.constant 0 : index
    %443 = vector.load %arg7[%c0_214, %c0_215, %c0_216] : memref<1x1x16xf32, #tpu.memory_space<vmem>>, vector<1x1x16xf32>
    %444 = vector.shape_cast %443 : vector<1x1x16xf32> to vector<1x16xf32>
    %445 = vector.shape_cast %442 : vector<1x16xf32> to vector<1x1x16xf32>
    tpu.vector_store %arg7[%c0_214, %c0_215, %c0_216], %445 {strides = array<i32>} : memref<1x1x16xf32, #tpu.memory_space<vmem>>, vector<1x1x16xf32>,
    return
  }
  func.func @transform_0(%arg0: i32) -> (i32, i32, i32) {
    %c0_i32 = arith.constant 0 : i32
    %c0_i32_0 = arith.constant 0 : i32
    %c0_i32_1 = arith.constant 0 : i32
    return %arg0, %c0_i32, %c0_i32_0 : i32, i32, i32
  }
  func.func @transform_1(%arg0: i32) -> (i32, i32, i32) {
    %c0_i32 = arith.constant 0 : i32
    %c0_i32_0 = arith.constant 0 : i32
    %c0_i32_1 = arith.constant 0 : i32
    %c0_i32_2 = arith.constant 0 : i32
    return %c0_i32, %c0_i32_0, %c0_i32_1 : i32, i32, i32
  }
  func.func @transform_2(%arg0: i32) -> (i32, i32, i32) {
    %c0_i32 = arith.constant 0 : i32
    %c0_i32_0 = arith.constant 0 : i32
    %c0_i32_1 = arith.constant 0 : i32
    %c0_i32_2 = arith.constant 0 : i32
    return %c0_i32, %c0_i32_0, %c0_i32_1 : i32, i32, i32
  }
  func.func @transform_3(%arg0: i32) -> (i32, i32, i32) {
    %c0_i32 = arith.constant 0 : i32
    %c0_i32_0 = arith.constant 0 : i32
    %c0_i32_1 = arith.constant 0 : i32
    %c0_i32_2 = arith.constant 0 : i32
    return %c0_i32, %c0_i32_0, %c0_i32_1 : i32, i32, i32
  }
  func.func @transform_4(%arg0: i32) -> (i32, i32, i32) {
    %c0_i32 = arith.constant 0 : i32
    %c0_i32_0 = arith.constant 0 : i32
    %c0_i32_1 = arith.constant 0 : i32
    %c0_i32_2 = arith.constant 0 : i32
    return %c0_i32, %c0_i32_0, %c0_i32_1 : i32, i32, i32
  }
  func.func @transform_5(%arg0: i32) -> (i32, i32, i32) {
    %c0_i32 = arith.constant 0 : i32
    %c0_i32_0 = arith.constant 0 : i32
    %c0_i32_1 = arith.constant 0 : i32
    %c0_i32_2 = arith.constant 0 : i32
    return %c0_i32, %c0_i32_0, %c0_i32_1 : i32, i32, i32
  }
  func.func @transform_6(%arg0: i32) -> (i32, i32, i32) {
    %c0_i32 = arith.constant 0 : i32
    %c0_i32_0 = arith.constant 0 : i32
    %c0_i32_1 = arith.constant 0 : i32
    return %arg0, %c0_i32, %c0_i32_0 : i32, i32, i32
  }
}

</mosaic_0001>

<bundles_post_ra>
// kernel: encoder_forward.1
= control target key start
LH: loop header
LB: loop body
LE: loop exit
PB: predicated region body
PF: predicated region fallthrough
CT: control target
= control target key end

     0   :  { %11 = vsyncpa [#allocation8], 0  ;;  %s5902_s0 = inlined_call_operand.vmem [shape: f32[2,32,128], index: 0, kind: input, shape index: {}]   ;;  %s5903_s1 = inlined_call_operand.vmem [shape: f32[3,128,256], index: 1, kind: input, shape index: {}]   ;;  %s5904_s2 = inlined_call_operand.vmem [shape: f32[3,128,128], index: 2, kind: input, shape index: {}]   ;;  %s5905_s3 = inlined_call_operand.vmem [shape: f32[3,64,64], index: 3, kind: input, shape index: {}]   ;;  %s5906_s4 = inlined_call_operand.vmem [shape: f32[3,32,32], index: 4, kind: input, shape index: {}]   ;;  %s5907_s5 = inlined_call_operand.vmem [shape: f32[3,16,32], index: 5, kind: input, shape index: {}]   ;;  %s5908_s6 = inlined_call_operand.hbm [shape: f32[2,1,16], index: 6, kind: output, shape index: {}]  }
   0x1   :  { %13 = vsyncpa [#allocation8 + $0x1], 0  ;;  %s4851_s21 = smov 0   ;;  %s4853_s22 = smov 0  }
   0x2   :  { %s4855_s23 = smov 0   ;;  %s4857_s24 = smov 0  }
   0x3 LB: > { %s4872_s25 = sadd.s32 4294967295, %s4803_s24   ;;  %s3366_s26 = sadd.s32 4294967294, %s4803_s24   ;;  %s4803_s24 = sphi %s4857_s24, %s5914_s24   ;;  %s4799_s23 = sphi %s4855_s23, %s5913_s23   ;;  %s4795_s22 = sphi %s4853_s22, %s5912_s22   ;;  %s4791_s21 = sphi %s4851_s21, %s5911_s21  }
   0x4   : > { %s4876_s27 = sadd.s32 1, %s4803_s24   ;;  %s157_s28 = sadd.s32 1, %s4799_s23 }
   0x5   : > { %s154_s29 = ssub.s32 %s4803_s24, %s4876_s27  ;;  %p167_p0 = scmp.ne.s32.totalorder %s4799_s23, %s4795_s22 }
   0x6   : > { %p155_p1 = scmp.eq.s32.totalorder %s154_s29, 0  ;;  %p168_p2 = scmp.eq.s32.totalorder %s4872_s25, 1 }
   0x7   : > { %p173_p3 = scmp.ne.s32.totalorder %s4795_s22, %s4791_s21  ;;  %p174_p4 = scmp.eq.s32.totalorder %s3366_s26, 1 }
   0x8   : > { %s4887_s30 = scalar_select %p155_p1, %s4799_s23, %s157_s28  }
   0x9   : > { %p4889_p5 = por %p168_p2, %p167_p0  ;;  %p4893_p6 = por %p174_p4, %p173_p3 }
   0xa   : > { %p3369_p7 = scmp.ge.s32.totalorder %s4803_s24, 1  ;;  %p215_p8 = scmp.lt.s32.totalorder %s4803_s24, 3 }
   0xc   : > { %p216_p9 = pnand %p3369_p7, %p215_p8 }
   0xd   : > { %v3373_v0 = vld [vmem:[%s5903_s1 + $0x108] sm:$0xff] (!%p216_p9)  ;;  %v3375_v1 = vld [vmem:[%s5903_s1 + $0x118] sm:$0xff] (!%p216_p9)  ;;  %v3372_v2 = vld [vmem:[%s5903_s1 + $0x100] sm:$0xff] (!%p216_p9)  ;;  %p244_p10 = scmp.lt.s32.totalorder (!%p216_p9), %s4872_s25, 1  ;;  %v4805_v7 = vmov (!%p216_p9), 0.0   ;;  %s4806_s13 = smov (!%p216_p9), 64  }
   0xe   : > { %219 = sbr.rel (%p216_p9) target bundleno = 7762 (0x1e52), region = 44  ;;  %v4160_v3 = vpack.c.bf16 (!%p216_p9), %v3375_v1, %v3373_v0  ;;  %v3374_v4 = vld [vmem:[%s5903_s1 + $0x110] sm:$0xff] (!%p216_p9)  ;;  %v3377_v5 = vld [vmem:[%s5903_s1 + $0x128] sm:$0xff] (!%p216_p9)  ;;  %v3379_v6 = vld [vmem:[%s5903_s1 + $0x138] sm:$0xff] (!%p216_p9)  ;;  %399 = vmatprep.mubr.f32.mxu0 (!%p216_p9), %v4805_v7  ;;  %253 = vst [vmem:[#allocation2] sm:$0x1] (!%p216_p9), %v4805_v7  ;;  %476 = vmatprep.mubr.f32.mxu1 (!%p216_p9), %v4805_v7 }
   0xf   : > { %254 = vst [vmem:[#allocation2 + $0x21] sm:$0x1] (!%p216_p9), %v4805_v7  ;;  %1039 = vst [vmem:[#allocation3] sm:$0x1] (!%p216_p9), %v4805_v7  ;;  %v4162_v8 = vpack.c.bf16 (!%p216_p9), %v3374_v4, %v3372_v2  ;;  %v4164_v9 = vpack.c.bf16 (!%p216_p9), %v3379_v6, %v3377_v5  ;;  %v3376_v10 = vld [vmem:[%s5903_s1 + $0x120] sm:$0xff] (!%p216_p9)  ;;  %v3378_v11 = vld [vmem:[%s5903_s1 + $0x130] sm:$0xff] (!%p216_p9) }
  0x10   : > { %1040 = vst [vmem:[#allocation3 + $0x11] sm:$0x1] (!%p216_p9), %v4805_v7  ;;  %v3381_v12 = vld [vmem:[%s5903_s1 + $0x148] sm:$0xff] (!%p216_p9)  ;;  %4161 = vmatprep.subr.bf16.mxu0 (!%p216_p9), %v4160_v3  ;;  %4193 = vmatprep.subr.bf16.mxu1 (!%p216_p9), %v4160_v3  ;;  %v3383_v13 = vld [vmem:[%s5903_s1 + $0x158] sm:$0xff] (!%p216_p9)  ;;  %v4166_v14 = vpack.c.bf16 (!%p216_p9), %v3378_v11, %v3376_v10  ;;  %v3380_v16 = vld [vmem:[%s5903_s1 + $0x140] sm:$0xff] (!%p216_p9)  ;;  %s4807_s14 = smov (!%p216_p9), 96  }
  0x11   : > { %4163 = vmatpush1.bf16.msra.mxu0 (!%p216_p9), %v4162_v8  ;;  %4195 = vmatpush1.bf16.msra.mxu1 (!%p216_p9), %v4162_v8  ;;  %v4168_v15 = vpack.c.bf16 (!%p216_p9), %v3383_v13, %v3381_v12  ;;  %v3382_v17 = vld [vmem:[%s5903_s1 + $0x150] sm:$0xff] (!%p216_p9)  ;;  %v3385_v18 = vld [vmem:[%s5903_s1 + $0x168] sm:$0xff] (!%p216_p9)  ;;  %v3387_v19 = vld [vmem:[%s5903_s1 + $0x178] sm:$0xff] (!%p216_p9)  ;;  %s4808_s15 = smov (!%p216_p9), 112   ;;  %s4809_s16 = smov (!%p216_p9), 120   ;;  %vm899_vm0 = vcmask (!%p216_p9), 64512  }
  0x12   : > { %4165 = vmatprep.subr.bf16.mxu0 (!%p216_p9), %v4164_v9  ;;  %4197 = vmatprep.subr.bf16.mxu1 (!%p216_p9), %v4164_v9  ;;  %v4170_v20 = vpack.c.bf16 (!%p216_p9), %v3382_v17, %v3380_v16  ;;  %v4172_v21 = vpack.c.bf16 (!%p216_p9), %v3387_v19, %v3385_v18  ;;  %v3384_v22 = vld [vmem:[%s5903_s1 + $0x160] sm:$0xff] (!%p216_p9)  ;;  %v3386_v23 = vld [vmem:[%s5903_s1 + $0x170] sm:$0xff] (!%p216_p9)  ;;  %v3389_v24 = vld [vmem:[%s5903_s1 + $0x188] sm:$0xff] (!%p216_p9)  ;;  %s4810_s17 = smov (!%p216_p9), 8   ;;  %s4811_s18 = smov (!%p216_p9), 16   ;;  %vm905_vm1 = vcmask (!%p216_p9), 130048  }
  0x13   : > { %v3391_v25 = vld [vmem:[%s5903_s1 + $0x198] sm:$0xff] (!%p216_p9)  ;;  %v4174_v28 = vpack.c.bf16 (!%p216_p9), %v3386_v23, %v3384_v22  ;;  %v3388_v30 = vld [vmem:[%s5903_s1 + $0x180] sm:$0xff] (!%p216_p9)  ;;  %v3390_v31 = vld [vmem:[%s5903_s1 + $0x190] sm:$0xff] (!%p216_p9)  ;;  %vm911_vm2 = vcmask (!%p216_p9), 261120   ;;  %vm917_vm3 = vcmask (!%p216_p9), 523264   ;;  %vm4814_vm4 = vmmov (!%p216_p9), 0  }
  0x14   : > { %v4176_v29 = vpack.c.bf16 (!%p216_p9), %v3391_v25, %v3389_v24  ;;  %v3393_v32 = vld [vmem:[%s5903_s1 + $0x1a8] sm:$0xff] (!%p216_p9)  ;;  %v3395_v33 = vld [vmem:[%s5903_s1 + $0x1b8] sm:$0xff] (!%p216_p9)  ;;  %v4178_v34 = vpack.c.bf16 (!%p216_p9), %v3390_v31, %v3388_v30  ;;  %v3392_v36 = vld [vmem:[%s5903_s1 + $0x1a0] sm:$0xff] (!%p216_p9)  ;;  %vm1654_vm7 = vcmask (!%p216_p9), 516096   ;;  %vm2125_vm9 = vcmask (!%p216_p9), 519168   ;;  %s3520_s28 = sshll.u32 (!%p216_p9), %s4872_s25, 4 }
  0x15   : > { %s245_s12 = scalar_select %p244_p10, %s4872_s25, 1  ;;  %4167 = vmatpush1.bf16.msra.mxu0 %v4166_v14  ;;  %4199 = vmatpush1.bf16.msra.mxu1 %v4166_v14  ;;  %v4180_v35 = vpack.c.bf16 %v3395_v33, %v3393_v32  ;;  %v3394_v37 = vld [vmem:[%s5903_s1 + $0x1b0] sm:$0xff]  ;;  %v3397_v38 = vld [vmem:[%s5903_s1 + $0x1c8] sm:$0xff]  ;;  %v3399_v39 = vld [vmem:[%s5903_s1 + $0x1d8] sm:$0xff]  ;;  %1655 = vst.msk [vmem:[#allocation4] sm:$0x1] %vm1654_vm7, %v4805_v7 }
  0x16   : > { %4169 = vmatprep.subr.bf16.mxu0 %v4168_v15  ;;  %4201 = vmatprep.subr.bf16.mxu1 %v4168_v15  ;;  %v4182_v40 = vpack.c.bf16 %v3394_v37, %v3392_v36  ;;  %v4184_v41 = vpack.c.bf16 %v3399_v39, %v3397_v38  ;;  %v3396_v42 = vld [vmem:[%s5903_s1 + $0x1c0] sm:$0xff]  ;;  %v3398_v43 = vld [vmem:[%s5903_s1 + $0x1d0] sm:$0xff]  ;;  %v3401_v44 = vld [vmem:[%s5903_s1 + $0x1e8] sm:$0xff]  ;;  %1656 = vst.msk [vmem:[#allocation4 + $0x9] sm:$0x1] %vm1654_vm7, %v4805_v7  ;;  %vm2242_vm10 = vcmask 253952   ;;  %s5859_s9 = scalar_lea.hbm %s5908_s6, %s3520_s28 }
  0x17   : > { %s3523_s19 = sshll.u32 %s245_s12, 5  ;;  %v3403_v45 = vld [vmem:[%s5903_s1 + $0x1f8] sm:$0xff]  ;;  %v4186_v48 = vpack.c.bf16 %v3398_v43, %v3396_v42  ;;  %v3400_v50 = vld [vmem:[%s5903_s1 + $0x1e0] sm:$0xff]  ;;  %v3402_v51 = vld [vmem:[%s5903_s1 + $0x1f0] sm:$0xff]  ;;  %2243 = vst.msk [vmem:[#allocation5] sm:$0x1] %vm2242_vm10, %v4805_v7 }
  0x18   : > { %s4954_s11 = scalar_lea.vmem %s5902_s0, %s3523_s19  ;;  %v4188_v49 = vpack.c.bf16 %v3403_v45, %v3401_v44  ;;  %v260_v52 = vld [vmem:[%s5903_s1 + $0x8] sm:$0xff]  ;;  %v262_v53 = vld [vmem:[%s5903_s1 + $0x18] sm:$0xff]  ;;  %v4190_v54 = vpack.c.bf16 %v3402_v51, %v3400_v50  ;;  %v259_v56 = vld [vmem:[%s5903_s1] sm:$0xff]  ;;  %s4812_s19 = smov 32   ;;  %2244 = vst.msk [vmem:[#allocation5 + $0x5] sm:$0x1] %vm2242_vm10, %v4805_v7 }
  0x19   : > { %v249_v26 = vld [vmem:[%s4954_s11] sm:$0xff]  ;;  %v250_v27 = vld [vmem:[%s4954_s11 + $0x8] sm:$0xff]  ;;  %4171 = vmatpush1.bf16.msra.mxu0 %v4170_v20  ;;  %4203 = vmatpush1.bf16.msra.mxu1 %v4170_v20  ;;  %v251_v46 = vld [vmem:[%s4954_s11 + $0x10] sm:$0xff]  ;;  %v4224_v55 = vpack.c.bf16 %v262_v53, %v260_v52  ;;  %vm2245_vm11 = vcmask 257024   ;;  %vm2702_vm13 = vcmask 254976   ;;  %vm2799_vm14 = vcmask 122880  }
  0x1a   : > { %255 = vst [vmem:[#allocation2 + $0x1] sm:$0xff] %v249_v26  ;;  %256 = vst [vmem:[#allocation2 + $0x9] sm:$0xff] %v250_v27  ;;  %4173 = vmatprep.subr.bf16.mxu0 %v4172_v21  ;;  %4205 = vmatprep.subr.bf16.mxu1 %v4172_v21  ;;  %v252_v47 = vld [vmem:[%s4954_s11 + $0x18] sm:$0xff]  ;;  %v261_v57 = vld [vmem:[%s5903_s1 + $0x10] sm:$0xff]  ;;  %vm2802_vm15 = vcmask 123904  }
  0x1b   : > { %257 = vst [vmem:[#allocation2 + $0x11] sm:$0xff] %v251_v46  ;;  %258 = vst [vmem:[#allocation2 + $0x19] sm:$0xff] %v252_v47  ;;  %v264_v58 = vld [vmem:[%s5903_s1 + $0x28] sm:$0xff]  ;;  %v266_v59 = vld [vmem:[%s5903_s1 + $0x38] sm:$0xff]  ;;  %v4226_v62 = vpack.c.bf16 %v261_v57, %v259_v56 }
  0x1c   : > { %v4228_v63 = vpack.c.bf16 %v266_v59, %v264_v58  ;;  %v263_v0 = vld [vmem:[%s5903_s1 + $0x20] sm:$0xff]  ;;  %v265_v1 = vld [vmem:[%s5903_s1 + $0x30] sm:$0xff]  ;;  %v268_v2 = vld [vmem:[%s5903_s1 + $0x48] sm:$0xff]  ;;  %2800 = vst.msk [vmem:[#allocation6] sm:$0x1] %vm2799_vm14, %v4805_v7 }
  0x1d   : > { %4175 = vmatpush1.bf16.msra.mxu0 %v4174_v28  ;;  %4207 = vmatpush1.bf16.msra.mxu1 %v4174_v28  ;;  %v270_v3 = vld [vmem:[%s5903_s1 + $0x58] sm:$0xff]  ;;  %v4230_v4 = vpack.c.bf16 %v265_v1, %v263_v0  ;;  %v267_v9 = vld [vmem:[%s5903_s1 + $0x40] sm:$0xff]  ;;  %v269_v10 = vld [vmem:[%s5903_s1 + $0x50] sm:$0xff]  ;;  %2801 = vst.msk [vmem:[#allocation6 + $0x3] sm:$0x1] %vm2799_vm14, %v4805_v7 }
  0x1e   : > { %4177 = vmatprep.subr.bf16.mxu0 %v4176_v29  ;;  %4209 = vmatprep.subr.bf16.mxu1 %v4176_v29  ;;  %v4232_v8 = vpack.c.bf16 %v270_v3, %v268_v2  ;;  %v272_v11 = vld [vmem:[%s5903_s1 + $0x68] sm:$0xff]  ;;  %v274_v12 = vld [vmem:[%s5903_s1 + $0x78] sm:$0xff]  ;;  %v4234_v13 = vpack.c.bf16 %v269_v10, %v267_v9  ;;  %v271_v15 = vld [vmem:[%s5903_s1 + $0x60] sm:$0xff] }
  0x1f   : > { %v4236_v14 = vpack.c.bf16 %v274_v12, %v272_v11  ;;  %v273_v16 = vld [vmem:[%s5903_s1 + $0x70] sm:$0xff]  ;;  %v276_v17 = vld [vmem:[%s5903_s1 + $0x88] sm:$0xff]  ;;  %v278_v18 = vld [vmem:[%s5903_s1 + $0x98] sm:$0xff] }
  0x20   : > { %v4238_v19 = vpack.c.bf16 %v273_v16, %v271_v15  ;;  %v4240_v20 = vpack.c.bf16 %v278_v18, %v276_v17  ;;  %v275_v21 = vld [vmem:[%s5903_s1 + $0x80] sm:$0xff]  ;;  %v277_v22 = vld [vmem:[%s5903_s1 + $0x90] sm:$0xff]  ;;  %v280_v23 = vld [vmem:[%s5903_s1 + $0xa8] sm:$0xff] }
  0x21   : > { %4179 = vmatpush1.bf16.msra.mxu0 %v4178_v34  ;;  %4211 = vmatpush1.bf16.msra.mxu1 %v4178_v34  ;;  %v5032_v60 = vld [vmem:[#allocation2 + $0x1] ss:$2 sm:$0xff]  ;;  %v5034_v61 = vld [vmem:[#allocation2 + $0x2] ss:$2 sm:$0xff]  ;;  %v282_v24 = vld [vmem:[%s5903_s1 + $0xb8] sm:$0xff]  ;;  %v4242_v25 = vpack.c.bf16 %v277_v22, %v275_v21 }
  0x22   : > { %4181 = vmatprep.subr.bf16.mxu0 %v4180_v35  ;;  %4213 = vmatprep.subr.bf16.mxu1 %v4180_v35  ;;  %v5050_v5 = vld [vmem:[#allocation2 + $0x11] ss:$2 sm:$0xff]  ;;  %v5052_v6 = vld [vmem:[#allocation2 + $0x12] ss:$2 sm:$0xff]  ;;  %v4244_v26 = vpack.c.bf16 %v282_v24, %v280_v23  ;;  %v284_v29 = vld [vmem:[%s5903_s1 + $0xc8] sm:$0xff] }
  0x23   : > { %v279_v27 = vld [vmem:[%s5903_s1 + $0xa0] sm:$0xff]  ;;  %v281_v28 = vld [vmem:[%s5903_s1 + $0xb0] sm:$0xff]  ;;  %v286_v30 = vld [vmem:[%s5903_s1 + $0xd8] sm:$0xff] }
  0x24   : > { %v4246_v31 = vpack.c.bf16 %v281_v28, %v279_v27  ;;  %v4248_v32 = vpack.c.bf16 %v286_v30, %v284_v29  ;;  %v283_v33 = vld [vmem:[%s5903_s1 + $0xc0] sm:$0xff]  ;;  %v285_v34 = vld [vmem:[%s5903_s1 + $0xd0] sm:$0xff]  ;;  %v288_v35 = vld [vmem:[%s5903_s1 + $0xe8] sm:$0xff] }
  0x25   : > { %4183 = vmatpush1.bf16.msra.mxu0 %v4182_v40  ;;  %4215 = vmatpush1.bf16.msra.mxu1 %v4182_v40  ;;  %v290_v36 = vld [vmem:[%s5903_s1 + $0xf8] sm:$0xff]  ;;  %v4250_v37 = vpack.c.bf16 %v285_v34, %v283_v33  ;;  %v287_v39 = vld [vmem:[%s5903_s1 + $0xe0] sm:$0xff]  ;;  %v289_v40 = vld [vmem:[%s5903_s1 + $0xf0] sm:$0xff] }
  0x26   : > { %4185 = vmatprep.subr.bf16.mxu0 %v4184_v41  ;;  %4217 = vmatprep.subr.bf16.mxu1 %v4184_v41  ;;  %v4252_v38 = vpack.c.bf16 %v290_v36, %v288_v35  ;;  %v3405_v41 = vld [vmem:[%s5903_s1 + $0x208] sm:$0xff]  ;;  %v3407_v42 = vld [vmem:[%s5903_s1 + $0x218] sm:$0xff]  ;;  %v4254_v43 = vpack.c.bf16 %v289_v40, %v287_v39  ;;  %v3404_v45 = vld [vmem:[%s5903_s1 + $0x200] sm:$0xff] }
  0x27   : > { %v4288_v44 = vpack.c.bf16 %v3407_v42, %v3405_v41  ;;  %v3406_v46 = vld [vmem:[%s5903_s1 + $0x210] sm:$0xff]  ;;  %v3409_v47 = vld [vmem:[%s5903_s1 + $0x228] sm:$0xff]  ;;  %v3408_v52 = vld [vmem:[%s5903_s1 + $0x220] sm:$0xff] }
  0x28   : > { %v4290_v50 = vpack.c.bf16 %v3406_v46, %v3404_v45  ;;  %v3410_v53 = vld [vmem:[%s5903_s1 + $0x230] sm:$0xff]  ;;  %v3412_v59 = vld [vmem:[%s5903_s1 + $0x240] sm:$0xff]  ;;  %v3425_v12 = vld [vmem:[%s5903_s1 + $0x2a8] sm:$0xff] }
  0x29   : > { %4187 = vmatpush1.bf16.msra.mxu0 %v4186_v48  ;;  %4219 = vmatpush1.bf16.msra.mxu1 %v4186_v48  ;;  %v3411_v48 = vld [vmem:[%s5903_s1 + $0x238] sm:$0xff]  ;;  %v4294_v56 = vpack.c.bf16 %v3410_v53, %v3408_v52  ;;  %v3416_v2 = vld [vmem:[%s5903_s1 + $0x260] sm:$0xff]  ;;  %v3418_v3 = vld [vmem:[%s5903_s1 + $0x270] sm:$0xff] }
  0x2a   : > { %4189 = vmatprep.subr.bf16.mxu0 %v4188_v49  ;;  %4221 = vmatprep.subr.bf16.mxu1 %v4188_v49  ;;  %v291_v49 = vld [vmem:[#allocation2] ss:$2 sm:$0xff]  ;;  %v4292_v51 = vpack.c.bf16 %v3411_v48, %v3409_v47  ;;  %v293_v57 = vld [vmem:[#allocation2 + $0x10] ss:$2 sm:$0xff] }
  0x2b   : > { %v3420_v10 = vld [vmem:[%s5903_s1 + $0x280] sm:$0xff]  ;;  %v3422_v11 = vld [vmem:[%s5903_s1 + $0x290] sm:$0xff]  ;;  %v3429_v18 = vld [vmem:[%s5903_s1 + $0x2c8] sm:$0xff] }
  0x2c   : > { %v3424_v16 = vld [vmem:[%s5903_s1 + $0x2a0] sm:$0xff]  ;;  %v3426_v17 = vld [vmem:[%s5903_s1 + $0x2b0] sm:$0xff]  ;;  %v3433_v24 = vld [vmem:[%s5903_s1 + $0x2e8] sm:$0xff] }
  0x2d   : > { %4191 = vmatpush1.bf16.msra.mxu0 %v4190_v54  ;;  %4223 = vmatpush1.bf16.msra.mxu1 %v4190_v54  ;;  %v3413_v54 = vld [vmem:[%s5903_s1 + $0x248] sm:$0xff]  ;;  %v3428_v22 = vld [vmem:[%s5903_s1 + $0x2c0] sm:$0xff]  ;;  %v3430_v23 = vld [vmem:[%s5903_s1 + $0x2d0] sm:$0xff] }
  0x2e   : > { %4225 = vmatprep.subr.bf16.mxu0 %v4224_v55  ;;  %4257 = vmatprep.subr.bf16.mxu1 %v4224_v55  ;;  %v3415_v55 = vld [vmem:[%s5903_s1 + $0x258] sm:$0xff]  ;;  %v3432_v28 = vld [vmem:[%s5903_s1 + $0x2e0] sm:$0xff]  ;;  %v3434_v29 = vld [vmem:[%s5903_s1 + $0x2f0] sm:$0xff] }
  0x2f   : > { %v4296_v58 = vpack.c.bf16 %v3415_v55, %v3413_v54  ;;  %v4318_v30 = vpack.c.bf16 %v3434_v29, %v3432_v28 }
  0x30   : > { %400 = vmatmul.mubr.f32.vlgmr.msra.gmra.mrb[0].mxu0 %v5032_v60  ;;  %477 = vmatmul.mubr.f32.vlgmr.msra.gmra.mrb[0].mxu1 %v5034_v61 }
  0x31   : > { %4227 = vmatpush1.bf16.msra.mxu0 %v4226_v62  ;;  %4259 = vmatpush1.bf16.msra.mxu1 %v4226_v62  ;;  %v3414_v62 = vld [vmem:[%s5903_s1 + $0x250] sm:$0xff] }
  0x32   : > { %4229 = vmatprep.subr.bf16.mxu0 %v4228_v63  ;;  %4261 = vmatprep.subr.bf16.mxu1 %v4228_v63  ;;  %v3417_v63 = vld [vmem:[%s5903_s1 + $0x268] sm:$0xff]  ;;  %v4298_v0 = vpack.c.bf16 %v3414_v62, %v3412_v59 }
  0x33   : > { %405 = vmatprep.mubr.f32.mxu0 %v4805_v7  ;;  %482 = vmatprep.mubr.f32.mxu1 %v4805_v7 }
  0x34   : > { %406 = vmatmul.mubr.f32.gmra.mrb[2].mxu0 %v5050_v5  ;;  %483 = vmatmul.mubr.f32.gmra.mrb[2].mxu1 %v5052_v6 }
  0x35   : > { %4231 = vmatpush1.bf16.msra.mxu0 %v4230_v4  ;;  %4263 = vmatpush1.bf16.msra.mxu1 %v4230_v4  ;;  %v3421_v4 = vld [vmem:[%s5903_s1 + $0x288] sm:$0xff] }
  0x36   : > { %4233 = vmatprep.subr.bf16.mxu0 %v4232_v8  ;;  %4265 = vmatprep.subr.bf16.mxu1 %v4232_v8  ;;  %v4302_v8 = vpack.c.bf16 %v3418_v3, %v3416_v2 }
  0x37   : > { %553 = vmatprep.mubr.f32.mxu0 %v4805_v7  ;;  %630 = vmatprep.mubr.f32.mxu1 %v4805_v7 }
  0x39   : > { %4235 = vmatpush1.bf16.msra.mxu0 %v4234_v13  ;;  %4267 = vmatpush1.bf16.msra.mxu1 %v4234_v13  ;;  %v3427_v13 = vld [vmem:[%s5903_s1 + $0x2b8] sm:$0xff] }
  0x3a   : > { %4237 = vmatprep.subr.bf16.mxu0 %v4236_v14  ;;  %4269 = vmatprep.subr.bf16.mxu1 %v4236_v14  ;;  %v4306_v14 = vpack.c.bf16 %v3422_v11, %v3420_v10  ;;  %v4308_v15 = vpack.c.bf16 %v3427_v13, %v3425_v12 }
  0x3d   : > { %4239 = vmatpush1.bf16.msra.mxu0 %v4238_v19  ;;  %4271 = vmatpush1.bf16.msra.mxu1 %v4238_v19  ;;  %v3431_v19 = vld [vmem:[%s5903_s1 + $0x2d8] sm:$0xff] }
  0x3e   : > { %4241 = vmatprep.subr.bf16.mxu0 %v4240_v20  ;;  %4273 = vmatprep.subr.bf16.mxu1 %v4240_v20  ;;  %v4310_v20 = vpack.c.bf16 %v3426_v17, %v3424_v16  ;;  %v4312_v21 = vpack.c.bf16 %v3431_v19, %v3429_v18 }
  0x41   : > { %4243 = vmatpush1.bf16.msra.mxu0 %v4242_v25  ;;  %4275 = vmatpush1.bf16.msra.mxu1 %v4242_v25  ;;  %v3435_v25 = vld [vmem:[%s5903_s1 + $0x2f8] sm:$0xff] }
  0x42   : > { %4245 = vmatprep.subr.bf16.mxu0 %v4244_v26  ;;  %4277 = vmatprep.subr.bf16.mxu1 %v4244_v26  ;;  %v4314_v26 = vpack.c.bf16 %v3430_v23, %v3428_v22  ;;  %v4316_v27 = vpack.c.bf16 %v3435_v25, %v3433_v24 }
  0x45   : > { %4247 = vmatpush1.bf16.msra.mxu0 %v4246_v31  ;;  %4279 = vmatpush1.bf16.msra.mxu1 %v4246_v31  ;;  %v677_v31 = vld [vmem:[#allocation2 + $0x3] ss:$2 sm:$0xff] }
  0x46   : > { %4249 = vmatprep.subr.bf16.mxu0 %v4248_v32  ;;  %4281 = vmatprep.subr.bf16.mxu1 %v4248_v32  ;;  %v679_v32 = vld [vmem:[#allocation2 + $0x13] ss:$2 sm:$0xff] }
  0x49   : > { %4251 = vmatpush1.bf16.msra.mxu0 %v4250_v37  ;;  %4283 = vmatpush1.bf16.msra.mxu1 %v4250_v37 }
  0x4a   : > { %4253 = vmatprep.subr.bf16.mxu0 %v4252_v38  ;;  %4285 = vmatprep.subr.bf16.mxu1 %v4252_v38 }
  0x4d   : > { %4255 = vmatpush1.bf16.msra.mxu0 %v4254_v43  ;;  %4287 = vmatpush1.bf16.msra.mxu1 %v4254_v43 }
  0x4e   : > { %4289 = vmatprep.subr.bf16.mxu0 %v4288_v44  ;;  %4321 = vmatprep.subr.bf16.mxu1 %v4288_v44 }
  0x50   : > { %554 = vmatmul.mubr.f32.vlgmr.msra.gmra.mrb[0].mxu0 %v291_v49  ;;  %631 = vmatmul.mubr.f32.vlgmr.msra.gmra.mrb[0].mxu1 %v5032_v60  ;;  %v3419_v60 = vld [vmem:[%s5903_s1 + $0x278] sm:$0xff] }
  0x51   : > { %4291 = vmatpush1.bf16.msra.mxu0 %v4290_v50  ;;  %4323 = vmatpush1.bf16.msra.mxu1 %v4290_v50  ;;  %v4300_v1 = vpack.c.bf16 %v3419_v60, %v3417_v63 }
  0x52   : > { %4293 = vmatprep.subr.bf16.mxu0 %v4292_v51  ;;  %4325 = vmatprep.subr.bf16.mxu1 %v4292_v51 }
  0x53   : > { %559 = vmatprep.mubr.f32.mxu0 %v4805_v7  ;;  %636 = vmatprep.mubr.f32.mxu1 %v4805_v7 }
  0x54   : > { %560 = vmatmul.mubr.f32.gmra.mrb[2].mxu0 %v293_v57  ;;  %637 = vmatmul.mubr.f32.gmra.mrb[2].mxu1 %v5050_v5  ;;  %v3423_v5 = vld [vmem:[%s5903_s1 + $0x298] sm:$0xff] }
  0x55   : > { %4295 = vmatpush1.bf16.msra.mxu0 %v4294_v56  ;;  %4327 = vmatpush1.bf16.msra.mxu1 %v4294_v56  ;;  %v4304_v9 = vpack.c.bf16 %v3423_v5, %v3421_v4 }
  0x56   : > { %4297 = vmatprep.subr.bf16.mxu0 %v4296_v58  ;;  %4329 = vmatprep.subr.bf16.mxu1 %v4296_v58 }
  0x57   : > { %744 = vmatprep.mubr.f32.mxu0 %v4805_v7  ;;  %821 = vmatprep.mubr.f32.mxu1 %v4805_v7 }
  0x59   : > { %4299 = vmatpush1.bf16.msra.mxu0 %v4298_v0  ;;  %4331 = vmatpush1.bf16.msra.mxu1 %v4298_v0 }
  0x5a   : > { %4301 = vmatprep.subr.bf16.mxu0 %v4300_v1  ;;  %4333 = vmatprep.subr.bf16.mxu1 %v4300_v1 }
  0x5d   : > { %4303 = vmatpush1.bf16.msra.mxu0 %v4302_v8  ;;  %4335 = vmatpush1.bf16.msra.mxu1 %v4302_v8 }
  0x5e   : > { %4305 = vmatprep.subr.bf16.mxu0 %v4304_v9  ;;  %4337 = vmatprep.subr.bf16.mxu1 %v4304_v9 }
  0x61   : > { %4307 = vmatpush1.bf16.msra.mxu0 %v4306_v14  ;;  %4339 = vmatpush1.bf16.msra.mxu1 %v4306_v14 }
  0x62   : > { %4309 = vmatprep.subr.bf16.mxu0 %v4308_v15  ;;  %4341 = vmatprep.subr.bf16.mxu1 %v4308_v15 }
  0x65   : > { %4311 = vmatpush1.bf16.msra.mxu0 %v4310_v20  ;;  %4343 = vmatpush1.bf16.msra.mxu1 %v4310_v20 }
  0x66   : > { %4313 = vmatprep.subr.bf16.mxu0 %v4312_v21  ;;  %4345 = vmatprep.subr.bf16.mxu1 %v4312_v21 }
  0x69   : > { %4315 = vmatpush1.bf16.msra.mxu0 %v4314_v26  ;;  %4347 = vmatpush1.bf16.msra.mxu1 %v4314_v26 }
  0x6a   : > { %4317 = vmatprep.subr.bf16.mxu0 %v4316_v27  ;;  %4349 = vmatprep.subr.bf16.mxu1 %v4316_v27 }
  0x6d   : > { %4319 = vmatpush1.bf16.msra.mxu0 %v4318_v30  ;;  %4351 = vmatpush1.bf16.msra.mxu1 %v4318_v30  ;;  %v919_v30 = vlaneseq }
  0x70   : > { %745 = vmatmul.mubr.f32.vlgmr.msra.gmra.mrb[0].mxu0 %v5034_v61  ;;  %822 = vmatmul.mubr.f32.vlgmr.msra.gmra.mrb[0].mxu1 %v677_v31  ;;  %v920_v31 = vshrl.u32 %v919_v30, 7 }
  0x71   : > { %750 = vmatprep.mubr.f32.mxu0 %v4805_v7  ;;  %827 = vmatprep.mubr.f32.mxu1 %v4805_v7 }
  0x74   : > { %751 = vmatmul.mubr.f32.gmra.mrb[2].mxu0 %v5052_v6  ;;  %828 = vmatmul.mubr.f32.gmra.mrb[2].mxu1 %v679_v32  ;;  %v5279_v32 = vsub.s32 0, %v920_v31 }
  0x75   : > { %3760 = vmatprep.mubr.msk.f32.mxu0 %vm4814_vm4, %v4805_v7  ;;  %3795 = vmatprep.mubr.msk.f32.mxu1 %vm4814_vm4, %v4805_v7 }
 0x143   : > { %v5232_v33 = vpop.f32.mrb[0].mxu0  ;;  %v5234_v34 = vpop.f32.mrb[0].mxu1 }
 0x144   : > { %v993_v35 = vmax.f32 %v5232_v33, %v5234_v34  ;;  %v5238_v36 = vpop.f32.mrb[1].mxu0  ;;  %v5240_v37 = vpop.f32.mrb[1].mxu1 }
 0x145   : > { %v994_v61 = vmax.f32 %v5238_v36, %v5240_v37 }
 0x147   : > { %v5244_v38 = vmax.f32 %v993_v35, %v994_v61  ;;  %v5246_v39 = vpop.f32.mrb[2].mxu0  ;;  %v5248_v6 = vpop.f32.mrb[2].mxu1 }
 0x148   : > { %v842_v40 = vadd.f32 %v5246_v39, %v5232_v33  ;;  %v856_v41 = vadd.f32 %v5248_v6, %v5234_v34  ;;  %v995_v42 = vmax.f32 %v5246_v39, %v5248_v6  ;;  %v5256_v43 = vpop.f32.mrb[3].mxu0  ;;  %v5258_v44 = vpop.f32.mrb[3].mxu1 }
 0x149   : > { %v849_v45 = vadd.f32 %v5256_v43, %v5238_v36  ;;  %v863_v46 = vadd.f32 %v5258_v44, %v5240_v37  ;;  %v996_v47 = vmax.f32 %v5256_v43, %v5258_v44 }
 0x14a   : > { %v843_v48 = vrot.slane %v842_v40, 4  ;;  %v857_v49 = vrot.slane %v856_v41, 4 }
 0x14b   : > { %v850_v50 = vrot.slane %v849_v45, 4  ;;  %v864_v51 = vrot.slane %v863_v46, 4  ;;  %v5266_v52 = vmax.f32 %v995_v42, %v996_v47 }
 0x14c   : > { %v844_v53 = vadd.f32 %v843_v48, %v842_v40  ;;  %v858_v54 = vadd.f32 %v857_v49, %v856_v41 }
 0x14d   : > { %v851_v55 = vadd.f32 %v850_v50, %v849_v45  ;;  %v865_v56 = vadd.f32 %v864_v51, %v863_v46 }
 0x14e   : > { %v845_v57 = vrot.slane %v844_v53, 2  ;;  %v859_v58 = vrot.slane %v858_v54, 2 }
 0x14f   : > { %v852_v59 = vrot.slane %v851_v55, 2  ;;  %v866_v62 = vrot.slane %v865_v56, 2 }
 0x150   : > { %v846_v63 = vadd.f32 %v845_v57, %v844_v53  ;;  %v860_v60 = vadd.f32 %v859_v58, %v858_v54 }
 0x151   : > { %v853_v0 = vadd.f32 %v852_v59, %v851_v55  ;;  %v867_v1 = vadd.f32 %v866_v62, %v865_v56 }
 0x152   : > { %v847_v2 = vrot.slane %v846_v63, 1  ;;  %v861_v3 = vrot.slane %v860_v60, 1 }
 0x153   : > { %v854_v4 = vrot.slane %v853_v0, 1  ;;  %v868_v5 = vrot.slane %v867_v1, 1 }
 0x154   : > { %v848_v8 = vadd.f32 %v847_v2, %v846_v63  ;;  %v862_v9 = vadd.f32 %v861_v3, %v860_v60 }
 0x155   : > { %v855_v10 = vadd.f32 %v854_v4, %v853_v0  ;;  %v869_v11 = vadd.f32 %v868_v5, %v867_v1 }
 0x156   : > { %v870_v12 = vadd.f32 %v862_v9, %v848_v8 }
 0x157   : > { %v871_v13 = vadd.f32 %v869_v11, %v855_v10 }
 0x159   : > { %v872_v14 = vadd.f32 %v871_v13, %v870_v12 }
 0x15b   : > { %874 = vrot.lane.b32.xlu0 %v872_v14, %s4806_s13 }
 0x1cd   : > { %v875_v15 = vpop.permute.xlu0 %874 }
 0x1ce   : > { %v877_v16 = vadd.f32 %v875_v15, %v872_v14 }
 0x1d0   : > { %879 = vrot.lane.b32.xlu0 %v877_v16, %s4807_s14 }
 0x242   : > { %v880_v17 = vpop.permute.xlu0 %879 }
 0x243   : > { %v882_v18 = vadd.f32 %v880_v17, %v877_v16 }
 0x245   : > { %884 = vrot.lane.b32.xlu1 %v882_v18, %s4808_s15 }
 0x2b7   : > { %v885_v19 = vpop.permute.xlu1 %884 }
 0x2b8   : > { %v887_v20 = vadd.f32 %v885_v19, %v882_v18 }
 0x2ba   : > { %889 = vrot.lane.b32.xlu1 %v887_v20, %s4809_s16 }
 0x32c   : > { %v890_v21 = vpop.permute.xlu1 %889 }
 0x32d   : > { %v892_v22 = vadd.f32 %v890_v21, %v887_v20 }
 0x32f   : > { %v894_v23 = vmul.f32 0.0009765625, %v892_v22 }
 0x331   : > { %896 = vrot.lane.b32.xlu0 %v894_v23, %s4810_s17 }
 0x3a3   : > { %v897_v24 = vpop.permute.xlu0 %896 }
 0x3a4   : > { %v900_v25 = vsel %vm899_vm0, %v894_v23, %v897_v24 }
 0x3a5   : > { %902 = vrot.lane.b32.xlu1 %v900_v25, %s4811_s18 }
 0x417   : > { %v903_v26 = vpop.permute.xlu1 %902 }
 0x418   : > { %v906_v27 = vsel %vm905_vm1, %v900_v25, %v903_v26 }
 0x419   : > { %908 = vrot.lane.b32.xlu0 %v906_v27, %s4812_s19 }
 0x48b   : > { %v909_v28 = vpop.permute.xlu0 %908 }
 0x48c   : > { %v912_v29 = vsel %vm911_vm2, %v906_v27, %v909_v28 }
 0x48d   : > { %914 = vrot.lane.b32.xlu1 %v912_v29, %s4806_s13 }
 0x4ff   : > { %v915_v35 = vpop.permute.xlu1 %914 }
 0x500   : > { %v918_v61 = vsel %vm917_vm3, %v912_v29, %v915_v35 }
 0x501   : > { %v5283_v40 = vrot.slane %v918_v61, %v5279_v32 }
 0x503   : > { %v923_v41 = vsub.f32 %v5232_v33, %v5283_v40  ;;  %v924_v42 = vsub.f32 %v5238_v36, %v5283_v40  ;;  %v925_v45 = vsub.f32 %v5246_v39, %v5283_v40  ;;  %v926_v46 = vsub.f32 %v5256_v43, %v5283_v40 }
 0x504   : > { %v927_v47 = vsub.f32 %v5234_v34, %v5283_v40  ;;  %v928_v48 = vsub.f32 %v5240_v37, %v5283_v40  ;;  %v929_v49 = vsub.f32 %v5248_v6, %v5283_v40  ;;  %v930_v33 = vsub.f32 %v5258_v44, %v5283_v40 }
 0x505   : > { %v931_v50 = vmul.f32 %v923_v41, %v923_v41  ;;  %v932_v36 = vmul.f32 %v924_v42, %v924_v42  ;;  %v933_v51 = vmul.f32 %v925_v45, %v925_v45  ;;  %v934_v53 = vmul.f32 %v926_v46, %v926_v46  ;;  %v3438_v46 = vld [vmem:[%s5904_s2 + $0x80] sm:$0xff] }
 0x506   : > { %v949_v39 = vmul.f32 %v927_v47, %v927_v47  ;;  %v950_v54 = vmul.f32 %v928_v48, %v928_v48  ;;  %v951_v55 = vmul.f32 %v929_v49, %v929_v49  ;;  %v952_v43 = vmul.f32 %v930_v33, %v930_v33  ;;  %v3439_v47 = vld [vmem:[%s5904_s2 + $0x88] sm:$0xff] }
 0x507   : > { %v935_v56 = vadd.f32 %v933_v51, %v931_v50  ;;  %v942_v57 = vadd.f32 %v934_v53, %v932_v36  ;;  %v1019_v34 = vsub.f32 %v5244_v38, %v5283_v40  ;;  %v1020_v37 = vsub.f32 %v5266_v52, %v5283_v40  ;;  %v3440_v36 = vld [vmem:[%s5904_s2 + $0x90] sm:$0xff]  ;;  %v3441_v51 = vld [vmem:[%s5904_s2 + $0x98] sm:$0xff]  ;;  %v1043_v38 = vld [vmem:[%s5904_s2] sm:$0xff] }
 0x508   : > { %v953_v6 = vadd.f32 %v951_v55, %v949_v39  ;;  %v960_v58 = vadd.f32 %v952_v43, %v950_v54  ;;  %v4813_v48 = vmov 0.0|0.0   ;;  %v4353_v49 = vpack.c.bf16 %v3439_v47, %v3438_v46  ;;  %v3442_v39 = vld [vmem:[%s5904_s2 + $0xa0] sm:$0xff]  ;;  %v3443_v54 = vld [vmem:[%s5904_s2 + $0xa8] sm:$0xff]  ;;  %v1054_v46 = vld [vmem:[%s5904_s2 + $0x58] sm:$0xff] }
 0x509   : > { %v936_v59 = vrot.slane %v935_v56, 4  ;;  %v943_v44 = vrot.slane %v942_v57, 4  ;;  %4352 = vmatprep.subr.bf16.mxu0 %v4813_v48  ;;  %4376 = vmatprep.subr.bf16.mxu1 %v4813_v48  ;;  %v4356_v53 = vpack.c.bf16 %v3441_v51, %v3440_v36  ;;  %v4359_v55 = vpack.c.bf16 %v3443_v54, %v3442_v39  ;;  %v1044_v52 = vld [vmem:[%s5904_s2 + $0x8] sm:$0xff]  ;;  %v1057_v36 = vld [vmem:[%s5904_s2 + $0x70] sm:$0xff]  ;;  %v1058_v51 = vld [vmem:[%s5904_s2 + $0x78] sm:$0xff] }
 0x50a   : > { %v954_v62 = vrot.slane %v953_v6, 4  ;;  %v961_v63 = vrot.slane %v960_v58, 4  ;;  %4354 = vmatpush3.bf16.msra.mxu0 %v4353_v49  ;;  %4378 = vmatpush3.bf16.msra.mxu1 %v4353_v49  ;;  %v4401_v40 = vpack.c.bf16 %v1044_v52, %v1043_v38  ;;  %v1055_v49 = vld [vmem:[%s5904_s2 + $0x60] sm:$0xff]  ;;  %v3455_v54 = vld [vmem:[%s5904_s2 + $0x108] sm:$0xff] }
 0x50b   : > { %v937_v60 = vadd.f32 %v936_v59, %v935_v56  ;;  %v944_v0 = vadd.f32 %v943_v44, %v942_v57  ;;  %4355 = vmatprep.subr.bf16.mxu0 %v4813_v48  ;;  %4379 = vmatprep.subr.bf16.mxu1 %v4813_v48  ;;  %v3444_v56 = vld [vmem:[%s5904_s2 + $0xb0] sm:$0xff]  ;;  %v3445_v57 = vld [vmem:[%s5904_s2 + $0xb8] sm:$0xff]  ;;  %v3446_v59 = vld [vmem:[%s5904_s2 + $0xc0] sm:$0xff] }
 0x50c   : > { %v955_v1 = vadd.f32 %v954_v62, %v953_v6  ;;  %v962_v2 = vadd.f32 %v961_v63, %v960_v58  ;;  %v4362_v58 = vpack.c.bf16 %v3445_v57, %v3444_v56  ;;  %v3447_v44 = vld [vmem:[%s5904_s2 + $0xc8] sm:$0xff]  ;;  %v3448_v63 = vld [vmem:[%s5904_s2 + $0xd0] sm:$0xff]  ;;  %v3454_v39 = vld [vmem:[%s5904_s2 + $0x100] sm:$0xff] }
 0x50d   : > { %v938_v3 = vrot.slane %v937_v60, 2  ;;  %v945_v4 = vrot.slane %v944_v0, 2  ;;  %v4365_v62 = vpack.c.bf16 %v3447_v44, %v3446_v59  ;;  %v3457_v56 = vld [vmem:[%s5904_s2 + $0x118] sm:$0xff]  ;;  %v3459_v59 = vld [vmem:[%s5904_s2 + $0x128] sm:$0xff] }
 0x50e   : > { %v956_v5 = vrot.slane %v955_v1, 2  ;;  %v963_v8 = vrot.slane %v962_v2, 2  ;;  %4357 = vmatpush3.bf16.msra.mxu0 %v4356_v53  ;;  %4381 = vmatpush3.bf16.msra.mxu1 %v4356_v53  ;;  %v4422_v53 = vpack.c.bf16 %v1058_v51, %v1057_v36 }
 0x50f   : > { %v939_v9 = vadd.f32 %v938_v3, %v937_v60  ;;  %v946_v10 = vadd.f32 %v945_v4, %v944_v0  ;;  %4358 = vmatprep.subr.bf16.mxu0 %v4813_v48  ;;  %4382 = vmatprep.subr.bf16.mxu1 %v4813_v48  ;;  %v3449_v60 = vld [vmem:[%s5904_s2 + $0xd8] sm:$0xff]  ;;  %v3452_v4 = vld [vmem:[%s5904_s2 + $0xf0] sm:$0xff] }
 0x510   : > { %v957_v11 = vadd.f32 %v956_v5, %v955_v1  ;;  %v964_v12 = vadd.f32 %v963_v8, %v962_v2  ;;  %v4368_v0 = vpack.c.bf16 %v3449_v60, %v3448_v63  ;;  %v3450_v1 = vld [vmem:[%s5904_s2 + $0xe0] sm:$0xff]  ;;  %v3451_v2 = vld [vmem:[%s5904_s2 + $0xe8] sm:$0xff]  ;;  %v3453_v5 = vld [vmem:[%s5904_s2 + $0xf8] sm:$0xff] }
 0x511   : > { %v940_v13 = vrot.slane %v939_v9, 1  ;;  %v947_v14 = vrot.slane %v946_v10, 1  ;;  %v4371_v3 = vpack.c.bf16 %v3451_v2, %v3450_v1  ;;  %v4374_v8 = vpack.c.bf16 %v3453_v5, %v3452_v4  ;;  %v3461_v63 = vld [vmem:[%s5904_s2 + $0x138] sm:$0xff]  ;;  %v3463_v1 = vld [vmem:[%s5904_s2 + $0x148] sm:$0xff] }
 0x512   : > { %v958_v15 = vrot.slane %v957_v11, 1  ;;  %v965_v16 = vrot.slane %v964_v12, 1  ;;  %4360 = vmatpush3.bf16.msra.mxu0 %v4359_v55  ;;  %4384 = vmatpush3.bf16.msra.mxu1 %v4359_v55  ;;  %v4449_v55 = vpack.c.bf16 %v3455_v54, %v3454_v39  ;;  %v3465_v4 = vld [vmem:[%s5904_s2 + $0x158] sm:$0xff] }
 0x513   : > { %v941_v17 = vadd.f32 %v940_v13, %v939_v9  ;;  %v948_v18 = vadd.f32 %v947_v14, %v946_v10  ;;  %4361 = vmatprep.subr.bf16.mxu0 %v4813_v48  ;;  %4385 = vmatprep.subr.bf16.mxu1 %v4813_v48 }
 0x514   : > { %v959_v19 = vadd.f32 %v958_v15, %v957_v11  ;;  %v966_v20 = vadd.f32 %v965_v16, %v964_v12 }
 0x516   : > { %v967_v21 = vadd.f32 %v959_v19, %v941_v17  ;;  %v968_v22 = vadd.f32 %v966_v20, %v948_v18  ;;  %4363 = vmatpush3.bf16.msra.mxu0 %v4362_v58  ;;  %4387 = vmatpush3.bf16.msra.mxu1 %v4362_v58  ;;  %v3458_v58 = vld [vmem:[%s5904_s2 + $0x120] sm:$0xff] }
 0x517   : > { %4364 = vmatprep.subr.bf16.mxu0 %v4813_v48  ;;  %4388 = vmatprep.subr.bf16.mxu1 %v4813_v48  ;;  %v4455_v44 = vpack.c.bf16 %v3459_v59, %v3458_v58 }
 0x518   : > { %v969_v23 = vadd.f32 %v968_v22, %v967_v21 }
 0x51a   : > { %971 = vrot.lane.b32.xlu0 %v969_v23, %s4806_s13  ;;  %4366 = vmatpush3.bf16.msra.mxu0 %v4365_v62 }
 0x51b   : > { %4390 = vmatpush3.bf16.msra.mxu1 %v4365_v62  ;;  %4367 = vmatprep.subr.bf16.mxu0 %v4813_v48  ;;  %v3460_v62 = vld [vmem:[%s5904_s2 + $0x130] sm:$0xff] }
 0x51c   : > { %4391 = vmatprep.subr.bf16.mxu1 %v4813_v48  ;;  %v4458_v60 = vpack.c.bf16 %v3461_v63, %v3460_v62 }
 0x51e   : > { %4369 = vmatpush3.bf16.msra.mxu0 %v4368_v0 }
 0x51f   : > { %4393 = vmatpush3.bf16.msra.mxu1 %v4368_v0  ;;  %4370 = vmatprep.subr.bf16.mxu0 %v4813_v48  ;;  %v3462_v0 = vld [vmem:[%s5904_s2 + $0x140] sm:$0xff] }
 0x520   : > { %4394 = vmatprep.subr.bf16.mxu1 %v4813_v48  ;;  %v4461_v2 = vpack.c.bf16 %v3463_v1, %v3462_v0 }
 0x522   : > { %4372 = vmatpush3.bf16.msra.mxu0 %v4371_v3 }
 0x523   : > { %4396 = vmatpush3.bf16.msra.mxu1 %v4371_v3  ;;  %4373 = vmatprep.subr.bf16.mxu0 %v4813_v48  ;;  %v3464_v3 = vld [vmem:[%s5904_s2 + $0x150] sm:$0xff] }
 0x524   : > { %4397 = vmatprep.subr.bf16.mxu1 %v4813_v48  ;;  %v4464_v5 = vpack.c.bf16 %v3465_v4, %v3464_v3 }
 0x526   : > { %4375 = vmatpush3.bf16.msra.mxu0 %v4374_v8 }
 0x527   : > { %4399 = vmatpush3.bf16.msra.mxu1 %v4374_v8  ;;  %4400 = vmatprep.subr.bf16.mxu0 %v4813_v48  ;;  %v3466_v8 = vld [vmem:[%s5904_s2 + $0x160] sm:$0xff] }
 0x528   : > { %4424 = vmatprep.subr.bf16.mxu1 %v4813_v48 }
 0x58c   : > { %v972_v24 = vpop.permute.xlu0 %971 }
 0x58d   : > { %v974_v25 = vadd.f32 %v972_v24, %v969_v23 }
 0x58f   : > { %976 = vrot.lane.b32.xlu1 %v974_v25, %s4807_s14 }
 0x601   : > { %v977_v26 = vpop.permute.xlu1 %976 }
 0x602   : > { %v979_v27 = vadd.f32 %v977_v26, %v974_v25 }
 0x604   : > { %981 = vrot.lane.b32.xlu0 %v979_v27, %s4808_s15 }
 0x676   : > { %v982_v28 = vpop.permute.xlu0 %981 }
 0x677   : > { %v984_v29 = vadd.f32 %v982_v28, %v979_v27  ;;  %v1047_v27 = vld [vmem:[%s5904_s2 + $0x20] sm:$0xff]  ;;  %v1048_v28 = vld [vmem:[%s5904_s2 + $0x28] sm:$0xff] }
 0x679   : > { %986 = vrot.lane.b32.xlu1 %v984_v29, %s4809_s16 }
 0x6eb   : > { %v987_v30 = vpop.permute.xlu1 %986 }
 0x6ec   : > { %v989_v31 = vadd.f32 %v987_v30, %v984_v29  ;;  %v4407_v29 = vpack.c.bf16 %v1048_v28, %v1047_v27  ;;  %v1049_v30 = vld [vmem:[%s5904_s2 + $0x30] sm:$0xff] }
 0x6ee   : > { %v990_v35 = vmul.f32 0.0009765625, %v989_v31  ;;  %v1050_v31 = vld [vmem:[%s5904_s2 + $0x38] sm:$0xff] }
 0x6f0   : > { %v991_v61 = vadd.f32 1e-05, %v990_v35  ;;  %v4410_v35 = vpack.c.bf16 %v1050_v31, %v1049_v30 }
 0x6f2   : > { %4719 = vrsqrt.f32 %v991_v61  ;;  %v1051_v61 = vld [vmem:[%s5904_s2 + $0x40] sm:$0xff] }
 0x6fc   : > { %v4720_v41 = vpop.eup %4719 }
 0x6fd   : > { %1000 = vrot.lane.b32.xlu0 %v4720_v41, %s4810_s17 }
 0x76f   : > { %v1001_v42 = vpop.permute.xlu0 %1000 }
 0x770   : > { %v1003_v45 = vsel %vm899_vm0, %v4720_v41, %v1001_v42  ;;  %v1052_v41 = vld [vmem:[%s5904_s2 + $0x48] sm:$0xff] }
 0x771   : > { %1005 = vrot.lane.b32.xlu1 %v1003_v45, %s4811_s18  ;;  %v4413_v42 = vpack.c.bf16 %v1052_v41, %v1051_v61 }
 0x7e3   : > { %v1006_v33 = vpop.permute.xlu1 %1005 }
 0x7e4   : > { %v1008_v50 = vsel %vm905_vm1, %v1003_v45, %v1006_v33  ;;  %v1053_v45 = vld [vmem:[%s5904_s2 + $0x50] sm:$0xff]  ;;  %v1056_v33 = vld [vmem:[%s5904_s2 + $0x68] sm:$0xff] }
 0x7e5   : > { %1010 = vrot.lane.b32.xlu0 %v1008_v50, %s4812_s19  ;;  %v4416_v47 = vpack.c.bf16 %v1054_v46, %v1053_v45 }
 0x857   : > { %v1011_v43 = vpop.permute.xlu0 %1010 }
 0x858   : > { %v1013_v6 = vsel %vm911_vm2, %v1008_v50, %v1011_v43  ;;  %v4419_v50 = vpack.c.bf16 %v1056_v33, %v1055_v49  ;;  %v3456_v43 = vld [vmem:[%s5904_s2 + $0x110] sm:$0xff] }
 0x859   : > { %1015 = vrot.lane.b32.xlu1 %v1013_v6, %s4806_s13 }
 0x8cb   : > { %v1016_v9 = vpop.permute.xlu1 %1015 }
 0x8cc   : > { %v1018_v10 = vsel %vm917_vm3, %v1013_v6, %v1016_v9  ;;  %v4452_v6 = vpack.c.bf16 %v3457_v56, %v3456_v43  ;;  %v3467_v9 = vld [vmem:[%s5904_s2 + $0x168] sm:$0xff] }
 0x8cd   : > { %v1024_v11 = vrot.slane %v1018_v10, %v5279_v32  ;;  %v4467_v10 = vpack.c.bf16 %v3467_v9, %v3466_v8 }
 0x8cf   : > { %v1025_v12 = vmul.f32 %v1024_v11, %v1019_v34  ;;  %v1026_v13 = vmul.f32 %v1024_v11, %v1020_v37  ;;  %v1045_v34 = vld [vmem:[%s5904_s2 + $0x10] sm:$0xff]  ;;  %v1046_v37 = vld [vmem:[%s5904_s2 + $0x18] sm:$0xff] }
 0x8d0   : > { %v4404_v26 = vpack.c.bf16 %v1046_v37, %v1045_v34  ;;  %v3468_v11 = vld [vmem:[%s5904_s2 + $0x170] sm:$0xff] }
 0x8d1   : > { %v1029_v14 = vmin.f32 %v1025_v12, 0.0  ;;  %v1030_v15 = vmin.f32 %v1026_v13, 0.0  ;;  %vm1027_vm5 = vcmp.gt.f32.partialorder %v1025_v12, 0.0  ;;  %vm1028_vm6 = vcmp.gt.f32.partialorder %v1026_v13, 0.0 }
 0x8d3   : > { %v1031_v16 = vmul.f32 1.442695, %v1029_v14  ;;  %v1033_v17 = vmul.f32 1.442695, %v1030_v15 }
 0x8d5   : > { %4721 = vpow2.f32 %v1031_v16 }
 0x8d6   : > { %4723 = vpow2.f32 %v1033_v17 }
 0x8df   : > { %v4722_v18 = vpop.eup %4721 }
 0x8e0   : > { %v4724_v19 = vpop.eup %4723  ;;  %v3436_v20 = vadd.f32 -1.0, %v4722_v18 }
 0x8e1   : > { %v3437_v21 = vadd.f32 -1.0, %v4724_v19 }
 0x8e2   : > { %v1037_v22 = vsel %vm1027_vm5, %v1025_v12, %v3436_v20  ;;  %v3469_v12 = vld [vmem:[%s5904_s2 + $0x178] sm:$0xff] }
 0x8e3   : > { %v1038_v23 = vsel %vm1028_vm6, %v1026_v13, %v3437_v21  ;;  %1041 = vst [vmem:[#allocation3 + $0x1] sm:$0xff] %v1037_v22  ;;  %v4470_v13 = vpack.c.bf16 %v3469_v12, %v3468_v11 }
 0x8e4   : > { %1042 = vst [vmem:[#allocation3 + $0x9] sm:$0xff] %v1038_v23 }
 0x8eb   : > { %v5406_v24 = vld [vmem:[#allocation3 + $0x1] ss:$2 sm:$0xff]  ;;  %v5408_v25 = vld [vmem:[#allocation3 + $0x2] ss:$2 sm:$0xff] }
 0x8ec   : > { %3761 = vmatmul.mubr.f32.vlgmr.msra.gmra.mrb[4].mxu0 %v5406_v24  ;;  %3796 = vmatmul.mubr.f32.vlgmr.msra.gmra.mrb[4].mxu1 %v5408_v25  ;;  %v1059_v57 = vld [vmem:[#allocation3] ss:$2 sm:$0xff]  ;;  %v1379_v14 = vld [vmem:[#allocation3 + $0x3] ss:$2 sm:$0xff] }
 0x8ed   : > { %4402 = vmatpush3.bf16.msra.mxu0 %v4401_v40  ;;  %4426 = vmatpush3.bf16.msra.mxu1 %v4401_v40 }
 0x8ee   : > { %4403 = vmatprep.subr.bf16.mxu0 %v4813_v48  ;;  %4427 = vmatprep.subr.bf16.mxu1 %v4813_v48 }
 0x8ef   : > { %3830 = vmatprep.mubr.msk.f32.mxu0 %vm4814_vm4, %v4805_v7  ;;  %3865 = vmatprep.mubr.msk.f32.mxu1 %vm4814_vm4, %v4805_v7 }
 0x8f1   : > { %4405 = vmatpush3.bf16.msra.mxu0 %v4404_v26  ;;  %4429 = vmatpush3.bf16.msra.mxu1 %v4404_v26 }
 0x8f2   : > { %4406 = vmatprep.subr.bf16.mxu0 %v4813_v48  ;;  %4430 = vmatprep.subr.bf16.mxu1 %v4813_v48 }
 0x8f5   : > { %4408 = vmatpush3.bf16.msra.mxu0 %v4407_v29  ;;  %4432 = vmatpush3.bf16.msra.mxu1 %v4407_v29 }
 0x8f6   : > { %4409 = vmatprep.subr.bf16.mxu0 %v4813_v48  ;;  %4433 = vmatprep.subr.bf16.mxu1 %v4813_v48 }
 0x8f9   : > { %4411 = vmatpush3.bf16.msra.mxu0 %v4410_v35  ;;  %4435 = vmatpush3.bf16.msra.mxu1 %v4410_v35 }
 0x8fa   : > { %4412 = vmatprep.subr.bf16.mxu0 %v4813_v48  ;;  %4436 = vmatprep.subr.bf16.mxu1 %v4813_v48 }
 0x8fd   : > { %4414 = vmatpush3.bf16.msra.mxu0 %v4413_v42  ;;  %4438 = vmatpush3.bf16.msra.mxu1 %v4413_v42 }
 0x8fe   : > { %4415 = vmatprep.subr.bf16.mxu0 %v4813_v48  ;;  %4439 = vmatprep.subr.bf16.mxu1 %v4813_v48 }
 0x901   : > { %4417 = vmatpush3.bf16.msra.mxu0 %v4416_v47  ;;  %4441 = vmatpush3.bf16.msra.mxu1 %v4416_v47 }
 0x902   : > { %4418 = vmatprep.subr.bf16.mxu0 %v4813_v48  ;;  %4442 = vmatprep.subr.bf16.mxu1 %v4813_v48 }
 0x905   : > { %4420 = vmatpush3.bf16.msra.mxu0 %v4419_v50  ;;  %4444 = vmatpush3.bf16.msra.mxu1 %v4419_v50 }
 0x906   : > { %4421 = vmatprep.subr.bf16.mxu0 %v4813_v48  ;;  %4445 = vmatprep.subr.bf16.mxu1 %v4813_v48 }
 0x909   : > { %4423 = vmatpush3.bf16.msra.mxu0 %v4422_v53  ;;  %4447 = vmatpush3.bf16.msra.mxu1 %v4422_v53 }
 0x90a   : > { %4448 = vmatprep.subr.bf16.mxu0 %v4813_v48  ;;  %4472 = vmatprep.subr.bf16.mxu1 %v4813_v48 }
 0x90c   : > { %3831 = vmatmul.mubr.f32.vlgmr.msra.gmra.mrb[4].mxu0 %v1059_v57  ;;  %3866 = vmatmul.mubr.f32.vlgmr.msra.gmra.mrb[4].mxu1 %v5406_v24 }
 0x90d   : > { %4450 = vmatpush3.bf16.msra.mxu0 %v4449_v55  ;;  %4474 = vmatpush3.bf16.msra.mxu1 %v4449_v55 }
 0x90e   : > { %4451 = vmatprep.subr.bf16.mxu0 %v4813_v48  ;;  %4475 = vmatprep.subr.bf16.mxu1 %v4813_v48 }
 0x90f   : > { %3900 = vmatprep.mubr.msk.f32.mxu0 %vm4814_vm4, %v4805_v7  ;;  %3935 = vmatprep.mubr.msk.f32.mxu1 %vm4814_vm4, %v4805_v7 }
 0x911   : > { %4453 = vmatpush3.bf16.msra.mxu0 %v4452_v6  ;;  %4477 = vmatpush3.bf16.msra.mxu1 %v4452_v6 }
 0x912   : > { %4454 = vmatprep.subr.bf16.mxu0 %v4813_v48  ;;  %4478 = vmatprep.subr.bf16.mxu1 %v4813_v48 }
 0x915   : > { %4456 = vmatpush3.bf16.msra.mxu0 %v4455_v44  ;;  %4480 = vmatpush3.bf16.msra.mxu1 %v4455_v44 }
 0x916   : > { %4457 = vmatprep.subr.bf16.mxu0 %v4813_v48  ;;  %4481 = vmatprep.subr.bf16.mxu1 %v4813_v48 }
 0x919   : > { %4459 = vmatpush3.bf16.msra.mxu0 %v4458_v60  ;;  %4483 = vmatpush3.bf16.msra.mxu1 %v4458_v60 }
 0x91a   : > { %4460 = vmatprep.subr.bf16.mxu0 %v4813_v48  ;;  %4484 = vmatprep.subr.bf16.mxu1 %v4813_v48 }
 0x91d   : > { %4462 = vmatpush3.bf16.msra.mxu0 %v4461_v2  ;;  %4486 = vmatpush3.bf16.msra.mxu1 %v4461_v2 }
 0x91e   : > { %4463 = vmatprep.subr.bf16.mxu0 %v4813_v48  ;;  %4487 = vmatprep.subr.bf16.mxu1 %v4813_v48 }
 0x921   : > { %4465 = vmatpush3.bf16.msra.mxu0 %v4464_v5  ;;  %4489 = vmatpush3.bf16.msra.mxu1 %v4464_v5 }
 0x922   : > { %4466 = vmatprep.subr.bf16.mxu0 %v4813_v48  ;;  %4490 = vmatprep.subr.bf16.mxu1 %v4813_v48 }
 0x925   : > { %4468 = vmatpush3.bf16.msra.mxu0 %v4467_v10  ;;  %4492 = vmatpush3.bf16.msra.mxu1 %v4467_v10 }
 0x926   : > { %4469 = vmatprep.subr.bf16.mxu0 %v4813_v48  ;;  %4493 = vmatprep.subr.bf16.mxu1 %v4813_v48 }
 0x929   : > { %4471 = vmatpush3.bf16.msra.mxu0 %v4470_v13  ;;  %4495 = vmatpush3.bf16.msra.mxu1 %v4470_v13 }
 0x92a   : > { %4496 = vmatprep.subr.bf16.mxu0 %v4813_v48  ;;  %4508 = vmatprep.subr.bf16.mxu1 %v4813_v48 }
 0x92c   : > { %3901 = vmatmul.mubr.f32.vlgmr.msra.gmra.mrb[4].mxu0 %v5408_v25  ;;  %3936 = vmatmul.mubr.f32.vlgmr.msra.gmra.mrb[4].mxu1 %v1379_v14 }
 0x92d   : > { %3954 = vmatprep.mubr.msk.f32.mxu0 %vm4814_vm4, %v4805_v7  ;;  %3973 = vmatprep.mubr.msk.f32.mxu1 %vm4814_vm4, %v4805_v7 }
 0x9ff   : > { %v1446_v15 = vpop.f32.mrb[4].mxu0  ;;  %v1516_v16 = vpop.f32.mrb[4].mxu1 }
 0xa00   : > { %v1522_v17 = vrot.slane %v1446_v15, 4  ;;  %v1528_v18 = vrot.slane %v1516_v16, 4  ;;  %v3902_v19 = vpop.f32.mrb[5].mxu0  ;;  %v3937_v20 = vpop.f32.mrb[5].mxu1  ;;  %v5542_v21 = vmax.f32 %v1446_v15, %v1516_v16 }
 0xa02   : > { %v1523_v22 = vadd.f32 %v1522_v17, %v1446_v15  ;;  %v1529_v23 = vadd.f32 %v1528_v18, %v1516_v16 }
 0xa04   : > { %v1524_v38 = vrot.slane %v1523_v22, 2  ;;  %v1530_v52 = vrot.slane %v1529_v23, 2 }
 0xa06   : > { %v1525_v40 = vadd.f32 %v1524_v38, %v1523_v22  ;;  %v1531_v34 = vadd.f32 %v1530_v52, %v1529_v23  ;;  %v3471_v23 = vld [vmem:[%s5905_s3 + $0x40] sm:$0xff]  ;;  %v3472_v38 = vld [vmem:[%s5905_s3 + $0x48] sm:$0xff] }
 0xa07   : > { %v4497_v52 = vpack.c.bf16 %v3472_v38, %v3471_v23 }
 0xa08   : > { %v1526_v37 = vrot.slane %v1525_v40, 1  ;;  %v1532_v24 = vrot.slane %v1531_v34, 1 }
 0xa09   : > { %4498 = vmatpush3.bf16.msra.mxu0 %v4497_v52  ;;  %4510 = vmatpush3.bf16.msra.mxu1 %v4497_v52 }
 0xa0a   : > { %v1527_v25 = vadd.f32 %v1526_v37, %v1525_v40  ;;  %v1533_v26 = vadd.f32 %v1532_v24, %v1531_v34  ;;  %4499 = vmatprep.subr.bf16.mxu0 %v4813_v48  ;;  %4511 = vmatprep.subr.bf16.mxu1 %v4813_v48  ;;  %v3473_v40 = vld [vmem:[%s5905_s3 + $0x50] sm:$0xff]  ;;  %v3474_v34 = vld [vmem:[%s5905_s3 + $0x58] sm:$0xff]  ;;  %v3475_v24 = vld [vmem:[%s5905_s3 + $0x60] sm:$0xff] }
 0xa0b   : > { %v4500_v37 = vpack.c.bf16 %v3474_v34, %v3473_v40 }
 0xa0c   : > { %v1534_v27 = vadd.f32 %v1533_v26, %v1527_v25  ;;  %v3476_v25 = vld [vmem:[%s5905_s3 + $0x68] sm:$0xff] }
 0xa0d   : > { %4501 = vmatpush3.bf16.msra.mxu0 %v4500_v37  ;;  %4513 = vmatpush3.bf16.msra.mxu1 %v4500_v37  ;;  %v4503_v26 = vpack.c.bf16 %v3476_v25, %v3475_v24 }
 0xa0e   : > { %1536 = vrot.lane.b32.xlu0 %v1534_v27, %s4806_s13  ;;  %4502 = vmatprep.subr.bf16.mxu0 %v4813_v48 }
 0xa0f   : > { %4514 = vmatprep.subr.bf16.mxu1 %v4813_v48 }
 0xa11   : > { %4504 = vmatpush3.bf16.msra.mxu0 %v4503_v26  ;;  %4516 = vmatpush3.bf16.msra.mxu1 %v4503_v26 }
 0xa12   : > { %4505 = vmatprep.subr.bf16.mxu0 %v4813_v48  ;;  %4517 = vmatprep.subr.bf16.mxu1 %v4813_v48 }
 0xa80   : > { %v1537_v28 = vpop.permute.xlu0 %1536 }
 0xa81   : > { %v1539_v29 = vadd.f32 %v1537_v28, %v1534_v27  ;;  %v3477_v27 = vld [vmem:[%s5905_s3 + $0x70] sm:$0xff]  ;;  %v3478_v28 = vld [vmem:[%s5905_s3 + $0x78] sm:$0xff] }
 0xa83   : > { %1541 = vrot.lane.b32.xlu1 %v1539_v29, %s4807_s14 }
 0xaf5   : > { %v1542_v30 = vpop.permute.xlu1 %1541 }
 0xaf6   : > { %v1544_v31 = vadd.f32 %v1542_v30, %v1539_v29  ;;  %v4506_v29 = vpack.c.bf16 %v3478_v28, %v3477_v27 }
 0xaf8   : > { %1546 = vrot.lane.b32.xlu0 %v1544_v31, %s4808_s15  ;;  %4507 = vmatpush3.bf16.msra.mxu0 %v4506_v29 }
 0xaf9   : > { %4519 = vmatpush3.bf16.msra.mxu1 %v4506_v29  ;;  %4520 = vmatprep.subr.bf16.mxu0 %v4813_v48 }
 0xafa   : > { %4532 = vmatprep.subr.bf16.mxu1 %v4813_v48 }
 0xb6a   : > { %v1547_v35 = vpop.permute.xlu0 %1546 }
 0xb6b   : > { %v1549_v61 = vadd.f32 %v1547_v35, %v1544_v31 }
 0xb6d   : > { %1551 = vrot.lane.b32.xlu1 %v1549_v61, %s4809_s16 }
 0xbdf   : > { %v1552_v41 = vpop.permute.xlu1 %1551 }
 0xbe0   : > { %v1554_v42 = vadd.f32 %v1552_v41, %v1549_v61 }
 0xbe2   : > { %v1556_v45 = vmul.f32 0.00390625, %v1554_v42 }
 0xbe4   : > { %1558 = vrot.lane.b32.xlu0 %v1556_v45, %s4810_s17 }
 0xc56   : > { %v1559_v46 = vpop.permute.xlu0 %1558 }
 0xc57   : > { %v1561_v47 = vsel %vm899_vm0, %v1556_v45, %v1559_v46 }
 0xc58   : > { %1563 = vrot.lane.b32.xlu1 %v1561_v47, %s4811_s18 }
 0xcca   : > { %v1564_v49 = vpop.permute.xlu1 %1563 }
 0xccb   : > { %v1566_v33 = vsel %vm905_vm1, %v1561_v47, %v1564_v49 }
 0xccc   : > { %1568 = vrot.lane.b32.xlu0 %v1566_v33, %s4812_s19 }
 0xd3e   : > { %v1569_v50 = vpop.permute.xlu0 %1568 }
 0xd3f   : > { %v1571_v36 = vsel %vm911_vm2, %v1566_v33, %v1569_v50 }
 0xd40   : > { %1573 = vrot.lane.b32.xlu1 %v1571_v36, %s4806_s13 }
 0xdb2   : > { %v1574_v51 = vpop.permute.xlu1 %1573 }
 0xdb3   : > { %v1576_v53 = vsel %vm917_vm3, %v1571_v36, %v1574_v51  ;;  %v1659_v36 = vld [vmem:[%s5905_s3 + $0x8] sm:$0xff] }
 0xdb4   : > { %v5557_v39 = vrot.slane %v1576_v53, %v5279_v32  ;;  %v1660_v53 = vld [vmem:[%s5905_s3 + $0x10] sm:$0xff] }
 0xdb6   : > { %v1581_v54 = vsub.f32 %v1446_v15, %v5557_v39  ;;  %v1582_v55 = vsub.f32 %v1516_v16, %v5557_v39 }
 0xdb8   : > { %v1583_v43 = vmul.f32 %v1581_v54, %v1581_v54  ;;  %v1590_v56 = vmul.f32 %v1582_v55, %v1582_v55 }
 0xdba   : > { %v1584_v57 = vrot.slane %v1583_v43, 4  ;;  %v1591_v6 = vrot.slane %v1590_v56, 4 }
 0xdbc   : > { %v1585_v58 = vadd.f32 %v1584_v57, %v1583_v43  ;;  %v1592_v59 = vadd.f32 %v1591_v6, %v1590_v56  ;;  %v1662_v56 = vld [vmem:[%s5905_s3 + $0x20] sm:$0xff]  ;;  %v1663_v57 = vld [vmem:[%s5905_s3 + $0x28] sm:$0xff] }
 0xdbd   : > { %v4527_v6 = vpack.c.bf16 %v1663_v57, %v1662_v56 }
 0xdbe   : > { %v1586_v44 = vrot.slane %v1585_v58, 2  ;;  %v1593_v62 = vrot.slane %v1592_v59, 2 }
 0xdc0   : > { %v1587_v63 = vadd.f32 %v1586_v44, %v1585_v58  ;;  %v1594_v60 = vadd.f32 %v1593_v62, %v1592_v59  ;;  %v1664_v58 = vld [vmem:[%s5905_s3 + $0x30] sm:$0xff]  ;;  %v1665_v59 = vld [vmem:[%s5905_s3 + $0x38] sm:$0xff]  ;;  %v3483_v62 = vld [vmem:[%s5905_s3 + $0x80] sm:$0xff] }
 0xdc1   : > { %v4530_v44 = vpack.c.bf16 %v1665_v59, %v1664_v58 }
 0xdc2   : > { %v1588_v0 = vrot.slane %v1587_v63, 1  ;;  %v1595_v1 = vrot.slane %v1594_v60, 1 }
 0xdc4   : > { %v1589_v2 = vadd.f32 %v1588_v0, %v1587_v63  ;;  %v1596_v3 = vadd.f32 %v1595_v1, %v1594_v60  ;;  %v3484_v63 = vld [vmem:[%s5905_s3 + $0x88] sm:$0xff]  ;;  %v3485_v0 = vld [vmem:[%s5905_s3 + $0x90] sm:$0xff]  ;;  %v3486_v1 = vld [vmem:[%s5905_s3 + $0x98] sm:$0xff] }
 0xdc5   : > { %v4545_v60 = vpack.c.bf16 %v3484_v63, %v3483_v62 }
 0xdc6   : > { %v1597_v4 = vadd.f32 %v1596_v3, %v1589_v2  ;;  %v4548_v3 = vpack.c.bf16 %v3486_v1, %v3485_v0 }
 0xdc8   : > { %1599 = vrot.lane.b32.xlu0 %v1597_v4, %s4806_s13 }
 0xe3a   : > { %v1600_v5 = vpop.permute.xlu0 %1599 }
 0xe3b   : > { %v1602_v8 = vadd.f32 %v1600_v5, %v1597_v4  ;;  %v3487_v4 = vld [vmem:[%s5905_s3 + $0xa0] sm:$0xff]  ;;  %v3488_v5 = vld [vmem:[%s5905_s3 + $0xa8] sm:$0xff] }
 0xe3d   : > { %1604 = vrot.lane.b32.xlu1 %v1602_v8, %s4807_s14 }
 0xeaf   : > { %v1605_v9 = vpop.permute.xlu1 %1604 }
 0xeb0   : > { %v1607_v10 = vadd.f32 %v1605_v9, %v1602_v8  ;;  %v4551_v8 = vpack.c.bf16 %v3488_v5, %v3487_v4  ;;  %v3489_v9 = vld [vmem:[%s5905_s3 + $0xb0] sm:$0xff] }
 0xeb2   : > { %1609 = vrot.lane.b32.xlu0 %v1607_v10, %s4808_s15 }
 0xf24   : > { %v1610_v11 = vpop.permute.xlu0 %1609 }
 0xf25   : > { %v1612_v12 = vadd.f32 %v1610_v11, %v1607_v10  ;;  %v3490_v10 = vld [vmem:[%s5905_s3 + $0xb8] sm:$0xff] }
 0xf26   : > { %v4554_v11 = vpack.c.bf16 %v3490_v10, %v3489_v9 }
 0xf27   : > { %1614 = vrot.lane.b32.xlu1 %v1612_v12, %s4809_s16 }
 0xf99   : > { %v1615_v13 = vpop.permute.xlu1 %1614 }
 0xf9a   : > { %v1617_v14 = vadd.f32 %v1615_v13, %v1612_v12 }
 0xf9c   : > { %v1618_v15 = vmul.f32 0.00390625, %v1617_v14 }
 0xf9e   : > { %v1619_v16 = vadd.f32 1e-05, %v1618_v15 }
 0xfa0   : > { %4725 = vrsqrt.f32 %v1619_v16 }
 0xfaa   : > { %v4726_v17 = vpop.eup %4725 }
 0xfab   : > { %1628 = vrot.lane.b32.xlu0 %v4726_v17, %s4810_s17 }
 0xfaf   : > { %1623 = vrot.lane.b32.xlu0 %v5542_v21, %s4806_s13 }
0x101d   : > { %v1629_v18 = vpop.permute.xlu0 %1628 }
0x101e   : > { %v1631_v19 = vsel %vm899_vm0, %v4726_v17, %v1629_v18 }
0x101f   : > { %1633 = vrot.lane.b32.xlu1 %v1631_v19, %s4811_s18 }
0x1021   : > { %v1624_v30 = vpop.permute.xlu0 %1623 }
0x1022   : > { %v1626_v31 = vmax.f32 %v5542_v21, %v1624_v30  ;;  %v1658_v21 = vld [vmem:[%s5905_s3] sm:$0xff] }
0x1023   : > { %v4521_v51 = vpack.c.bf16 %v1659_v36, %v1658_v21 }
0x1024   : > { %v1642_v41 = vsub.f32 %v1626_v31, %v5557_v39  ;;  %v1661_v39 = vld [vmem:[%s5905_s3 + $0x18] sm:$0xff] }
0x1025   : > { %v4524_v43 = vpack.c.bf16 %v1661_v39, %v1660_v53 }
0x1091   : > { %v1634_v20 = vpop.permute.xlu1 %1633 }
0x1092   : > { %v1636_v22 = vsel %vm905_vm1, %v1631_v19, %v1634_v20 }
0x1093   : > { %1638 = vrot.lane.b32.xlu1 %v1636_v22, %s4812_s19 }
0x1105   : > { %v1639_v35 = vpop.permute.xlu1 %1638 }
0x1106   : > { %v1641_v61 = vsel %vm911_vm2, %v1636_v22, %v1639_v35 }
0x1107   : > { %v1646_v42 = vrot.slane %v1641_v61, %v5279_v32 }
0x1109   : > { %v1647_v45 = vmul.f32 %v1646_v42, %v1642_v41 }
0x110b   : > { %v1649_v46 = vmin.f32 %v1647_v45, 0.0  ;;  %vm1648_vm8 = vcmp.gt.f32.partialorder %v1647_v45, 0.0 }
0x110d   : > { %v1650_v47 = vmul.f32 1.442695, %v1649_v46 }
0x110f   : > { %4727 = vpow2.f32 %v1650_v47 }
0x1119   : > { %v4728_v49 = vpop.eup %4727 }
0x111a   : > { %v3470_v33 = vadd.f32 -1.0, %v4728_v49 }
0x111c   : > { %v1653_v50 = vsel %vm1648_vm8, %v1647_v45, %v3470_v33 }
0x111d   : > { %1657 = vst.msk [vmem:[#allocation4 + $0x1] sm:$0xff] %vm917_vm3, %v1653_v50 }
0x1124   : > { %v1668_v54 = vld [vmem:[#allocation4 + $0x1] ss:$2 sm:$0xf]  ;;  %v1679_v55 = vld [vmem:[#allocation4 + $0x2] ss:$2 sm:$0xf] }
0x1125   : > { %3955 = vmatmul.mubr.msk.f32.vlgmr.msra.gmra.mrb[6].mxu0 %vm917_vm3, %v1668_v54  ;;  %3974 = vmatmul.mubr.msk.f32.vlgmr.msra.gmra.mrb[6].mxu1 %vm917_vm3, %v1679_v55  ;;  %v1666_v2 = vld [vmem:[#allocation4] ss:$2 sm:$0xf]  ;;  %v1979_v12 = vld [vmem:[#allocation4 + $0x3] ss:$2 sm:$0xf] }
0x1126   : > { %4522 = vmatpush3.bf16.msra.mxu0 %v4521_v51  ;;  %4534 = vmatpush3.bf16.msra.mxu1 %v4521_v51 }
0x1127   : > { %4523 = vmatprep.subr.bf16.mxu0 %v4813_v48  ;;  %4535 = vmatprep.subr.bf16.mxu1 %v4813_v48 }
0x1128   : > { %3992 = vmatprep.mubr.msk.f32.mxu0 %vm4814_vm4, %v4805_v7  ;;  %4011 = vmatprep.mubr.msk.f32.mxu1 %vm4814_vm4, %v4805_v7 }
0x112a   : > { %4525 = vmatpush3.bf16.msra.mxu0 %v4524_v43  ;;  %4537 = vmatpush3.bf16.msra.mxu1 %v4524_v43 }
0x112b   : > { %4526 = vmatprep.subr.bf16.mxu0 %v4813_v48  ;;  %4538 = vmatprep.subr.bf16.mxu1 %v4813_v48 }
0x112e   : > { %4528 = vmatpush3.bf16.msra.mxu0 %v4527_v6  ;;  %4540 = vmatpush3.bf16.msra.mxu1 %v4527_v6 }
0x112f   : > { %4529 = vmatprep.subr.bf16.mxu0 %v4813_v48  ;;  %4541 = vmatprep.subr.bf16.mxu1 %v4813_v48 }
0x1132   : > { %4531 = vmatpush3.bf16.msra.mxu0 %v4530_v44  ;;  %4543 = vmatpush3.bf16.msra.mxu1 %v4530_v44 }
0x1133   : > { %4544 = vmatprep.subr.bf16.mxu0 %v4813_v48  ;;  %4556 = vmatprep.subr.bf16.mxu1 %v4813_v48 }
0x1135   : > { %3993 = vmatmul.mubr.msk.f32.vlgmr.msra.gmra.mrb[6].mxu0 %vm917_vm3, %v1666_v2  ;;  %4012 = vmatmul.mubr.msk.f32.vlgmr.msra.gmra.mrb[6].mxu1 %vm917_vm3, %v1668_v54 }
0x1136   : > { %4546 = vmatpush3.bf16.msra.mxu0 %v4545_v60  ;;  %4558 = vmatpush3.bf16.msra.mxu1 %v4545_v60 }
0x1137   : > { %4547 = vmatprep.subr.bf16.mxu0 %v4813_v48  ;;  %4559 = vmatprep.subr.bf16.mxu1 %v4813_v48 }
0x1138   : > { %4030 = vmatprep.mubr.msk.f32.mxu0 %vm4814_vm4, %v4805_v7  ;;  %4049 = vmatprep.mubr.msk.f32.mxu1 %vm4814_vm4, %v4805_v7 }
0x113a   : > { %4549 = vmatpush3.bf16.msra.mxu0 %v4548_v3  ;;  %4561 = vmatpush3.bf16.msra.mxu1 %v4548_v3 }
0x113b   : > { %4550 = vmatprep.subr.bf16.mxu0 %v4813_v48  ;;  %4562 = vmatprep.subr.bf16.mxu1 %v4813_v48 }
0x113e   : > { %4552 = vmatpush3.bf16.msra.mxu0 %v4551_v8  ;;  %4564 = vmatpush3.bf16.msra.mxu1 %v4551_v8 }
0x113f   : > { %4553 = vmatprep.subr.bf16.mxu0 %v4813_v48  ;;  %4565 = vmatprep.subr.bf16.mxu1 %v4813_v48 }
0x1142   : > { %4555 = vmatpush3.bf16.msra.mxu0 %v4554_v11  ;;  %4567 = vmatpush3.bf16.msra.mxu1 %v4554_v11 }
0x1143   : > { %4568 = vmatprep.subr.bf16.mxu0 %v4813_v48  ;;  %4574 = vmatprep.subr.bf16.mxu1 %v4813_v48 }
0x1145   : > { %4031 = vmatmul.mubr.msk.f32.vlgmr.msra.gmra.mrb[6].mxu0 %vm917_vm3, %v1679_v55  ;;  %4050 = vmatmul.mubr.msk.f32.vlgmr.msra.gmra.mrb[6].mxu1 %vm917_vm3, %v1979_v12 }
0x1146   : > { %4060 = vmatprep.mubr.msk.f32.mxu0 %vm4814_vm4, %v4805_v7  ;;  %4071 = vmatprep.mubr.msk.f32.mxu1 %vm4814_vm4, %v4805_v7 }
0x1218   : > { %v2046_v13 = vpop.f32.mrb[6].mxu0  ;;  %v2119_v14 = vpop.f32.mrb[6].mxu1 }
0x1219   : > { %v2126_v15 = vsel %vm2125_vm9, %v2046_v13, 0.0  ;;  %v2133_v16 = vsel %vm2125_vm9, %v2119_v14, 0.0  ;;  %v5695_v17 = vmax.f32 %v2046_v13, %v2119_v14  ;;  %v4032_v18 = vpop.f32.mrb[7].mxu0  ;;  %v4051_v19 = vpop.f32.mrb[7].mxu1 }
0x121a   : > { %v2127_v20 = vrot.slane %v2126_v15, 4  ;;  %v2134_v22 = vrot.slane %v2133_v16, 4  ;;  %v3495_v18 = vld [vmem:[%s5906_s4 + $0x28] sm:$0xff] }
0x121c   : > { %v2128_v23 = vadd.f32 %v2127_v20, %v2126_v15  ;;  %v2135_v38 = vadd.f32 %v2134_v22, %v2133_v16  ;;  %v3494_v16 = vld [vmem:[%s5906_s4 + $0x20] sm:$0xff]  ;;  %v3496_v20 = vld [vmem:[%s5906_s4 + $0x30] sm:$0xff]  ;;  %v3497_v22 = vld [vmem:[%s5906_s4 + $0x38] sm:$0xff] }
0x121d   : > { %v4569_v19 = vpack.c.bf16 %v3495_v18, %v3494_v16 }
0x121e   : > { %v2129_v52 = vrot.slane %v2128_v23, 2  ;;  %v2136_v40 = vrot.slane %v2135_v38, 2 }
0x121f   : > { %4570 = vmatpush3.bf16.msra.mxu0 %v4569_v19  ;;  %4576 = vmatpush3.bf16.msra.mxu1 %v4569_v19 }
0x1220   : > { %v2130_v34 = vadd.f32 %v2129_v52, %v2128_v23  ;;  %v2137_v37 = vadd.f32 %v2136_v40, %v2135_v38  ;;  %v4572_v23 = vpack.c.bf16 %v3497_v22, %v3496_v20  ;;  %4571 = vmatprep.subr.bf16.mxu0 %v4813_v48  ;;  %4577 = vmatprep.subr.bf16.mxu1 %v4813_v48 }
0x1222   : > { %v2131_v24 = vrot.slane %v2130_v34, 1  ;;  %v2138_v25 = vrot.slane %v2137_v37, 1 }
0x1223   : > { %4573 = vmatpush3.bf16.msra.mxu0 %v4572_v23  ;;  %4579 = vmatpush3.bf16.msra.mxu1 %v4572_v23 }
0x1224   : > { %v2132_v26 = vadd.f32 %v2131_v24, %v2130_v34  ;;  %v2139_v27 = vadd.f32 %v2138_v25, %v2137_v37  ;;  %4580 = vmatprep.subr.bf16.mxu0 %v4813_v48  ;;  %4586 = vmatprep.subr.bf16.mxu1 %v4813_v48 }
0x1226   : > { %v2140_v28 = vadd.f32 %v2139_v27, %v2132_v26 }
0x1228   : > { %2142 = vrot.lane.b32.xlu0 %v2140_v28, %s4807_s14 }
0x129a   : > { %v2143_v29 = vpop.permute.xlu0 %2142 }
0x129b   : > { %v2145_v30 = vadd.f32 %v2143_v29, %v2140_v28 }
0x129d   : > { %2147 = vrot.lane.b32.xlu1 %v2145_v30, %s4808_s15 }
0x130f   : > { %v2148_v31 = vpop.permute.xlu1 %2147 }
0x1310   : > { %v2150_v35 = vadd.f32 %v2148_v31, %v2145_v30  ;;  %v2248_v31 = vld [vmem:[%s5906_s4 + $0x8] sm:$0xff] }
0x1312   : > { %2152 = vrot.lane.b32.xlu0 %v2150_v35, %s4809_s16 }
0x1384   : > { %v2153_v61 = vpop.permute.xlu0 %2152 }
0x1385   : > { %v2155_v41 = vadd.f32 %v2153_v61, %v2150_v35  ;;  %v2249_v61 = vld [vmem:[%s5906_s4 + $0x10] sm:$0xff] }
0x1387   : > { %v2157_v42 = vmul.f32 0.015625, %v2155_v41  ;;  %v2250_v41 = vld [vmem:[%s5906_s4 + $0x18] sm:$0xff] }
0x1389   : > { %2159 = vrot.lane.b32.xlu1 %v2157_v42, %s4810_s17 }
0x13fb   : > { %v2160_v45 = vpop.permute.xlu1 %2159 }
0x13fc   : > { %v2162_v46 = vsel %vm899_vm0, %v2157_v42, %v2160_v45 }
0x13fd   : > { %2164 = vrot.lane.b32.xlu0 %v2162_v46, %s4811_s18 }
0x146f   : > { %v2165_v47 = vpop.permute.xlu0 %2164 }
0x1470   : > { %v2167_v49 = vsel %vm905_vm1, %v2162_v46, %v2165_v47  ;;  %v4584_v46 = vpack.c.bf16 %v2250_v41, %v2249_v61  ;;  %v3502_v47 = vld [vmem:[%s5906_s4 + $0x40] sm:$0xff] }
0x1471   : > { %2169 = vrot.lane.b32.xlu1 %v2167_v49, %s4812_s19 }
0x14e3   : > { %v2170_v33 = vpop.permute.xlu1 %2169 }
0x14e4   : > { %v2172_v50 = vsel %vm911_vm2, %v2167_v49, %v2170_v33  ;;  %v3503_v49 = vld [vmem:[%s5906_s4 + $0x48] sm:$0xff] }
0x14e5   : > { %v2176_v21 = vrot.slane %v2172_v50, %v5279_v32  ;;  %v4593_v33 = vpack.c.bf16 %v3503_v49, %v3502_v47  ;;  %v3504_v50 = vld [vmem:[%s5906_s4 + $0x50] sm:$0xff] }
0x14e7   : > { %v2177_v36 = vsub.f32 %v2046_v13, %v2176_v21  ;;  %v2178_v51 = vsub.f32 %v2119_v14, %v2176_v21 }
0x14e9   : > { %v2179_v53 = vmul.f32 %v2177_v36, %v2177_v36  ;;  %v2187_v39 = vmul.f32 %v2178_v51, %v2178_v51 }
0x14eb   : > { %v2180_v54 = vsel %vm2125_vm9, %v2179_v53, 0.0  ;;  %v2188_v55 = vsel %vm2125_vm9, %v2187_v39, 0.0 }
0x14ec   : > { %v2181_v43 = vrot.slane %v2180_v54, 4  ;;  %v2189_v56 = vrot.slane %v2188_v55, 4 }
0x14ee   : > { %v2182_v57 = vadd.f32 %v2181_v43, %v2180_v54  ;;  %v2190_v6 = vadd.f32 %v2189_v56, %v2188_v55 }
0x14f0   : > { %v2183_v58 = vrot.slane %v2182_v57, 2  ;;  %v2191_v59 = vrot.slane %v2190_v6, 2 }
0x14f2   : > { %v2184_v44 = vadd.f32 %v2183_v58, %v2182_v57  ;;  %v2192_v62 = vadd.f32 %v2191_v59, %v2190_v6 }
0x14f4   : > { %v2185_v63 = vrot.slane %v2184_v44, 1  ;;  %v2193_v60 = vrot.slane %v2192_v62, 1 }
0x14f6   : > { %v2186_v0 = vadd.f32 %v2185_v63, %v2184_v44  ;;  %v2194_v1 = vadd.f32 %v2193_v60, %v2192_v62 }
0x14f8   : > { %v2195_v2 = vadd.f32 %v2194_v1, %v2186_v0 }
0x14fa   : > { %2197 = vrot.lane.b32.xlu0 %v2195_v2, %s4807_s14 }
0x156c   : > { %v2198_v3 = vpop.permute.xlu0 %2197 }
0x156d   : > { %v2200_v4 = vadd.f32 %v2198_v3, %v2195_v2 }
0x156f   : > { %2202 = vrot.lane.b32.xlu1 %v2200_v4, %s4808_s15 }
0x15e1   : > { %v2203_v5 = vpop.permute.xlu1 %2202 }
0x15e2   : > { %v2205_v8 = vadd.f32 %v2203_v5, %v2200_v4 }
0x15e4   : > { %2207 = vrot.lane.b32.xlu0 %v2205_v8, %s4809_s16 }
0x15e8   : > { %2216 = vrot.lane.b32.xlu0 %v5695_v17, %s4807_s14 }
0x1656   : > { %v2208_v9 = vpop.permute.xlu0 %2207 }
0x1657   : > { %v2210_v10 = vadd.f32 %v2208_v9, %v2205_v8 }
0x1659   : > { %v2211_v11 = vmul.f32 0.015625, %v2210_v10 }
0x165a   : > { %v2217_v38 = vpop.permute.xlu0 %2216 }
0x165b   : > { %v2212_v12 = vadd.f32 1e-05, %v2211_v11  ;;  %v2219_v52 = vmax.f32 %v5695_v17, %v2217_v38  ;;  %v2247_v17 = vld [vmem:[%s5906_s4] sm:$0xff] }
0x165c   : > { %v4581_v35 = vpack.c.bf16 %v2248_v31, %v2247_v17 }
0x165d   : > { %4729 = vrsqrt.f32 %v2212_v12  ;;  %v2230_v37 = vsub.f32 %v2219_v52, %v2176_v21  ;;  %v3505_v21 = vld [vmem:[%s5906_s4 + $0x58] sm:$0xff] }
0x165e   : > { %v4596_v51 = vpack.c.bf16 %v3505_v21, %v3504_v50  ;;  %v3509_v50 = vld [vmem:[%s5907_s5 + $0x10] sm:$0xff]  ;;  %v3510_v21 = vld [vmem:[%s5907_s5 + $0x18] sm:$0xff] }
0x1667   : > { %v4730_v13 = vpop.eup %4729 }
0x1668   : > { %2221 = vrot.lane.b32.xlu1 %v4730_v13, %s4810_s17 }
0x16da   : > { %v2222_v14 = vpop.permute.xlu1 %2221 }
0x16db   : > { %v2224_v15 = vsel %vm899_vm0, %v4730_v13, %v2222_v14 }
0x16dc   : > { %2226 = vrot.lane.b32.xlu1 %v2224_v15, %s4811_s18 }
0x174e   : > { %v2227_v40 = vpop.permute.xlu1 %2226 }
0x174f   : > { %v2229_v34 = vsel %vm905_vm1, %v2224_v15, %v2227_v40 }
0x1750   : > { %v2234_v24 = vrot.slane %v2229_v34, %v5279_v32 }
0x1752   : > { %v2235_v25 = vmul.f32 %v2234_v24, %v2230_v37 }
0x1754   : > { %v2237_v26 = vmin.f32 %v2235_v25, 0.0  ;;  %vm2236_vm12 = vcmp.gt.f32.partialorder %v2235_v25, 0.0 }
0x1756   : > { %v2238_v27 = vmul.f32 1.442695, %v2237_v26 }
0x1758   : > { %4731 = vpow2.f32 %v2238_v27 }
0x1762   : > { %v4732_v28 = vpop.eup %4731 }
0x1763   : > { %v3493_v29 = vadd.f32 -1.0, %v4732_v28 }
0x1765   : > { %v2241_v30 = vsel %vm2236_vm12, %v2235_v25, %v3493_v29 }
0x1766   : > { %2246 = vst.msk [vmem:[#allocation5 + $0x1] sm:$0xf] %vm2245_vm11, %v2241_v30 }
0x176d   : > { %v2253_v42 = vld [vmem:[#allocation5 + $0x1] ss:$2 sm:$0x3]  ;;  %v2260_v45 = vld [vmem:[#allocation5 + $0x2] ss:$2 sm:$0x3] }
0x176e   : > { %4061 = vmatmul.mubr.msk.f32.vlgmr.msra.gmra.mrb[8].mxu0 %vm911_vm2, %v2253_v42  ;;  %4072 = vmatmul.mubr.msk.f32.vlgmr.msra.gmra.mrb[8].mxu1 %vm911_vm2, %v2260_v45  ;;  %v2251_v36 = vld [vmem:[#allocation5] ss:$2 sm:$0x3]  ;;  %v2556_v53 = vld [vmem:[#allocation5 + $0x3] ss:$2 sm:$0x3] }
0x176f   : > { %4582 = vmatpush3.bf16.msra.mxu0 %v4581_v35  ;;  %4588 = vmatpush3.bf16.msra.mxu1 %v4581_v35 }
0x1770   : > { %4583 = vmatprep.subr.bf16.mxu0 %v4813_v48  ;;  %4589 = vmatprep.subr.bf16.mxu1 %v4813_v48 }
0x1771   : > { %4082 = vmatprep.mubr.msk.f32.mxu0 %vm4814_vm4, %v4805_v7  ;;  %4093 = vmatprep.mubr.msk.f32.mxu1 %vm4814_vm4, %v4805_v7 }
0x1773   : > { %4585 = vmatpush3.bf16.msra.mxu0 %v4584_v46  ;;  %4591 = vmatpush3.bf16.msra.mxu1 %v4584_v46 }
0x1774   : > { %4592 = vmatprep.subr.bf16.mxu0 %v4813_v48  ;;  %4598 = vmatprep.subr.bf16.mxu1 %v4813_v48 }
0x1776   : > { %4083 = vmatmul.mubr.msk.f32.vlgmr.msra.gmra.mrb[8].mxu0 %vm911_vm2, %v2251_v36  ;;  %4094 = vmatmul.mubr.msk.f32.vlgmr.msra.gmra.mrb[8].mxu1 %vm911_vm2, %v2253_v42  ;;  %v4605_v36 = vpack.c.bf16 %v3510_v21, %v3509_v50 }
0x1777   : > { %4594 = vmatpush3.bf16.msra.mxu0 %v4593_v33  ;;  %4600 = vmatpush3.bf16.msra.mxu1 %v4593_v33 }
0x1778   : > { %4595 = vmatprep.subr.bf16.mxu0 %v4813_v48  ;;  %4601 = vmatprep.subr.bf16.mxu1 %v4813_v48 }
0x1779   : > { %4104 = vmatprep.mubr.msk.f32.mxu0 %vm4814_vm4, %v4805_v7  ;;  %4115 = vmatprep.mubr.msk.f32.mxu1 %vm4814_vm4, %v4805_v7 }
0x177b   : > { %4597 = vmatpush3.bf16.msra.mxu0 %v4596_v51  ;;  %4603 = vmatpush3.bf16.msra.mxu1 %v4596_v51 }
0x177c   : > { %4604 = vmatprep.subr.bf16.mxu0 %v4813_v48  ;;  %4607 = vmatprep.subr.bf16.mxu1 %v4813_v48 }
0x177e   : > { %4105 = vmatmul.mubr.msk.f32.vlgmr.msra.gmra.mrb[8].mxu0 %vm911_vm2, %v2260_v45  ;;  %4116 = vmatmul.mubr.msk.f32.vlgmr.msra.gmra.mrb[8].mxu1 %vm911_vm2, %v2556_v53 }
0x177f   : > { %4122 = vmatprep.mubr.msk.f32.mxu0 %vm4814_vm4, %v4805_v7  ;;  %4129 = vmatprep.mubr.msk.f32.mxu1 %vm4814_vm4, %v4805_v7 }
0x1780   : > { %4606 = vmatpush3.bf16.msra.mxu0 %v4605_v36  ;;  %4609 = vmatpush3.bf16.msra.mxu1 %v4605_v36 }
0x1781   : > { %4610 = vmatprep.subr.bf16.mxu0 %v4813_v48  ;;  %4613 = vmatprep.subr.bf16.mxu1 %v4813_v48 }
0x1851   : > { %v2623_v39 = vpop.f32.mrb[8].mxu0  ;;  %v2696_v54 = vpop.f32.mrb[8].mxu1 }
0x1852   : > { %v2703_v55 = vsel %vm2702_vm13, %v2623_v39, 0.0  ;;  %v2710_v43 = vsel %vm2702_vm13, %v2696_v54, 0.0  ;;  %v5790_v56 = vmax.f32 %v2623_v39, %v2696_v54  ;;  %v4106_v57 = vpop.f32.mrb[9].mxu0  ;;  %v4117_v6 = vpop.f32.mrb[9].mxu1 }
0x1853   : > { %v2704_v58 = vrot.slane %v2703_v55, 4  ;;  %v2711_v59 = vrot.slane %v2710_v43, 4 }
0x1855   : > { %v2705_v44 = vadd.f32 %v2704_v58, %v2703_v55  ;;  %v2712_v62 = vadd.f32 %v2711_v59, %v2710_v43 }
0x1857   : > { %v2706_v63 = vrot.slane %v2705_v44, 2  ;;  %v2713_v60 = vrot.slane %v2712_v62, 2 }
0x1859   : > { %v2707_v0 = vadd.f32 %v2706_v63, %v2705_v44  ;;  %v2714_v1 = vadd.f32 %v2713_v60, %v2712_v62  ;;  %v2805_v63 = vld [vmem:[%s5907_s5 + $0x8] sm:$0xff] }
0x185b   : > { %v2708_v2 = vrot.slane %v2707_v0, 1  ;;  %v2715_v3 = vrot.slane %v2714_v1, 1 }
0x185d   : > { %v2709_v4 = vadd.f32 %v2708_v2, %v2707_v0  ;;  %v2716_v5 = vadd.f32 %v2715_v3, %v2714_v1  ;;  %v3515_v1 = vld [vmem:[%s5907_s5 + $0x20] sm:$0xff]  ;;  %v3516_v2 = vld [vmem:[%s5907_s5 + $0x28] sm:$0xff]  ;;  %v2806_v3 = vld [vmem:[#allocation6] ss:$2 sm:$0x1] }
0x185f   : > { %v2717_v8 = vadd.f32 %v2716_v5, %v2709_v4  ;;  %v4617_v4 = vpack.c.bf16 %v3516_v2, %v3515_v1  ;;  %v3107_v5 = vld [vmem:[#allocation6 + $0x3] ss:$2 sm:$0x1] }
0x1861   : > { %2719 = vrot.lane.b32.xlu0 %v2717_v8, %s4808_s15 }
0x18d3   : > { %v2720_v9 = vpop.permute.xlu0 %2719 }
0x18d4   : > { %v2722_v10 = vadd.f32 %v2720_v9, %v2717_v8 }
0x18d6   : > { %2724 = vrot.lane.b32.xlu1 %v2722_v10, %s4809_s16 }
0x1948   : > { %v2725_v11 = vpop.permute.xlu1 %2724 }
0x1949   : > { %v2727_v12 = vadd.f32 %v2725_v11, %v2722_v10 }
0x194b   : > { %v2729_v13 = vmul.f32 0.0625, %v2727_v12 }
0x194d   : > { %2731 = vrot.lane.b32.xlu0 %v2729_v13, %s4810_s17 }
0x19bf   : > { %v2732_v14 = vpop.permute.xlu0 %2731 }
0x19c0   : > { %v2734_v15 = vsel %vm899_vm0, %v2729_v13, %v2732_v14 }
0x19c1   : > { %2736 = vrot.lane.b32.xlu1 %v2734_v15, %s4811_s18 }
0x1a33   : > { %v2737_v16 = vpop.permute.xlu1 %2736 }
0x1a34   : > { %v2739_v18 = vsel %vm905_vm1, %v2734_v15, %v2737_v16 }
0x1a35   : > { %v2743_v19 = vrot.slane %v2739_v18, %v5279_v32 }
0x1a37   : > { %v2744_v20 = vsub.f32 %v2623_v39, %v2743_v19  ;;  %v2745_v22 = vsub.f32 %v2696_v54, %v2743_v19 }
0x1a39   : > { %v2746_v23 = vmul.f32 %v2744_v20, %v2744_v20  ;;  %v2754_v38 = vmul.f32 %v2745_v22, %v2745_v22 }
0x1a3b   : > { %v2747_v52 = vsel %vm2702_vm13, %v2746_v23, 0.0  ;;  %v2755_v40 = vsel %vm2702_vm13, %v2754_v38, 0.0 }
0x1a3c   : > { %v2748_v34 = vrot.slane %v2747_v52, 4  ;;  %v2756_v37 = vrot.slane %v2755_v40, 4 }
0x1a3e   : > { %v2749_v24 = vadd.f32 %v2748_v34, %v2747_v52  ;;  %v2757_v25 = vadd.f32 %v2756_v37, %v2755_v40 }
0x1a40   : > { %v2750_v26 = vrot.slane %v2749_v24, 2  ;;  %v2758_v27 = vrot.slane %v2757_v25, 2 }
0x1a42   : > { %v2751_v28 = vadd.f32 %v2750_v26, %v2749_v24  ;;  %v2759_v29 = vadd.f32 %v2758_v27, %v2757_v25 }
0x1a44   : > { %v2752_v30 = vrot.slane %v2751_v28, 1  ;;  %v2760_v17 = vrot.slane %v2759_v29, 1 }
0x1a46   : > { %v2753_v31 = vadd.f32 %v2752_v30, %v2751_v28  ;;  %v2761_v35 = vadd.f32 %v2760_v17, %v2759_v29 }
0x1a48   : > { %v2762_v61 = vadd.f32 %v2761_v35, %v2753_v31 }
0x1a4a   : > { %2764 = vrot.lane.b32.xlu0 %v2762_v61, %s4808_s15 }
0x1a4e   : > { %2778 = vrot.lane.b32.xlu0 %v5790_v56, %s4808_s15 }
0x1abc   : > { %v2765_v41 = vpop.permute.xlu0 %2764 }
0x1abd   : > { %v2767_v42 = vadd.f32 %v2765_v41, %v2762_v61 }
0x1abf   : > { %2769 = vrot.lane.b32.xlu1 %v2767_v42, %s4809_s16 }
0x1ac0   : > { %v2779_v51 = vpop.permute.xlu0 %2778 }
0x1ac1   : > { %v2781_v53 = vmax.f32 %v5790_v56, %v2779_v51  ;;  %v2804_v56 = vld [vmem:[%s5907_s5] sm:$0xff] }
0x1ac2   : > { %v4611_v60 = vpack.c.bf16 %v2805_v63, %v2804_v56 }
0x1ac3   : > { %v2787_v55 = vsub.f32 %v2781_v53, %v2743_v19 }
0x1b31   : > { %v2770_v45 = vpop.permute.xlu1 %2769 }
0x1b32   : > { %v2772_v46 = vadd.f32 %v2770_v45, %v2767_v42 }
0x1b34   : > { %v2773_v47 = vmul.f32 0.0625, %v2772_v46 }
0x1b36   : > { %v2774_v49 = vadd.f32 1e-05, %v2773_v47 }
0x1b38   : > { %4733 = vrsqrt.f32 %v2774_v49 }
0x1b42   : > { %v4734_v33 = vpop.eup %4733 }
0x1b43   : > { %2783 = vrot.lane.b32.xlu1 %v4734_v33, %s4810_s17  ;;  %s4815_s17 = smov [#allocation7]  }
0x1b44   : > { %s4745_s10 = sshll.u32 %s4815_s17, 4  ;;  %s4746_s10 = int_to_ptr.vmem [resolvable:$false] %s4745_s10 }
0x1b45   : > { %s4747_s12 = scalar_lea.vmem %s4746_s10, 32 }
0x1bb5   : > { %v2784_v39 = vpop.permute.xlu1 %2783 }
0x1bb6   : > { %v2786_v54 = vsel %vm899_vm0, %v4734_v33, %v2784_v39 }
0x1bb7   : > { %v2791_v43 = vrot.slane %v2786_v54, %v5279_v32 }
0x1bb9   : > { %v2792_v57 = vmul.f32 %v2791_v43, %v2787_v55 }
0x1bbb   : > { %v2794_v6 = vmin.f32 %v2792_v57, 0.0  ;;  %vm2793_vm2 = vcmp.gt.f32.partialorder %v2792_v57, 0.0 }
0x1bbd   : > { %v2795_v58 = vmul.f32 1.442695, %v2794_v6 }
0x1bbf   : > { %4735 = vpow2.f32 %v2795_v58 }
0x1bc9   : > { %v4736_v59 = vpop.eup %4735 }
0x1bca   : > { %v3508_v44 = vadd.f32 -1.0, %v4736_v59 }
0x1bcc   : > { %v2798_v62 = vsel %vm2793_vm2, %v2792_v57, %v3508_v44 }
0x1bcd   : > { %2803 = vst.msk [vmem:[#allocation6 + $0x1] sm:$0x3] %vm2802_vm15, %v2798_v62 }
0x1bd4   : > { %v2808_v32 = vld [vmem:[#allocation6 + $0x1] ss:$2 sm:$0x1]  ;;  %v2813_v0 = vld [vmem:[#allocation6 + $0x2] ss:$2 sm:$0x1] }
0x1bd5   : > { %4123 = vmatmul.mubr.msk.f32.vlgmr.msra.gmra.mrb[10].mxu0 %vm905_vm1, %v2808_v32  ;;  %4130 = vmatmul.mubr.msk.f32.vlgmr.msra.gmra.mrb[10].mxu1 %vm905_vm1, %v2813_v0 }
0x1bd6   : > { %4612 = vmatpush3.bf16.msra.mxu0 %v4611_v60  ;;  %4615 = vmatpush3.bf16.msra.mxu1 %v4611_v60 }
0x1bd7   : > { %4136 = vmatprep.mubr.msk.f32.mxu0 %vm4814_vm4, %v4805_v7  ;;  %4143 = vmatprep.mubr.msk.f32.mxu1 %vm4814_vm4, %v4805_v7 }
0x1bd8   : > { %4616 = vmatprep.subr.bf16.mxu0 %v4813_v48  ;;  %4619 = vmatprep.subr.bf16.mxu1 %v4813_v48 }
0x1bdd   : > { %4137 = vmatmul.mubr.msk.f32.vlgmr.msra.gmra.mrb[10].mxu0 %vm905_vm1, %v2806_v3  ;;  %4144 = vmatmul.mubr.msk.f32.vlgmr.msra.gmra.mrb[10].mxu1 %vm905_vm1, %v2808_v32 }
0x1bde   : > { %4618 = vmatpush3.bf16.msra.mxu0 %v4617_v4  ;;  %4621 = vmatpush3.bf16.msra.mxu1 %v4617_v4 }
0x1bdf   : > { %4150 = vmatprep.mubr.msk.f32.mxu0 %vm4814_vm4, %v4805_v7  ;;  %4157 = vmatprep.mubr.msk.f32.mxu1 %vm4814_vm4, %v4805_v7 }
0x1be5   : > { %4151 = vmatmul.mubr.msk.f32.vlgmr.msra.gmra.mrb[10].mxu0 %vm905_vm1, %v2813_v0  ;;  %4158 = vmatmul.mubr.msk.f32.vlgmr.msra.gmra.mrb[10].mxu1 %vm905_vm1, %v3107_v5 }
0x1cb8   : > { %v3174_v48 = vpop.f32.mrb[10].mxu0  ;;  %v3247_v8 = vpop.f32.mrb[10].mxu1 }
0x1cb9   : > { %v3255_v9 = vadd.f32 %v3247_v8, %v3174_v48  ;;  %v3283_v10 = vmax.f32 %v3174_v48, %v3247_v8  ;;  %v4152_v11 = vpop.f32.mrb[11].mxu0  ;;  %v4159_v12 = vpop.f32.mrb[11].mxu1 }
0x1cbb   : > { %3257 = vrot.lane.b32.xlu0 %v3255_v9, %s4808_s15 }
0x1d2d   : > { %v3258_v13 = vpop.permute.xlu0 %3257 }
0x1d2e   : > { %v3260_v14 = vadd.f32 %v3258_v13, %v3255_v9 }
0x1d30   : > { %v3262_v15 = vmul.f32 0.25, %v3260_v14 }
0x1d32   : > { %3264 = vrot.lane.b32.xlu1 %v3262_v15, %s4811_s18  ;;  %s242_s18 = sand.u32 1, %s4795_s22  }
0x1d33   : > { %s243_s13 = scalar_lea.vmem [#allocation7], %s242_s18  ;;  %s3299_s16 = scalar_lea.sflag [#allocation8], %s242_s18 }
0x1d34   : > { %s3311_s29 = sshll.u32 %s243_s13, 4  ;;  %s5861_s29 = int_to_ptr.vmem [resolvable:$true] %s3311_s29 }
0x1d35   : > { %s4741_s25 = scalar_lea.vmem %s5861_s29, 16  ;;  %p4748_p0 = scmp.lt.s32.totalorder %s5861_s29, %s4746_s10 }
0x1d36   : > { %3285 = vrot.lane.b32.xlu1 %v3283_v10, %s4808_s15  ;;  %p4742_p11 = scmp.ne.s32.totalorder %s5861_s29, %s4741_s25  ;;  %p4749_p1 = scmp.lt.s32.totalorder %s4747_s12, %s4741_s25 }
0x1d38   : > { %p4743_p12 = pnand %p4742_p11, %p4889_p5  ;;  %p4750_p2 = por %p4749_p1, %p4748_p0 }
0x1d3a   : > { %p4744_p13 = pneg %p4743_p12 }
0x1d3c   : > { %p4751_p3 = pnand %p4750_p2, %p4744_p13 }
0x1da4   : > { %v3265_v7 = vpop.permute.xlu1 %3264 }
0x1da5   : > { %v3267_v16 = vsel %vm905_vm1, %v3262_v15, %v3265_v7 }
0x1da6   : > { %v3268_v18 = vsub.f32 %v3174_v48, %v3267_v16  ;;  %v3269_v19 = vsub.f32 %v3247_v8, %v3267_v16 }
0x1da8   : > { %v3270_v20 = vmul.f32 %v3268_v18, %v3268_v18  ;;  %v3272_v22 = vmul.f32 %v3269_v19, %v3269_v19  ;;  %v3286_v37 = vpop.permute.xlu1 %3285 }
0x1da9   : > { %v3288_v24 = vmax.f32 %v3283_v10, %v3286_v37 }
0x1daa   : > { %v3274_v23 = vadd.f32 %v3272_v22, %v3270_v20 }
0x1dab   : > { %v3289_v25 = vsub.f32 %v3288_v24, %v3267_v16 }
0x1dac   : > { %3276 = vrot.lane.b32.xlu0 %v3274_v23, %s4808_s15 }
0x1e1e   : > { %v3277_v38 = vpop.permute.xlu0 %3276 }
0x1e1f   : > { %v3279_v52 = vadd.f32 %v3277_v38, %v3274_v23 }
0x1e21   : > { %v3280_v40 = vmul.f32 0.25, %v3279_v52 }
0x1e23   : > { %v3281_v34 = vadd.f32 1e-05, %v3280_v40 }
0x1e25   : > { %4737 = vrsqrt.f32 %v3281_v34 }
0x1e2f   : > { %v4738_v26 = vpop.eup %4737 }
0x1e30   : > { %v3290_v27 = vmul.f32 %v4738_v26, %v3289_v25 }
0x1e32   : > { %v3292_v28 = vmin.f32 %v3290_v27, 0.0  ;;  %vm3291_vm0 = vcmp.gt.f32.partialorder %v3290_v27, 0.0 }
0x1e34   : > { %v3293_v29 = vmul.f32 1.442695, %v3292_v28 }
0x1e36   : > { %4739 = vpow2.f32 %v3293_v29 }
0x1e40   : > { %v4740_v30 = vpop.eup %4739 }
0x1e41   : > { %v3519_v17 = vadd.f32 -1.0, %v4740_v30 }
0x1e43   : > { %v3296_v31 = vsel %vm3291_vm0, %v3290_v27, %v3519_v17 }
0x1e44   : > { %3297 = vst.msk [vmem:[%s243_s13] sm:$0x1] %vm2799_vm14, %v3296_v31 }
0x1e45   : > { %4754 = shalt.err (!%p4751_p3)
}
0x1e46   : > { %s4755_s20 = scalar_lea.hbm %s5859_s9, 16  ;;  %s4759_s19 = scalar_lea.hbm %s5908_s6, 32 }
0x1e47   : > { %p4756_p4 = scmp.ne.s32.totalorder %s5859_s9, %s4755_s20  ;;  %p4760_p9 = scmp.lt.u32.totalorder %s5859_s9, %s5908_s6 }
0x1e48   : > { %p4761_p10 = scmp.lt.u32.totalorder %s4759_s19, %s4755_s20  ;;  %p4763_p12 = scmp.lt.u32.totalorder %s4755_s20, %s5859_s9 }
0x1e49   : > { %p4757_p7 = pnand %p4756_p4, %p4889_p5 }
0x1e4a   : > { %p4762_p11 = por %p4761_p10, %p4760_p9 }
0x1e4b   : > { %p4758_p8 = pneg %p4757_p7 }
0x1e4c   : > { %p4764_p13 = por %p4763_p12, %p4762_p11 }
0x1e4e   : > { %p4765_p0 = pnand %p4764_p13, %p4758_p8 }
0x1e50   : > { %4768 = shalt.err (!%p4765_p0)
}
0x1e51   : > { %4670 = dma.vmem_to_hbm [thread:$0]  (%p4889_p5), %s5861_s29, 16, %s5859_s9, %s3299_s16  }
0x1e52 PF: > { %p4676_p1 = scmp.ge.s32.totalorder %s4803_s24, 2  ;;  %s3323_s13 = sand.u32 1, %s4791_s21  }
0x1e53   : > { %s3324_s15 = scalar_lea.sflag [#allocation8], %s3323_s13 }
0x1e54   : > { %p4673_p2 = pnand %p4676_p1, %p4893_p6 }
0x1e56   : > { %4786 = dma.done.wait (!%p4673_p2), %s3324_s15, 16  }
0x1e57   : > { %4788 = vsyncadd (!%p4673_p2), %s3324_s15, 4294967280  ;;  %p16_p3 = scmp.ge.s32.totalorder %s4876_s27, 4   ;;  %s5911_s21 = smov %s4795_s22 }
0x1e58   : > { %s5912_s22 = smov %s4799_s23  ;;  %s5913_s23 = smov %s4887_s30 }
0x1e59   : > { %s5914_s24 = smov %s4876_s27  ;;  %18 = sbr.rel (!%p16_p3) target bundleno = 3 (0x3), region = 108 }
0x1e60   :  { %3328 = vsyncpa [#allocation8], 1 }
0x1e61   :  { %3330 = vsyncpa [#allocation8 + $0x1], 1 }

</bundles_post_ra>
